<compile_context>
chip_gen: v7x
topology: tpu7x:2x2x1
jax: 0.10.0
libtpu: 0.0.40
codegen_flags: <defaults>
</compile_context>

<pallas_src>
import jax
import jax.numpy as jnp
from jax import lax
from jax.experimental import pallas as pl
from jax.experimental.pallas import tpu as pltpu

# ---------------- small synthetic config (matches module hyper-parameters) ----------------
IN_CH = 3
TRANS_DIM = 32       # trans_dim
DEPTH = 2            # depth
NUM_HEADS = 4        # num_heads
GROUP_K = 8          # group_k  (kNN group size)
PATCH_NUM = 8        # patch_num (G, number of FPS centers)
ENCODER_DIMS = 64    # encoder_dims
DET_TOKEN_NUM = 4    # det_token_num, init type = 'random'
BN_EPS = 1e-5
LN_EPS = 1e-6


# ---------------- exact-GELU helper (erf via Abramowitz-Stegun 7.1.26, |err|<1.5e-7) -------
# Kept as a polynomial (torch-exact to ~1e-7); exp lands on the EUP, rest is a dozen VPU ops.
def _erf(x):
    a1, a2, a3, a4, a5 = 0.254829592, -0.284496736, 1.421413741, -1.453152027, 1.061405429
    p = 0.3275911
    sgn = jnp.where(x >= 0.0, 1.0, -1.0)
    ax = jnp.abs(x)
    t = 1.0 / (1.0 + p * ax)
    poly = ((((a5 * t + a4) * t + a3) * t + a2) * t + a1) * t
    return sgn * (1.0 - poly * jnp.exp(-ax * ax))


def _gelu(x):
    # matches torch.nn.GELU() (exact erf formulation) to ~1e-7
    return 0.5 * x * (1.0 + _erf(x * 0.7071067811865476))


def _full_spec(a):
    nd = a.ndim
    return pl.BlockSpec(a.shape, lambda i, _nd=nd: (0,) * _nd)


def _pick_group_tile(bg, k, target_rows=256):
    """Largest divisor of bg with gt*k <= target_rows, respecting the sublane rule,
    preferring >=2 grid steps so v7x's two TensorCores both get work."""
    cands = [gt for gt in range(1, bg + 1)
             if bg % gt == 0 and gt * k <= target_rows and (gt % 8 == 0 or gt == bg)]
    if not cands:
        return bg
    multi = [gt for gt in cands if bg // gt >= 2]
    return max(multi) if multi else max(cands)


# ---------------- Pallas kernel 1: batched group Encoder + reduce_dim + pos_embed MLP ------
def encoder_pos_kernel(neigh_ref, center_ref,
                       w1, b1, w2, b2, w3g, w3h, b3, w4, b4, wr, br,
                       pw1, pb1, pw2, pb2,
                       out_ref):
    GT = center_ref.shape[0]
    NK, _ = neigh_ref.shape
    K = NK // GT

    x = neigh_ref[...]                                                            # (GT*K, 3)
    # Conv1d(3,128) with BN folded: 3 VPU broadcast-FMAs instead of a 3-deep MXU contraction.
    h1 = (x[:, 0:1] * w1[0:1, :] + x[:, 1:2] * w1[1:2, :]
          + x[:, 2:3] * w1[2:3, :] + b1[...])
    h1 = jnp.maximum(h1, 0.0)                                                     # BN+ReLU

    # Conv1d(128,256): bf16 MXU operands, f32 accumulation.
    h2 = jnp.dot(h1.astype(jnp.bfloat16), w2[...],
                 preferred_element_type=jnp.float32) + b2[...]                    # (GT*K, 256)

    # per-group max pooling, then w3 split: cat([g, h]) @ w3 == g @ w3[:256] + h @ w3[256:]
    g = jnp.max(h2.reshape(GT, K, -1), axis=1)                                    # (GT, 256)
    fg = jnp.dot(g.astype(jnp.bfloat16), w3g[...],
                 preferred_element_type=jnp.float32)                              # (GT, 512)
    fh = jnp.dot(h2.astype(jnp.bfloat16), w3h[...],
                 preferred_element_type=jnp.float32)                              # (GT*K, 512)
    f = fh.reshape(GT, K, -1) + fg[:, None, :] + b3[...]                          # BN folded
    f = jnp.maximum(f, 0.0)
    f = jnp.dot(f.reshape(GT * K, -1).astype(jnp.bfloat16), w4[...],
                preferred_element_type=jnp.float32) + b4[...]                     # (GT*K, E)
    tok = jnp.max(f.reshape(GT, K, -1), axis=1)                                   # (GT, E)
    # fused reduce_dim: Linear(encoder_dims -> trans_dim)
    tok = jnp.dot(tok, wr[...], preferred_element_type=jnp.float32) + br[...]     # (GT, C)

    # fused pos_embed on the group centers: Linear(3,128) (as FMAs) -> GELU -> Linear(128,C)
    c = center_ref[...]                                                           # (GT, 3)
    p = (c[:, 0:1] * pw1[0:1, :] + c[:, 1:2] * pw1[1:2, :]
         + c[:, 2:3] * pw1[2:3, :] + pb1[...])
    p = _gelu(p)
    pos = jnp.dot(p, pw2[...], preferred_element_type=jnp.float32) + pb2[...]     # (GT, C)

    # single merged (GT, 2C) output -> fewer masked stores / writeback DMAs
    out_ref[...] = jnp.concatenate([tok, pos], axis=-1)


def encoder_pos_forward(neigh_flat, center_flat, enc_p, pe_p):
    """neigh_flat: (B*G*K, 3) relative coords, center_flat: (B*G, 3)
       -> merged (B*G, 2*trans_dim) tensor: [:, :C]=tokens, [:, C:]=pos."""
    NKtot, CIN = neigh_flat.shape
    BG = center_flat.shape[0]
    K = NKtot // BG
    C = enc_p['br'].shape[1]
    GT = _pick_group_tile(BG, K)
    ntiles = BG // GT
    weights = [enc_p[k] for k in ('w1', 'b1', 'w2', 'b2', 'w3g', 'w3h',
                                  'b3', 'w4', 'b4', 'wr', 'br')] + \
              [pe_p[k] for k in ('w1', 'b1', 'w2', 'b2')]
    return pl.pallas_call(
        encoder_pos_kernel,
        out_shape=jax.ShapeDtypeStruct((BG, 2 * C), jnp.float32),
        grid=(ntiles,),
        in_specs=[pl.BlockSpec((GT * K, CIN), lambda i: (i, 0)),
                  pl.BlockSpec((GT, CIN), lambda i: (i, 0))]
                 + [_full_spec(a) for a in weights],
        out_specs=pl.BlockSpec((GT, 2 * C), lambda i: (i, 0)),
        compiler_params=pltpu.CompilerParams(dimension_semantics=("parallel",)),
    )(neigh_flat, center_flat, *weights)


# ---------------- Pallas kernel 2: fused ViT encoder (x+pos, all DEPTH blocks, det slice) --
def vit_blocks_kernel(x_ref, pos_ref, bias_ref,
                      ln1g, ln1b, wqkv, bqkv, wproj, bproj,
                      ln2g, ln2b, wfc1, bfc1, wfc2, bfc2, out_ref):
    _, Tp, C = x_ref.shape
    H = NUM_HEADS
    DH = C // H
    scale = 1.0 / (DH ** 0.5)
    depth = wqkv.shape[0]
    T_real = 1 + PATCH_NUM + DET_TOKEN_NUM          # real (unpadded) token count

    bias = bias_ref[...].reshape(1, 1, Tp)          # additive mask for padded key tokens
    x = (x_ref[...] + pos_ref[...]).reshape(Tp, C)  # x = x + pos ; pos_drop = identity

    # TODO(synk): at real sizes (C=384, depth=12) stream the depth axis (grid axis marked
    # "arbitrary" or pltpu.emit_pipeline) instead of keeping all stacked weights resident.
    for d in range(depth):                          # unrolled, static DEPTH
        # --- LayerNorm 1 + fused QKV projection ---
        mu = jnp.mean(x, axis=-1, keepdims=True)
        var = jnp.mean((x - mu) ** 2, axis=-1, keepdims=True)
        xn = (x - mu) * lax.rsqrt(var + LN_EPS) * ln1g[d] + ln1b[d]
        qkv = (jnp.dot(xn, wqkv[d], preferred_element_type=jnp.float32)
               + bqkv[d]).reshape(Tp, 3 * H, DH)
        qkv = jnp.transpose(qkv, (1, 0, 2))         # (3H, Tp, DH)
        q, k, v = qkv[:H], qkv[H:2 * H], qkv[2 * H:]

        # --- batched multi-head attention (all heads in two einsums; f32 throughout) ---
        s = jnp.einsum('hqd,hkd->hqk', q, k, preferred_element_type=jnp.float32) * scale
        s = s + bias
        s = s - jnp.max(s, axis=-1, keepdims=True)
        e = jnp.exp(s)
        pattn = e * pl.reciprocal(jnp.sum(e, axis=-1, keepdims=True), approx=True)
        att = jnp.einsum('hqk,hkd->hqd', pattn, v, preferred_element_type=jnp.float32)
        att = jnp.transpose(att, (1, 0, 2)).reshape(Tp, C)
        x = x + jnp.dot(att, wproj[d], preferred_element_type=jnp.float32) + bproj[d]

        # --- LayerNorm 2 + MLP (4x, GELU) ---
        mu2 = jnp.mean(x, axis=-1, keepdims=True)
        var2 = jnp.mean((x - mu2) ** 2, axis=-1, keepdims=True)
        xn2 = (x - mu2) * lax.rsqrt(var2 + LN_EPS) * ln2g[d] + ln2b[d]
        hdn = _gelu(jnp.dot(xn2, wfc1[d], preferred_element_type=jnp.float32) + bfc1[d])
        x = x + jnp.dot(hdn, wfc2[d], preferred_element_type=jnp.float32) + bfc2[d]

    # write only the [DET] token slice (everything else is discarded downstream anyway)
    out_ref[...] = x[T_real - DET_TOKEN_NUM:T_real].reshape(1, DET_TOKEN_NUM, C)


def vit_forward(x, pos, attn_bias, bparams):
    B, Tp, C = x.shape
    ws = [bparams[k] for k in ('ln1_g', 'ln1_b', 'wqkv', 'bqkv', 'wproj', 'bproj',
                               'ln2_g', 'ln2_b', 'wfc1', 'bfc1', 'wfc2', 'bfc2')]
    return pl.pallas_call(
        vit_blocks_kernel,
        out_shape=jax.ShapeDtypeStruct((B, DET_TOKEN_NUM, C), jnp.float32),
        grid=(B,),
        in_specs=[pl.BlockSpec((1, Tp, C), lambda b: (b, 0, 0)),
                  pl.BlockSpec((1, Tp, C), lambda b: (b, 0, 0)),
                  _full_spec(attn_bias)] + [_full_spec(a) for a in ws],
        out_specs=pl.BlockSpec((1, DET_TOKEN_NUM, C), lambda b: (b, 0, 0)),
        compiler_params=pltpu.CompilerParams(dimension_semantics=("parallel",)),
    )(x, pos, attn_bias, *ws)


# ---------------- plain-JAX glue: Group divider (FPS + kNN grouping) ----------------
# TODO(synk): DFPSSampler / QueryAndGroup are data-dependent sequential/gather ops; kept in plain JAX.
def farthest_point_sample(xyz, npoint):
    B, N, _ = xyz.shape

    def one(pts):
        def body(i, carry):
            mind, sel, last = carry
            d = jnp.sum((pts - pts[last]) ** 2, axis=-1)
            mind = jnp.minimum(mind, d)
            nxt = jnp.argmax(mind).astype(jnp.int32)
            sel = sel.at[i].set(nxt)
            return mind, sel, nxt

        sel0 = jnp.zeros((npoint,), jnp.int32)           # first center = point 0
        mind0 = jnp.full((N,), jnp.inf, jnp.float32)
        _, sel, _ = lax.fori_loop(1, npoint, body, (mind0, sel0, jnp.int32(0)))
        return sel

    return jax.vmap(one)(xyz)


def knn_group(xyz, center, k):
    # squared distances (B, G, N) -> k nearest neighbors, centered (relative) coords
    d = jnp.sum((center[:, :, None, :] - xyz[:, None, :, :]) ** 2, axis=-1)
    _, idx = lax.top_k(-d, k)                            # (B, G, K)
    grouped = jax.vmap(lambda p, i: p[i])(xyz, idx)      # (B, G, K, 3)
    return grouped - center[:, :, None, :]


# ---------------- full forward ----------------
@jax.jit
def point_transformer_mae_forward(params, pts):
    B, N, _ = pts.shape
    xyz = pts[..., :3]

    # group_divider
    center_idx = farthest_point_sample(xyz, PATCH_NUM)                     # (B, G)
    center = jax.vmap(lambda p, i: p[i])(xyz, center_idx)                  # (B, G, 3)
    neighborhood = knn_group(xyz, center, GROUP_K)                         # (B, G, K, 3)

    # encoder (+ fused reduce_dim) and pos_embed MLP in one fused, group-batched kernel
    BG = B * PATCH_NUM
    tokpos = encoder_pos_forward(neighborhood.reshape(BG * GROUP_K, 3),
                                 center.reshape(BG, 3),
                                 params['encoder'], params['pos_embed'])
    point_tokens = tokpos[:, :TRANS_DIM].reshape(B, PATCH_NUM, TRANS_DIM)
    pos = tokpos[:, TRANS_DIM:].reshape(B, PATCH_NUM, TRANS_DIM)

    # cls / det tokens (det_token_init_type='random')
    cls_tokens = jnp.broadcast_to(params['cls_token'], (B, 1, TRANS_DIM))
    cls_pos = jnp.broadcast_to(params['cls_pos'], (B, 1, TRANS_DIM))
    det_tokens = jnp.broadcast_to(params['det_token'], (B, DET_TOKEN_NUM, TRANS_DIM))
    det_pos = jnp.broadcast_to(params['det_pos'], (B, DET_TOKEN_NUM, TRANS_DIM))

    x = jnp.concatenate([cls_tokens, point_tokens, det_tokens], axis=1)
    pos_all = jnp.concatenate([cls_pos, pos, det_pos], axis=1)

    # pad token dim to a sublane multiple; padded keys are masked out inside the kernel
    T = x.shape[1]
    Tp = ((T + 7) // 8) * 8
    pad = Tp - T
    if pad:
        x = jnp.pad(x, ((0, 0), (0, pad), (0, 0)))
        pos_all = jnp.pad(pos_all, ((0, 0), (0, pad), (0, 0)))
    attn_bias = jnp.where(jnp.arange(Tp) < T, 0.0, -1e30).astype(jnp.float32).reshape(1, Tp)

    # fused VisionTransformer: x = x + pos; pos_drop (identity); DEPTH blocks; no final norm.
    # The kernel returns only the [DET] token slice (B, #DET, trans_dim).
    features = vit_forward(x, pos_all, attn_bias, params['blocks'])
    return dict(features=features, det_token_center=None)


# ---------------- deterministic parameter initialization ----------------
def init_params(key):
    ks = iter(jax.random.split(key, 96))

    def nrm(shape, s=0.02):
        return (s * jax.random.normal(next(ks), shape)).astype(jnp.float32)

    def bn(dim):
        g = 1.0 + 0.1 * jax.random.normal(next(ks), (1, dim))
        b = 0.1 * jax.random.normal(next(ks), (1, dim))
        m = 0.1 * jax.random.normal(next(ks), (1, dim))
        v = jax.random.uniform(next(ks), (1, dim), minval=0.5, maxval=1.5)
        scale = g / jnp.sqrt(v + BN_EPS)
        shift = b - m * scale
        return scale.astype(jnp.float32), shift.astype(jnp.float32)

    enc = {}
    w1, b1 = nrm((3, 128)), nrm((1, 128))                        # Conv1d(3,128,1)
    s1, t1 = bn(128)                                             # BatchNorm1d(128), eval mode
    enc['w1'] = (w1 * s1).astype(jnp.float32)                    # BN folded into conv
    enc['b1'] = (b1 * s1 + t1).astype(jnp.float32)
    w2, b2 = nrm((128, 256)), nrm((1, 256))                      # Conv1d(128,256,1)
    enc['w2'] = w2.astype(jnp.bfloat16)                          # bf16 MXU operand (f32 acc)
    enc['b2'] = b2
    w3 = nrm((512, 512))                                         # Conv1d(512,512,1)
    b3 = nrm((1, 512))
    s2, t2 = bn(512)                                             # BatchNorm1d(512), eval mode
    enc['w3g'] = (w3[:256] * s2).astype(jnp.bfloat16)            # split for concat-free form
    enc['w3h'] = (w3[256:] * s2).astype(jnp.bfloat16)
    enc['b3'] = (b3 * s2 + t2).astype(jnp.float32)
    w4, b4 = nrm((512, ENCODER_DIMS)), nrm((1, ENCODER_DIMS))    # Conv1d(512,E,1)
    enc['w4'] = w4.astype(jnp.bfloat16)
    enc['b4'] = b4
    enc['wr'], enc['br'] = nrm((ENCODER_DIMS, TRANS_DIM)), nrm((1, TRANS_DIM))  # reduce_dim

    pe = dict(w1=nrm((3, 128)), b1=nrm((1, 128)),
              w2=nrm((128, TRANS_DIM)), b2=nrm((1, TRANS_DIM)))

    # per-block ViT weights, stacked on a leading depth axis for the fused kernel
    per_block = []
    for _ in range(DEPTH):
        per_block.append(dict(
            ln1_g=(1.0 + nrm((1, TRANS_DIM))), ln1_b=nrm((1, TRANS_DIM)),
            wqkv=nrm((TRANS_DIM, 3 * TRANS_DIM)),                # fused QKV, x @ Wqkv layout
            bqkv=nrm((1, 3 * TRANS_DIM)),
            wproj=nrm((TRANS_DIM, TRANS_DIM)), bproj=nrm((1, TRANS_DIM)),
            ln2_g=(1.0 + nrm((1, TRANS_DIM))), ln2_b=nrm((1, TRANS_DIM)),
            wfc1=nrm((TRANS_DIM, 4 * TRANS_DIM)), bfc1=nrm((1, 4 * TRANS_DIM)),
            wfc2=nrm((4 * TRANS_DIM, TRANS_DIM)), bfc2=nrm((1, TRANS_DIM)),
        ))
    blocks = {k: jnp.stack([b[k] for b in per_block], axis=0) for k in per_block[0]}

    return dict(
        encoder=enc, pos_embed=pe, blocks=blocks,
        cls_token=jnp.zeros((1, 1, TRANS_DIM), jnp.float32),     # nn.Parameter(torch.zeros)
        cls_pos=nrm((1, 1, TRANS_DIM), 1.0),                     # nn.Parameter(torch.randn)
        det_token=nrm((1, DET_TOKEN_NUM, TRANS_DIM)),            # trunc_normal_(std=0.02)
        det_pos=nrm((1, DET_TOKEN_NUM, TRANS_DIM)),
    )


if __name__ == "__main__":
    key = jax.random.PRNGKey(0)
    pkey, dkey = jax.random.split(key)
    params = init_params(pkey)

    B, N = 2, 64
    pts = jax.random.normal(dkey, (B, N, 3), dtype=jnp.float32)   # input point cloud B x N x 3

    out = point_transformer_mae_forward(params, pts)
    feats = jax.block_until_ready(out['features'])
    assert feats.shape == (B, DET_TOKEN_NUM, TRANS_DIM), feats.shape
    assert bool(jnp.all(jnp.isfinite(feats)))
    print("KERNEL_OK")
</pallas_src>

<mosaic_0001>
module attributes {stable_mosaic.version = 11 : i64} {
  func.func @encoder_pos_kernel(%arg0: i32, %arg1: memref<64x3xf32, #tpu.memory_space<vmem>>, %arg2: memref<8x3xf32, #tpu.memory_space<vmem>>, %arg3: memref<3x128xf32, #tpu.memory_space<vmem>>, %arg4: memref<1x128xf32, #tpu.memory_space<vmem>>, %arg5: memref<128x256xbf16, #tpu.memory_space<vmem>>, %arg6: memref<1x256xf32, #tpu.memory_space<vmem>>, %arg7: memref<256x512xbf16, #tpu.memory_space<vmem>>, %arg8: memref<256x512xbf16, #tpu.memory_space<vmem>>, %arg9: memref<1x512xf32, #tpu.memory_space<vmem>>, %arg10: memref<512x64xbf16, #tpu.memory_space<vmem>>, %arg11: memref<1x64xf32, #tpu.memory_space<vmem>>, %arg12: memref<64x32xf32, #tpu.memory_space<vmem>>, %arg13: memref<1x32xf32, #tpu.memory_space<vmem>>, %arg14: memref<3x128xf32, #tpu.memory_space<vmem>>, %arg15: memref<1x128xf32, #tpu.memory_space<vmem>>, %arg16: memref<128x32xf32, #tpu.memory_space<vmem>>, %arg17: memref<1x32xf32, #tpu.memory_space<vmem>>, %arg18: memref<8x64xf32, #tpu.memory_space<vmem>>) attributes {dimension_semantics = [#tpu.dimension_semantics<parallel>], iteration_bounds = array<i64: 2>, scalar_prefetch = 0 : i64, scratch_operands = 0 : i64, tpu.core_type = #tpu.core_type<tc>, window_params = [{transform_indices = @transform_0, window_bounds = array<i64: 64, 3>}, {transform_indices = @transform_1, window_bounds = array<i64: 8, 3>}, {pipeline_mode = #tpu.pipeline_mode<synchronous>, transform_indices = @transform_2, window_bounds = array<i64: 3, 128>}, {pipeline_mode = #tpu.pipeline_mode<synchronous>, transform_indices = @transform_3, window_bounds = array<i64: 1, 128>}, {pipeline_mode = #tpu.pipeline_mode<synchronous>, transform_indices = @transform_4, window_bounds = array<i64: 128, 256>}, {pipeline_mode = #tpu.pipeline_mode<synchronous>, transform_indices = @transform_5, window_bounds = array<i64: 1, 256>}, {pipeline_mode = #tpu.pipeline_mode<synchronous>, transform_indices = @transform_6, window_bounds = array<i64: 256, 512>}, {pipeline_mode = #tpu.pipeline_mode<synchronous>, transform_indices = @transform_7, window_bounds = array<i64: 256, 512>}, {pipeline_mode = #tpu.pipeline_mode<synchronous>, transform_indices = @transform_8, window_bounds = array<i64: 1, 512>}, {pipeline_mode = #tpu.pipeline_mode<synchronous>, transform_indices = @transform_9, window_bounds = array<i64: 512, 64>}, {pipeline_mode = #tpu.pipeline_mode<synchronous>, transform_indices = @transform_10, window_bounds = array<i64: 1, 64>}, {pipeline_mode = #tpu.pipeline_mode<synchronous>, transform_indices = @transform_11, window_bounds = array<i64: 64, 32>}, {pipeline_mode = #tpu.pipeline_mode<synchronous>, transform_indices = @transform_12, window_bounds = array<i64: 1, 32>}, {pipeline_mode = #tpu.pipeline_mode<synchronous>, transform_indices = @transform_13, window_bounds = array<i64: 3, 128>}, {pipeline_mode = #tpu.pipeline_mode<synchronous>, transform_indices = @transform_14, window_bounds = array<i64: 1, 128>}, {pipeline_mode = #tpu.pipeline_mode<synchronous>, transform_indices = @transform_15, window_bounds = array<i64: 128, 32>}, {pipeline_mode = #tpu.pipeline_mode<synchronous>, transform_indices = @transform_16, window_bounds = array<i64: 1, 32>}, {transform_indices = @transform_17, window_bounds = array<i64: 8, 64>}]} {
    %c0 = arith.constant 0 : index
    %c0_0 = arith.constant 0 : index
    %0 = vector.load %arg1[%c0, %c0_0] : memref<64x3xf32, #tpu.memory_space<vmem>>, vector<64x3xf32>
    %1 = vector.extract_strided_slice %0 {offsets = [0, 0], sizes = [64, 1], strides = [1, 1]} : vector<64x3xf32> to vector<64x1xf32>
    %c0_1 = arith.constant 0 : index
    %c0_2 = arith.constant 0 : index
    %2 = vector.load %arg3[%c0_1, %c0_2] : memref<3x128xf32, #tpu.memory_space<vmem>>, vector<1x128xf32>
    %3 = vector.broadcast %1 : vector<64x1xf32> to vector<64x128xf32>
    %4 = vector.broadcast %2 : vector<1x128xf32> to vector<64x128xf32>
    %5 = arith.mulf %3, %4 : vector<64x128xf32>
    %6 = vector.extract_strided_slice %0 {offsets = [0, 1], sizes = [64, 1], strides = [1, 1]} : vector<64x3xf32> to vector<64x1xf32>
    %c1 = arith.constant 1 : index
    %c0_3 = arith.constant 0 : index
    %7 = vector.load %arg3[%c1, %c0_3] : memref<3x128xf32, #tpu.memory_space<vmem>>, vector<1x128xf32>
    %8 = vector.broadcast %6 : vector<64x1xf32> to vector<64x128xf32>
    %9 = vector.broadcast %7 : vector<1x128xf32> to vector<64x128xf32>
    %10 = arith.mulf %8, %9 : vector<64x128xf32>
    %11 = arith.addf %5, %10 : vector<64x128xf32>
    %12 = vector.extract_strided_slice %0 {offsets = [0, 2], sizes = [64, 1], strides = [1, 1]} : vector<64x3xf32> to vector<64x1xf32>
    %c2 = arith.constant 2 : index
    %c0_4 = arith.constant 0 : index
    %13 = vector.load %arg3[%c2, %c0_4] : memref<3x128xf32, #tpu.memory_space<vmem>>, vector<1x128xf32>
    %14 = vector.broadcast %12 : vector<64x1xf32> to vector<64x128xf32>
    %15 = vector.broadcast %13 : vector<1x128xf32> to vector<64x128xf32>
    %16 = arith.mulf %14, %15 : vector<64x128xf32>
    %17 = arith.addf %11, %16 : vector<64x128xf32>
    %c0_5 = arith.constant 0 : index
    %c0_6 = arith.constant 0 : index
    %18 = vector.load %arg4[%c0_5, %c0_6] : memref<1x128xf32, #tpu.memory_space<vmem>>, vector<1x128xf32>
    %19 = vector.broadcast %18 : vector<1x128xf32> to vector<64x128xf32>
    %20 = arith.addf %17, %19 : vector<64x128xf32>
    %cst = arith.constant 0.000000e+00 : f32
    %21 = vector.broadcast %cst : f32 to vector<64x128xf32>
    %22 = arith.maximumf %20, %21 : vector<64x128xf32>
    %23 = arith.truncf %22 : vector<64x128xf32> to vector<64x128xbf16>
    %c0_7 = arith.constant 0 : index
    %c0_8 = arith.constant 0 : index
    %24 = vector.load %arg5[%c0_7, %c0_8] : memref<128x256xbf16, #tpu.memory_space<vmem>>, vector<128x256xbf16>
    %cst_9 = arith.constant dense<0.000000e+00> : vector<64x256xf32>
    %25 = tpu.matmul %23, %24, %cst_9 {dimension_numbers = #tpu.dot_dimension_numbers<[1], [0], [0], [1], [0, 0, 1, 1], [], []>} : vector<64x128xbf16>, vector<128x256xbf16>, vector<64x256xf32> -> vector<64x256xf32>
    %c0_10 = arith.constant 0 : index
    %c0_11 = arith.constant 0 : index
    %26 = vector.load %arg6[%c0_10, %c0_11] : memref<1x256xf32, #tpu.memory_space<vmem>>, vector<1x256xf32>
    %27 = vector.broadcast %26 : vector<1x256xf32> to vector<64x256xf32>
    %28 = arith.addf %25, %27 : vector<64x256xf32>
    %29 = vector.shape_cast %28 : vector<64x256xf32> to vector<8x8x256xf32>
    %cst_12 = arith.constant dense<0xFF800000> : vector<8x256xf32>
    %30 = vector.multi_reduction <maximumf>, %29, %cst_12 [1] : vector<8x8x256xf32> to vector<8x256xf32>
    %31 = arith.truncf %30 : vector<8x256xf32> to vector<8x256xbf16>
    %c0_13 = arith.constant 0 : index
    %c0_14 = arith.constant 0 : index
    %32 = vector.load %arg7[%c0_13, %c0_14] : memref<256x512xbf16, #tpu.memory_space<vmem>>, vector<256x512xbf16>
    %cst_15 = arith.constant dense<0.000000e+00> : vector<8x512xf32>
    %33 = tpu.matmul %31, %32, %cst_15 {dimension_numbers = #tpu.dot_dimension_numbers<[1], [0], [0], [1], [0, 0, 1, 1], [], []>} : vector<8x256xbf16>, vector<256x512xbf16>, vector<8x512xf32> -> vector<8x512xf32>
    %34 = arith.truncf %28 : vector<64x256xf32> to vector<64x256xbf16>
    %c0_16 = arith.constant 0 : index
    %c0_17 = arith.constant 0 : index
    %35 = vector.load %arg8[%c0_16, %c0_17] : memref<256x512xbf16, #tpu.memory_space<vmem>>, vector<256x512xbf16>
    %cst_18 = arith.constant dense<0.000000e+00> : vector<64x512xf32>
    %36 = tpu.matmul %34, %35, %cst_18 {dimension_numbers = #tpu.dot_dimension_numbers<[1], [0], [0], [1], [0, 0, 1, 1], [], []>} : vector<64x256xbf16>, vector<256x512xbf16>, vector<64x512xf32> -> vector<64x512xf32>
    %37 = vector.shape_cast %36 : vector<64x512xf32> to vector<8x8x512xf32>
    %38 = vector.shape_cast %33 : vector<8x512xf32> to vector<8x1x512xf32>
    %39 = vector.broadcast %38 : vector<8x1x512xf32> to vector<8x8x512xf32>
    %40 = arith.addf %37, %39 : vector<8x8x512xf32>
    %c0_19 = arith.constant 0 : index
    %c0_20 = arith.constant 0 : index
    %41 = vector.load %arg9[%c0_19, %c0_20] : memref<1x512xf32, #tpu.memory_space<vmem>>, vector<1x512xf32>
    %42 = vector.shape_cast %41 : vector<1x512xf32> to vector<1x1x512xf32>
    %43 = vector.broadcast %42 : vector<1x1x512xf32> to vector<8x8x512xf32>
    %44 = arith.addf %40, %43 : vector<8x8x512xf32>
    %cst_21 = arith.constant 0.000000e+00 : f32
    %45 = vector.broadcast %cst_21 : f32 to vector<8x8x512xf32>
    %46 = arith.maximumf %44, %45 : vector<8x8x512xf32>
    %47 = vector.shape_cast %46 : vector<8x8x512xf32> to vector<64x512xf32>
    %48 = arith.truncf %47 : vector<64x512xf32> to vector<64x512xbf16>
    %c0_22 = arith.constant 0 : index
    %c0_23 = arith.constant 0 : index
    %49 = vector.load %arg10[%c0_22, %c0_23] : memref<512x64xbf16, #tpu.memory_space<vmem>>, vector<512x64xbf16>
    %cst_24 = arith.constant dense<0.000000e+00> : vector<64x64xf32>
    %50 = tpu.matmul %48, %49, %cst_24 {dimension_numbers = #tpu.dot_dimension_numbers<[1], [0], [0], [1], [0, 0, 1, 1], [], []>} : vector<64x512xbf16>, vector<512x64xbf16>, vector<64x64xf32> -> vector<64x64xf32>
    %c0_25 = arith.constant 0 : index
    %c0_26 = arith.constant 0 : index
    %51 = vector.load %arg11[%c0_25, %c0_26] : memref<1x64xf32, #tpu.memory_space<vmem>>, vector<1x64xf32>
    %52 = vector.broadcast %51 : vector<1x64xf32> to vector<64x64xf32>
    %53 = arith.addf %50, %52 : vector<64x64xf32>
    %54 = vector.shape_cast %53 : vector<64x64xf32> to vector<8x8x64xf32>
    %cst_27 = arith.constant dense<0xFF800000> : vector<8x64xf32>
    %55 = vector.multi_reduction <maximumf>, %54, %cst_27 [1] : vector<8x8x64xf32> to vector<8x64xf32>
    %c0_28 = arith.constant 0 : index
    %c0_29 = arith.constant 0 : index
    %56 = vector.load %arg12[%c0_28, %c0_29] : memref<64x32xf32, #tpu.memory_space<vmem>>, vector<64x32xf32>
    %cst_30 = arith.constant dense<0.000000e+00> : vector<8x32xf32>
    %57 = tpu.matmul %55, %56, %cst_30 {dimension_numbers = #tpu.dot_dimension_numbers<[1], [0], [0], [1], [0, 0, 1, 1], [], []>} : vector<8x64xf32>, vector<64x32xf32>, vector<8x32xf32> -> vector<8x32xf32>
    %c0_31 = arith.constant 0 : index
    %c0_32 = arith.constant 0 : index
    %58 = vector.load %arg13[%c0_31, %c0_32] : memref<1x32xf32, #tpu.memory_space<vmem>>, vector<1x32xf32>
    %59 = vector.broadcast %58 : vector<1x32xf32> to vector<8x32xf32>
    %60 = arith.addf %57, %59 : vector<8x32xf32>
    %c0_33 = arith.constant 0 : index
    %c0_34 = arith.constant 0 : index
    %61 = vector.load %arg2[%c0_33, %c0_34] : memref<8x3xf32, #tpu.memory_space<vmem>>, vector<8x3xf32>
    %62 = vector.extract_strided_slice %61 {offsets = [0, 0], sizes = [8, 1], strides = [1, 1]} : vector<8x3xf32> to vector<8x1xf32>
    %c0_35 = arith.constant 0 : index
    %c0_36 = arith.constant 0 : index
    %63 = vector.load %arg14[%c0_35, %c0_36] : memref<3x128xf32, #tpu.memory_space<vmem>>, vector<1x128xf32>
    %64 = vector.broadcast %62 : vector<8x1xf32> to vector<8x128xf32>
    %65 = vector.broadcast %63 : vector<1x128xf32> to vector<8x128xf32>
    %66 = arith.mulf %64, %65 : vector<8x128xf32>
    %67 = vector.extract_strided_slice %61 {offsets = [0, 1], sizes = [8, 1], strides = [1, 1]} : vector<8x3xf32> to vector<8x1xf32>
    %c1_37 = arith.constant 1 : index
    %c0_38 = arith.constant 0 : index
    %68 = vector.load %arg14[%c1_37, %c0_38] : memref<3x128xf32, #tpu.memory_space<vmem>>, vector<1x128xf32>
    %69 = vector.broadcast %67 : vector<8x1xf32> to vector<8x128xf32>
    %70 = vector.broadcast %68 : vector<1x128xf32> to vector<8x128xf32>
    %71 = arith.mulf %69, %70 : vector<8x128xf32>
    %72 = arith.addf %66, %71 : vector<8x128xf32>
    %73 = vector.extract_strided_slice %61 {offsets = [0, 2], sizes = [8, 1], strides = [1, 1]} : vector<8x3xf32> to vector<8x1xf32>
    %c2_39 = arith.constant 2 : index
    %c0_40 = arith.constant 0 : index
    %74 = vector.load %arg14[%c2_39, %c0_40] : memref<3x128xf32, #tpu.memory_space<vmem>>, vector<1x128xf32>
    %75 = vector.broadcast %73 : vector<8x1xf32> to vector<8x128xf32>
    %76 = vector.broadcast %74 : vector<1x128xf32> to vector<8x128xf32>
    %77 = arith.mulf %75, %76 : vector<8x128xf32>
    %78 = arith.addf %72, %77 : vector<8x128xf32>
    %c0_41 = arith.constant 0 : index
    %c0_42 = arith.constant 0 : index
    %79 = vector.load %arg15[%c0_41, %c0_42] : memref<1x128xf32, #tpu.memory_space<vmem>>, vector<1x128xf32>
    %80 = vector.broadcast %79 : vector<1x128xf32> to vector<8x128xf32>
    %81 = arith.addf %78, %80 : vector<8x128xf32>
    %cst_43 = arith.constant 5.000000e-01 : f32
    %82 = vector.broadcast %cst_43 : f32 to vector<8x128xf32>
    %83 = arith.mulf %82, %81 : vector<8x128xf32>
    %cst_44 = arith.constant 0.707106769 : f32
    %84 = vector.broadcast %cst_44 : f32 to vector<8x128xf32>
    %85 = arith.mulf %81, %84 : vector<8x128xf32>
    %cst_45 = arith.constant 0.000000e+00 : f32
    %86 = vector.broadcast %cst_45 : f32 to vector<8x128xf32>
    %87 = arith.cmpf oge, %85, %86 : vector<8x128xf32>
    %cst_46 = arith.constant 1.000000e+00 : f32
    %cst_47 = arith.constant -1.000000e+00 : f32
    %88 = vector.broadcast %cst_46 : f32 to vector<8x128xf32>
    %89 = vector.broadcast %cst_47 : f32 to vector<8x128xf32>
    %90 = arith.select %87, %88, %89 : vector<8x128xi1>, vector<8x128xf32>
    %91 = math.absf %85 : vector<8x128xf32>
    %cst_48 = arith.constant 0.327591091 : f32
    %92 = vector.broadcast %cst_48 : f32 to vector<8x128xf32>
    %93 = arith.mulf %92, %91 : vector<8x128xf32>
    %cst_49 = arith.constant 1.000000e+00 : f32
    %94 = vector.broadcast %cst_49 : f32 to vector<8x128xf32>
    %95 = arith.addf %94, %93 : vector<8x128xf32>
    %cst_50 = arith.constant 1.000000e+00 : f32
    %96 = vector.broadcast %cst_50 : f32 to vector<8x128xf32>
    %97 = arith.divf %96, %95 : vector<8x128xf32>
    %cst_51 = arith.constant 1.06140542 : f32
    %98 = vector.broadcast %cst_51 : f32 to vector<8x128xf32>
    %99 = arith.mulf %98, %97 : vector<8x128xf32>
    %cst_52 = arith.constant -1.45315206 : f32
    %100 = vector.broadcast %cst_52 : f32 to vector<8x128xf32>
    %101 = arith.addf %99, %100 : vector<8x128xf32>
    %102 = arith.mulf %101, %97 : vector<8x128xf32>
    %cst_53 = arith.constant 1.42141378 : f32
    %103 = vector.broadcast %cst_53 : f32 to vector<8x128xf32>
    %104 = arith.addf %102, %103 : vector<8x128xf32>
    %105 = arith.mulf %104, %97 : vector<8x128xf32>
    %cst_54 = arith.constant -0.284496725 : f32
    %106 = vector.broadcast %cst_54 : f32 to vector<8x128xf32>
    %107 = arith.addf %105, %106 : vector<8x128xf32>
    %108 = arith.mulf %107, %97 : vector<8x128xf32>
    %cst_55 = arith.constant 0.254829586 : f32
    %109 = vector.broadcast %cst_55 : f32 to vector<8x128xf32>
    %110 = arith.addf %108, %109 : vector<8x128xf32>
    %111 = arith.mulf %110, %97 : vector<8x128xf32>
    %cst_56 = arith.constant 0.000000e+00 : f32
    %112 = vector.broadcast %cst_56 : f32 to vector<8x128xf32>
    %113 = arith.subf %112, %91 : vector<8x128xf32>
    %114 = arith.mulf %113, %91 : vector<8x128xf32>
    %115 = math.exp %114 : vector<8x128xf32>
    %116 = arith.mulf %111, %115 : vector<8x128xf32>
    %cst_57 = arith.constant 1.000000e+00 : f32
    %117 = vector.broadcast %cst_57 : f32 to vector<8x128xf32>
    %118 = arith.subf %117, %116 : vector<8x128xf32>
    %119 = arith.mulf %90, %118 : vector<8x128xf32>
    %cst_58 = arith.constant 1.000000e+00 : f32
    %120 = vector.broadcast %cst_58 : f32 to vector<8x128xf32>
    %121 = arith.addf %120, %119 : vector<8x128xf32>
    %122 = arith.mulf %83, %121 : vector<8x128xf32>
    %c0_59 = arith.constant 0 : index
    %c0_60 = arith.constant 0 : index
    %123 = vector.load %arg16[%c0_59, %c0_60] : memref<128x32xf32, #tpu.memory_space<vmem>>, vector<128x32xf32>
    %cst_61 = arith.constant dense<0.000000e+00> : vector<8x32xf32>
    %124 = tpu.matmul %122, %123, %cst_61 {dimension_numbers = #tpu.dot_dimension_numbers<[1], [0], [0], [1], [0, 0, 1, 1], [], []>} : vector<8x128xf32>, vector<128x32xf32>, vector<8x32xf32> -> vector<8x32xf32>
    %c0_62 = arith.constant 0 : index
    %c0_63 = arith.constant 0 : index
    %125 = vector.load %arg17[%c0_62, %c0_63] : memref<1x32xf32, #tpu.memory_space<vmem>>, vector<1x32xf32>
    %126 = vector.broadcast %125 : vector<1x32xf32> to vector<8x32xf32>
    %127 = arith.addf %124, %126 : vector<8x32xf32>
    %128 = tpu.concatenate %60, %127 in 1 : vector<8x32xf32>, vector<8x32xf32> -> vector<8x64xf32>
    %c0_64 = arith.constant 0 : index
    %c0_65 = arith.constant 0 : index
    %129 = vector.load %arg18[%c0_64, %c0_65] : memref<8x64xf32, #tpu.memory_space<vmem>>, vector<8x64xf32>
    tpu.vector_store %arg18[%c0_64, %c0_65], %128 {strides = array<i32>} : memref<8x64xf32, #tpu.memory_space<vmem>>, vector<8x64xf32>,
    return
  }
  func.func @transform_0(%arg0: i32) -> (i32, i32) {
    %c0_i32 = arith.constant 0 : i32
    %c0_i32_0 = arith.constant 0 : i32
    return %arg0, %c0_i32 : i32, i32
  }
  func.func @transform_1(%arg0: i32) -> (i32, i32) {
    %c0_i32 = arith.constant 0 : i32
    %c0_i32_0 = arith.constant 0 : i32
    return %arg0, %c0_i32 : i32, i32
  }
  func.func @transform_2(%arg0: i32) -> (i32, i32) {
    %c0_i32 = arith.constant 0 : i32
    %c0_i32_0 = arith.constant 0 : i32
    %c0_i32_1 = arith.constant 0 : i32
    return %c0_i32, %c0_i32_0 : i32, i32
  }
  func.func @transform_3(%arg0: i32) -> (i32, i32) {
    %c0_i32 = arith.constant 0 : i32
    %c0_i32_0 = arith.constant 0 : i32
    %c0_i32_1 = arith.constant 0 : i32
    return %c0_i32, %c0_i32_0 : i32, i32
  }
  func.func @transform_4(%arg0: i32) -> (i32, i32) {
    %c0_i32 = arith.constant 0 : i32
    %c0_i32_0 = arith.constant 0 : i32
    %c0_i32_1 = arith.constant 0 : i32
    return %c0_i32, %c0_i32_0 : i32, i32
  }
  func.func @transform_5(%arg0: i32) -> (i32, i32) {
    %c0_i32 = arith.constant 0 : i32
    %c0_i32_0 = arith.constant 0 : i32
    %c0_i32_1 = arith.constant 0 : i32
    return %c0_i32, %c0_i32_0 : i32, i32
  }
  func.func @transform_6(%arg0: i32) -> (i32, i32) {
    %c0_i32 = arith.constant 0 : i32
    %c0_i32_0 = arith.constant 0 : i32
    %c0_i32_1 = arith.constant 0 : i32
    return %c0_i32, %c0_i32_0 : i32, i32
  }
  func.func @transform_7(%arg0: i32) -> (i32, i32) {
    %c0_i32 = arith.constant 0 : i32
    %c0_i32_0 = arith.constant 0 : i32
    %c0_i32_1 = arith.constant 0 : i32
    return %c0_i32, %c0_i32_0 : i32, i32
  }
  func.func @transform_8(%arg0: i32) -> (i32, i32) {
    %c0_i32 = arith.constant 0 : i32
    %c0_i32_0 = arith.constant 0 : i32
    %c0_i32_1 = arith.constant 0 : i32
    return %c0_i32, %c0_i32_0 : i32, i32
  }
  func.func @transform_9(%arg0: i32) -> (i32, i32) {
    %c0_i32 = arith.constant 0 : i32
    %c0_i32_0 = arith.constant 0 : i32
    %c0_i32_1 = arith.constant 0 : i32
    return %c0_i32, %c0_i32_0 : i32, i32
  }
  func.func @transform_10(%arg0: i32) -> (i32, i32) {
    %c0_i32 = arith.constant 0 : i32
    %c0_i32_0 = arith.constant 0 : i32
    %c0_i32_1 = arith.constant 0 : i32
    return %c0_i32, %c0_i32_0 : i32, i32
  }
  func.func @transform_11(%arg0: i32) -> (i32, i32) {
    %c0_i32 = arith.constant 0 : i32
    %c0_i32_0 = arith.constant 0 : i32
    %c0_i32_1 = arith.constant 0 : i32
    return %c0_i32, %c0_i32_0 : i32, i32
  }
  func.func @transform_12(%arg0: i32) -> (i32, i32) {
    %c0_i32 = arith.constant 0 : i32
    %c0_i32_0 = arith.constant 0 : i32
    %c0_i32_1 = arith.constant 0 : i32
    return %c0_i32, %c0_i32_0 : i32, i32
  }
  func.func @transform_13(%arg0: i32) -> (i32, i32) {
    %c0_i32 = arith.constant 0 : i32
    %c0_i32_0 = arith.constant 0 : i32
    %c0_i32_1 = arith.constant 0 : i32
    return %c0_i32, %c0_i32_0 : i32, i32
  }
  func.func @transform_14(%arg0: i32) -> (i32, i32) {
    %c0_i32 = arith.constant 0 : i32
    %c0_i32_0 = arith.constant 0 : i32
    %c0_i32_1 = arith.constant 0 : i32
    return %c0_i32, %c0_i32_0 : i32, i32
  }
  func.func @transform_15(%arg0: i32) -> (i32, i32) {
    %c0_i32 = arith.constant 0 : i32
    %c0_i32_0 = arith.constant 0 : i32
    %c0_i32_1 = arith.constant 0 : i32
    return %c0_i32, %c0_i32_0 : i32, i32
  }
  func.func @transform_16(%arg0: i32) -> (i32, i32) {
    %c0_i32 = arith.constant 0 : i32
    %c0_i32_0 = arith.constant 0 : i32
    %c0_i32_1 = arith.constant 0 : i32
    return %c0_i32, %c0_i32_0 : i32, i32
  }
  func.func @transform_17(%arg0: i32) -> (i32, i32) {
    %c0_i32 = arith.constant 0 : i32
    %c0_i32_0 = arith.constant 0 : i32
    return %arg0, %c0_i32 : i32, i32
  }
}

module attributes {stable_mosaic.version = 11 : i64} {
  func.func @vit_blocks_kernel(%arg0: i32, %arg1: memref<1x16x32xf32, #tpu.memory_space<vmem>>, %arg2: memref<1x16x32xf32, #tpu.memory_space<vmem>>, %arg3: memref<1x16xf32, #tpu.memory_space<vmem>>, %arg4: memref<2x1x32xf32, #tpu.memory_space<vmem>>, %arg5: memref<2x1x32xf32, #tpu.memory_space<vmem>>, %arg6: memref<2x32x96xf32, #tpu.memory_space<vmem>>, %arg7: memref<2x1x96xf32, #tpu.memory_space<vmem>>, %arg8: memref<2x32x32xf32, #tpu.memory_space<vmem>>, %arg9: memref<2x1x32xf32, #tpu.memory_space<vmem>>, %arg10: memref<2x1x32xf32, #tpu.memory_space<vmem>>, %arg11: memref<2x1x32xf32, #tpu.memory_space<vmem>>, %arg12: memref<2x32x128xf32, #tpu.memory_space<vmem>>, %arg13: memref<2x1x128xf32, #tpu.memory_space<vmem>>, %arg14: memref<2x128x32xf32, #tpu.memory_space<vmem>>, %arg15: memref<2x1x32xf32, #tpu.memory_space<vmem>>, %arg16: memref<1x4x32xf32, #tpu.memory_space<vmem>>) attributes {dimension_semantics = [#tpu.dimension_semantics<parallel>], iteration_bounds = array<i64: 2>, scalar_prefetch = 0 : i64, scratch_operands = 0 : i64, tpu.core_type = #tpu.core_type<tc>, window_params = [{transform_indices = @transform_0, window_bounds = array<i64: 1, 16, 32>}, {transform_indices = @transform_1, window_bounds = array<i64: 1, 16, 32>}, {pipeline_mode = #tpu.pipeline_mode<synchronous>, transform_indices = @transform_2, window_bounds = array<i64: 1, 16>}, {pipeline_mode = #tpu.pipeline_mode<synchronous>, transform_indices = @transform_3, window_bounds = array<i64: 2, 1, 32>}, {pipeline_mode = #tpu.pipeline_mode<synchronous>, transform_indices = @transform_4, window_bounds = array<i64: 2, 1, 32>}, {pipeline_mode = #tpu.pipeline_mode<synchronous>, transform_indices = @transform_5, window_bounds = array<i64: 2, 32, 96>}, {pipeline_mode = #tpu.pipeline_mode<synchronous>, transform_indices = @transform_6, window_bounds = array<i64: 2, 1, 96>}, {pipeline_mode = #tpu.pipeline_mode<synchronous>, transform_indices = @transform_7, window_bounds = array<i64: 2, 32, 32>}, {pipeline_mode = #tpu.pipeline_mode<synchronous>, transform_indices = @transform_8, window_bounds = array<i64: 2, 1, 32>}, {pipeline_mode = #tpu.pipeline_mode<synchronous>, transform_indices = @transform_9, window_bounds = array<i64: 2, 1, 32>}, {pipeline_mode = #tpu.pipeline_mode<synchronous>, transform_indices = @transform_10, window_bounds = array<i64: 2, 1, 32>}, {pipeline_mode = #tpu.pipeline_mode<synchronous>, transform_indices = @transform_11, window_bounds = array<i64: 2, 32, 128>}, {pipeline_mode = #tpu.pipeline_mode<synchronous>, transform_indices = @transform_12, window_bounds = array<i64: 2, 1, 128>}, {pipeline_mode = #tpu.pipeline_mode<synchronous>, transform_indices = @transform_13, window_bounds = array<i64: 2, 128, 32>}, {pipeline_mode = #tpu.pipeline_mode<synchronous>, transform_indices = @transform_14, window_bounds = array<i64: 2, 1, 32>}, {transform_indices = @transform_15, window_bounds = array<i64: 1, 4, 32>}]} {
    %c0 = arith.constant 0 : index
    %c0_0 = arith.constant 0 : index
    %0 = vector.load %arg3[%c0, %c0_0] : memref<1x16xf32, #tpu.memory_space<vmem>>, vector<1x16xf32>
    %1 = vector.shape_cast %0 : vector<1x16xf32> to vector<1x1x16xf32>
    %c0_1 = arith.constant 0 : index
    %c0_2 = arith.constant 0 : index
    %c0_3 = arith.constant 0 : index
    %2 = vector.load %arg1[%c0_1, %c0_2, %c0_3] : memref<1x16x32xf32, #tpu.memory_space<vmem>>, vector<1x16x32xf32>
    %c0_4 = arith.constant 0 : index
    %c0_5 = arith.constant 0 : index
    %c0_6 = arith.constant 0 : index
    %3 = vector.load %arg2[%c0_4, %c0_5, %c0_6] : memref<1x16x32xf32, #tpu.memory_space<vmem>>, vector<1x16x32xf32>
    %4 = arith.addf %2, %3 : vector<1x16x32xf32>
    %5 = vector.shape_cast %4 : vector<1x16x32xf32> to vector<16x32xf32>
    %cst = arith.constant dense<0.000000e+00> : vector<16xf32>
    %6 = vector.multi_reduction <add>, %5, %cst [1] : vector<16x32xf32> to vector<16xf32>
    %7 = vector.shape_cast %6 : vector<16xf32> to vector<16x1xf32>
    %cst_7 = arith.constant 3.200000e+01 : f32
    %8 = vector.broadcast %cst_7 : f32 to vector<16x1xf32>
    %9 = arith.divf %7, %8 : vector<16x1xf32>
    %10 = vector.broadcast %9 : vector<16x1xf32> to vector<16x32xf32>
    %11 = arith.subf %5, %10 : vector<16x32xf32>
    %12 = arith.mulf %11, %11 : vector<16x32xf32>
    %cst_8 = arith.constant dense<0.000000e+00> : vector<16xf32>
    %13 = vector.multi_reduction <add>, %12, %cst_8 [1] : vector<16x32xf32> to vector<16xf32>
    %14 = vector.shape_cast %13 : vector<16xf32> to vector<16x1xf32>
    %cst_9 = arith.constant 3.200000e+01 : f32
    %15 = vector.broadcast %cst_9 : f32 to vector<16x1xf32>
    %16 = arith.divf %14, %15 : vector<16x1xf32>
    %17 = vector.broadcast %9 : vector<16x1xf32> to vector<16x32xf32>
    %18 = arith.subf %5, %17 : vector<16x32xf32>
    %cst_10 = arith.constant 9.99999997E-7 : f32
    %19 = vector.broadcast %cst_10 : f32 to vector<16x1xf32>
    %20 = arith.addf %16, %19 : vector<16x1xf32>
    %21 = math.rsqrt %20 : vector<16x1xf32>
    %22 = vector.broadcast %21 : vector<16x1xf32> to vector<16x32xf32>
    %23 = arith.mulf %18, %22 : vector<16x32xf32>
    %c0_11 = arith.constant 0 : index
    %c0_12 = arith.constant 0 : index
    %c0_13 = arith.constant 0 : index
    %24 = vector.load %arg4[%c0_11, %c0_12, %c0_13] : memref<2x1x32xf32, #tpu.memory_space<vmem>>, vector<1x1x32xf32>
    %25 = vector.shape_cast %24 : vector<1x1x32xf32> to vector<1x32xf32>
    %26 = vector.broadcast %25 : vector<1x32xf32> to vector<16x32xf32>
    %27 = arith.mulf %23, %26 : vector<16x32xf32>
    %c0_14 = arith.constant 0 : index
    %c0_15 = arith.constant 0 : index
    %c0_16 = arith.constant 0 : index
    %28 = vector.load %arg5[%c0_14, %c0_15, %c0_16] : memref<2x1x32xf32, #tpu.memory_space<vmem>>, vector<1x1x32xf32>
    %29 = vector.shape_cast %28 : vector<1x1x32xf32> to vector<1x32xf32>
    %30 = vector.broadcast %29 : vector<1x32xf32> to vector<16x32xf32>
    %31 = arith.addf %27, %30 : vector<16x32xf32>
    %c0_17 = arith.constant 0 : index
    %c0_18 = arith.constant 0 : index
    %c0_19 = arith.constant 0 : index
    %32 = vector.load %arg6[%c0_17, %c0_18, %c0_19] : memref<2x32x96xf32, #tpu.memory_space<vmem>>, vector<1x32x96xf32>
    %33 = vector.shape_cast %32 : vector<1x32x96xf32> to vector<32x96xf32>
    %cst_20 = arith.constant dense<0.000000e+00> : vector<16x96xf32>
    %34 = tpu.matmul %31, %33, %cst_20 {dimension_numbers = #tpu.dot_dimension_numbers<[1], [0], [0], [1], [0, 0, 1, 1], [], []>} : vector<16x32xf32>, vector<32x96xf32>, vector<16x96xf32> -> vector<16x96xf32>
    %c0_21 = arith.constant 0 : index
    %c0_22 = arith.constant 0 : index
    %c0_23 = arith.constant 0 : index
    %35 = vector.load %arg7[%c0_21, %c0_22, %c0_23] : memref<2x1x96xf32, #tpu.memory_space<vmem>>, vector<1x1x96xf32>
    %36 = vector.shape_cast %35 : vector<1x1x96xf32> to vector<1x96xf32>
    %37 = vector.broadcast %36 : vector<1x96xf32> to vector<16x96xf32>
    %38 = arith.addf %34, %37 : vector<16x96xf32>
    %39 = vector.shape_cast %38 : vector<16x96xf32> to vector<16x12x8xf32>
    %40 = tpu.transpose %39, [1, 0, 2] : vector<16x12x8xf32> -> vector<12x16x8xf32>
    %41 = vector.extract_strided_slice %40 {offsets = [0, 0, 0], sizes = [4, 16, 8], strides = [1, 1, 1]} : vector<12x16x8xf32> to vector<4x16x8xf32>
    %42 = vector.extract_strided_slice %40 {offsets = [4, 0, 0], sizes = [4, 16, 8], strides = [1, 1, 1]} : vector<12x16x8xf32> to vector<4x16x8xf32>
    %43 = vector.extract_strided_slice %40 {offsets = [8, 0, 0], sizes = [4, 16, 8], strides = [1, 1, 1]} : vector<12x16x8xf32> to vector<4x16x8xf32>
    "tpu.trace_start"() <{level = 10 : i32, message = "hqd,hkd->hqk"}> : () -> ()
    %cst_24 = arith.constant dense<0.000000e+00> : vector<4x16x16xf32>
    %44 = tpu.matmul %41, %42, %cst_24 {dimension_numbers = #tpu.dot_dimension_numbers<[2], [2], [1], [1], [0, 0, 0, 1, 1, 1], [0], [0]>} : vector<4x16x8xf32>, vector<4x16x8xf32>, vector<4x16x16xf32> -> vector<4x16x16xf32>
    "tpu.trace_stop"() : () -> ()
    %cst_25 = arith.constant 0.353553385 : f32
    %45 = vector.broadcast %cst_25 : f32 to vector<4x16x16xf32>
    %46 = arith.mulf %44, %45 : vector<4x16x16xf32>
    %47 = vector.broadcast %1 : vector<1x1x16xf32> to vector<4x16x16xf32>
    %48 = arith.addf %46, %47 : vector<4x16x16xf32>
    %cst_26 = arith.constant dense<0xFF800000> : vector<4x16xf32>
    %49 = vector.multi_reduction <maximumf>, %48, %cst_26 [2] : vector<4x16x16xf32> to vector<4x16xf32>
    %50 = vector.shape_cast %49 : vector<4x16xf32> to vector<4x16x1xf32>
    %51 = vector.broadcast %50 : vector<4x16x1xf32> to vector<4x16x16xf32>
    %52 = arith.subf %48, %51 : vector<4x16x16xf32>
    %53 = math.exp %52 : vector<4x16x16xf32>
    %cst_27 = arith.constant dense<0.000000e+00> : vector<4x16xf32>
    %54 = vector.multi_reduction <add>, %53, %cst_27 [2] : vector<4x16x16xf32> to vector<4x16xf32>
    %55 = vector.shape_cast %54 : vector<4x16xf32> to vector<4x16x1xf32>
    %56 = tpu.reciprocal %55 {approx = true} : vector<4x16x1xf32> -> vector<4x16x1xf32>
    %57 = vector.broadcast %56 : vector<4x16x1xf32> to vector<4x16x16xf32>
    %58 = arith.mulf %53, %57 : vector<4x16x16xf32>
    "tpu.trace_start"() <{level = 10 : i32, message = "hqk,hkd->hqd"}> : () -> ()
    %cst_28 = arith.constant dense<0.000000e+00> : vector<4x16x8xf32>
    %59 = tpu.matmul %58, %43, %cst_28 {dimension_numbers = #tpu.dot_dimension_numbers<[2], [1], [1], [2], [0, 0, 0, 1, 1, 2], [0], [0]>} : vector<4x16x16xf32>, vector<4x16x8xf32>, vector<4x16x8xf32> -> vector<4x16x8xf32>
    "tpu.trace_stop"() : () -> ()
    %60 = tpu.transpose %59, [1, 0, 2] : vector<4x16x8xf32> -> vector<16x4x8xf32>
    %61 = vector.shape_cast %60 : vector<16x4x8xf32> to vector<16x32xf32>
    %c0_29 = arith.constant 0 : index
    %c0_30 = arith.constant 0 : index
    %c0_31 = arith.constant 0 : index
    %62 = vector.load %arg8[%c0_29, %c0_30, %c0_31] : memref<2x32x32xf32, #tpu.memory_space<vmem>>, vector<1x32x32xf32>
    %63 = vector.shape_cast %62 : vector<1x32x32xf32> to vector<32x32xf32>
    %cst_32 = arith.constant dense<0.000000e+00> : vector<16x32xf32>
    %64 = tpu.matmul %61, %63, %cst_32 {dimension_numbers = #tpu.dot_dimension_numbers<[1], [0], [0], [1], [0, 0, 1, 1], [], []>} : vector<16x32xf32>, vector<32x32xf32>, vector<16x32xf32> -> vector<16x32xf32>
    %65 = arith.addf %5, %64 : vector<16x32xf32>
    %c0_33 = arith.constant 0 : index
    %c0_34 = arith.constant 0 : index
    %c0_35 = arith.constant 0 : index
    %66 = vector.load %arg9[%c0_33, %c0_34, %c0_35] : memref<2x1x32xf32, #tpu.memory_space<vmem>>, vector<1x1x32xf32>
    %67 = vector.shape_cast %66 : vector<1x1x32xf32> to vector<1x32xf32>
    %68 = vector.broadcast %67 : vector<1x32xf32> to vector<16x32xf32>
    %69 = arith.addf %65, %68 : vector<16x32xf32>
    %cst_36 = arith.constant dense<0.000000e+00> : vector<16xf32>
    %70 = vector.multi_reduction <add>, %69, %cst_36 [1] : vector<16x32xf32> to vector<16xf32>
    %71 = vector.shape_cast %70 : vector<16xf32> to vector<16x1xf32>
    %cst_37 = arith.constant 3.200000e+01 : f32
    %72 = vector.broadcast %cst_37 : f32 to vector<16x1xf32>
    %73 = arith.divf %71, %72 : vector<16x1xf32>
    %74 = vector.broadcast %73 : vector<16x1xf32> to vector<16x32xf32>
    %75 = arith.subf %69, %74 : vector<16x32xf32>
    %76 = arith.mulf %75, %75 : vector<16x32xf32>
    %cst_38 = arith.constant dense<0.000000e+00> : vector<16xf32>
    %77 = vector.multi_reduction <add>, %76, %cst_38 [1] : vector<16x32xf32> to vector<16xf32>
    %78 = vector.shape_cast %77 : vector<16xf32> to vector<16x1xf32>
    %cst_39 = arith.constant 3.200000e+01 : f32
    %79 = vector.broadcast %cst_39 : f32 to vector<16x1xf32>
    %80 = arith.divf %78, %79 : vector<16x1xf32>
    %81 = vector.broadcast %73 : vector<16x1xf32> to vector<16x32xf32>
    %82 = arith.subf %69, %81 : vector<16x32xf32>
    %cst_40 = arith.constant 9.99999997E-7 : f32
    %83 = vector.broadcast %cst_40 : f32 to vector<16x1xf32>
    %84 = arith.addf %80, %83 : vector<16x1xf32>
    %85 = math.rsqrt %84 : vector<16x1xf32>
    %86 = vector.broadcast %85 : vector<16x1xf32> to vector<16x32xf32>
    %87 = arith.mulf %82, %86 : vector<16x32xf32>
    %c0_41 = arith.constant 0 : index
    %c0_42 = arith.constant 0 : index
    %c0_43 = arith.constant 0 : index
    %88 = vector.load %arg10[%c0_41, %c0_42, %c0_43] : memref<2x1x32xf32, #tpu.memory_space<vmem>>, vector<1x1x32xf32>
    %89 = vector.shape_cast %88 : vector<1x1x32xf32> to vector<1x32xf32>
    %90 = vector.broadcast %89 : vector<1x32xf32> to vector<16x32xf32>
    %91 = arith.mulf %87, %90 : vector<16x32xf32>
    %c0_44 = arith.constant 0 : index
    %c0_45 = arith.constant 0 : index
    %c0_46 = arith.constant 0 : index
    %92 = vector.load %arg11[%c0_44, %c0_45, %c0_46] : memref<2x1x32xf32, #tpu.memory_space<vmem>>, vector<1x1x32xf32>
    %93 = vector.shape_cast %92 : vector<1x1x32xf32> to vector<1x32xf32>
    %94 = vector.broadcast %93 : vector<1x32xf32> to vector<16x32xf32>
    %95 = arith.addf %91, %94 : vector<16x32xf32>
    %c0_47 = arith.constant 0 : index
    %c0_48 = arith.constant 0 : index
    %c0_49 = arith.constant 0 : index
    %96 = vector.load %arg12[%c0_47, %c0_48, %c0_49] : memref<2x32x128xf32, #tpu.memory_space<vmem>>, vector<1x32x128xf32>
    %97 = vector.shape_cast %96 : vector<1x32x128xf32> to vector<32x128xf32>
    %cst_50 = arith.constant dense<0.000000e+00> : vector<16x128xf32>
    %98 = tpu.matmul %95, %97, %cst_50 {dimension_numbers = #tpu.dot_dimension_numbers<[1], [0], [0], [1], [0, 0, 1, 1], [], []>} : vector<16x32xf32>, vector<32x128xf32>, vector<16x128xf32> -> vector<16x128xf32>
    %c0_51 = arith.constant 0 : index
    %c0_52 = arith.constant 0 : index
    %c0_53 = arith.constant 0 : index
    %99 = vector.load %arg13[%c0_51, %c0_52, %c0_53] : memref<2x1x128xf32, #tpu.memory_space<vmem>>, vector<1x1x128xf32>
    %100 = vector.shape_cast %99 : vector<1x1x128xf32> to vector<1x128xf32>
    %101 = vector.broadcast %100 : vector<1x128xf32> to vector<16x128xf32>
    %102 = arith.addf %98, %101 : vector<16x128xf32>
    %cst_54 = arith.constant 5.000000e-01 : f32
    %103 = vector.broadcast %cst_54 : f32 to vector<16x128xf32>
    %104 = arith.mulf %103, %102 : vector<16x128xf32>
    %cst_55 = arith.constant 0.707106769 : f32
    %105 = vector.broadcast %cst_55 : f32 to vector<16x128xf32>
    %106 = arith.mulf %102, %105 : vector<16x128xf32>
    %cst_56 = arith.constant 0.000000e+00 : f32
    %107 = vector.broadcast %cst_56 : f32 to vector<16x128xf32>
    %108 = arith.cmpf oge, %106, %107 : vector<16x128xf32>
    %cst_57 = arith.constant 1.000000e+00 : f32
    %cst_58 = arith.constant -1.000000e+00 : f32
    %109 = vector.broadcast %cst_57 : f32 to vector<16x128xf32>
    %110 = vector.broadcast %cst_58 : f32 to vector<16x128xf32>
    %111 = arith.select %108, %109, %110 : vector<16x128xi1>, vector<16x128xf32>
    %112 = math.absf %106 : vector<16x128xf32>
    %cst_59 = arith.constant 0.327591091 : f32
    %113 = vector.broadcast %cst_59 : f32 to vector<16x128xf32>
    %114 = arith.mulf %113, %112 : vector<16x128xf32>
    %cst_60 = arith.constant 1.000000e+00 : f32
    %115 = vector.broadcast %cst_60 : f32 to vector<16x128xf32>
    %116 = arith.addf %115, %114 : vector<16x128xf32>
    %cst_61 = arith.constant 1.000000e+00 : f32
    %117 = vector.broadcast %cst_61 : f32 to vector<16x128xf32>
    %118 = arith.divf %117, %116 : vector<16x128xf32>
    %cst_62 = arith.constant 1.06140542 : f32
    %119 = vector.broadcast %cst_62 : f32 to vector<16x128xf32>
    %120 = arith.mulf %119, %118 : vector<16x128xf32>
    %cst_63 = arith.constant -1.45315206 : f32
    %121 = vector.broadcast %cst_63 : f32 to vector<16x128xf32>
    %122 = arith.addf %120, %121 : vector<16x128xf32>
    %123 = arith.mulf %122, %118 : vector<16x128xf32>
    %cst_64 = arith.constant 1.42141378 : f32
    %124 = vector.broadcast %cst_64 : f32 to vector<16x128xf32>
    %125 = arith.addf %123, %124 : vector<16x128xf32>
    %126 = arith.mulf %125, %118 : vector<16x128xf32>
    %cst_65 = arith.constant -0.284496725 : f32
    %127 = vector.broadcast %cst_65 : f32 to vector<16x128xf32>
    %128 = arith.addf %126, %127 : vector<16x128xf32>
    %129 = arith.mulf %128, %118 : vector<16x128xf32>
    %cst_66 = arith.constant 0.254829586 : f32
    %130 = vector.broadcast %cst_66 : f32 to vector<16x128xf32>
    %131 = arith.addf %129, %130 : vector<16x128xf32>
    %132 = arith.mulf %131, %118 : vector<16x128xf32>
    %cst_67 = arith.constant 0.000000e+00 : f32
    %133 = vector.broadcast %cst_67 : f32 to vector<16x128xf32>
    %134 = arith.subf %133, %112 : vector<16x128xf32>
    %135 = arith.mulf %134, %112 : vector<16x128xf32>
    %136 = math.exp %135 : vector<16x128xf32>
    %137 = arith.mulf %132, %136 : vector<16x128xf32>
    %cst_68 = arith.constant 1.000000e+00 : f32
    %138 = vector.broadcast %cst_68 : f32 to vector<16x128xf32>
    %139 = arith.subf %138, %137 : vector<16x128xf32>
    %140 = arith.mulf %111, %139 : vector<16x128xf32>
    %cst_69 = arith.constant 1.000000e+00 : f32
    %141 = vector.broadcast %cst_69 : f32 to vector<16x128xf32>
    %142 = arith.addf %141, %140 : vector<16x128xf32>
    %143 = arith.mulf %104, %142 : vector<16x128xf32>
    %c0_70 = arith.constant 0 : index
    %c0_71 = arith.constant 0 : index
    %c0_72 = arith.constant 0 : index
    %144 = vector.load %arg14[%c0_70, %c0_71, %c0_72] : memref<2x128x32xf32, #tpu.memory_space<vmem>>, vector<1x128x32xf32>
    %145 = vector.shape_cast %144 : vector<1x128x32xf32> to vector<128x32xf32>
    %cst_73 = arith.constant dense<0.000000e+00> : vector<16x32xf32>
    %146 = tpu.matmul %143, %145, %cst_73 {dimension_numbers = #tpu.dot_dimension_numbers<[1], [0], [0], [1], [0, 0, 1, 1], [], []>} : vector<16x128xf32>, vector<128x32xf32>, vector<16x32xf32> -> vector<16x32xf32>
    %147 = arith.addf %69, %146 : vector<16x32xf32>
    %c0_74 = arith.constant 0 : index
    %c0_75 = arith.constant 0 : index
    %c0_76 = arith.constant 0 : index
    %148 = vector.load %arg15[%c0_74, %c0_75, %c0_76] : memref<2x1x32xf32, #tpu.memory_space<vmem>>, vector<1x1x32xf32>
    %149 = vector.shape_cast %148 : vector<1x1x32xf32> to vector<1x32xf32>
    %150 = vector.broadcast %149 : vector<1x32xf32> to vector<16x32xf32>
    %151 = arith.addf %147, %150 : vector<16x32xf32>
    %cst_77 = arith.constant dense<0.000000e+00> : vector<16xf32>
    %152 = vector.multi_reduction <add>, %151, %cst_77 [1] : vector<16x32xf32> to vector<16xf32>
    %153 = vector.shape_cast %152 : vector<16xf32> to vector<16x1xf32>
    %cst_78 = arith.constant 3.200000e+01 : f32
    %154 = vector.broadcast %cst_78 : f32 to vector<16x1xf32>
    %155 = arith.divf %153, %154 : vector<16x1xf32>
    %156 = vector.broadcast %155 : vector<16x1xf32> to vector<16x32xf32>
    %157 = arith.subf %151, %156 : vector<16x32xf32>
    %158 = arith.mulf %157, %157 : vector<16x32xf32>
    %cst_79 = arith.constant dense<0.000000e+00> : vector<16xf32>
    %159 = vector.multi_reduction <add>, %158, %cst_79 [1] : vector<16x32xf32> to vector<16xf32>
    %160 = vector.shape_cast %159 : vector<16xf32> to vector<16x1xf32>
    %cst_80 = arith.constant 3.200000e+01 : f32
    %161 = vector.broadcast %cst_80 : f32 to vector<16x1xf32>
    %162 = arith.divf %160, %161 : vector<16x1xf32>
    %163 = vector.broadcast %155 : vector<16x1xf32> to vector<16x32xf32>
    %164 = arith.subf %151, %163 : vector<16x32xf32>
    %cst_81 = arith.constant 9.99999997E-7 : f32
    %165 = vector.broadcast %cst_81 : f32 to vector<16x1xf32>
    %166 = arith.addf %162, %165 : vector<16x1xf32>
    %167 = math.rsqrt %166 : vector<16x1xf32>
    %168 = vector.broadcast %167 : vector<16x1xf32> to vector<16x32xf32>
    %169 = arith.mulf %164, %168 : vector<16x32xf32>
    %c1 = arith.constant 1 : index
    %c0_82 = arith.constant 0 : index
    %c0_83 = arith.constant 0 : index
    %170 = vector.load %arg4[%c1, %c0_82, %c0_83] : memref<2x1x32xf32, #tpu.memory_space<vmem>>, vector<1x1x32xf32>
    %171 = vector.shape_cast %170 : vector<1x1x32xf32> to vector<1x32xf32>
    %172 = vector.broadcast %171 : vector<1x32xf32> to vector<16x32xf32>
    %173 = arith.mulf %169, %172 : vector<16x32xf32>
    %c1_84 = arith.constant 1 : index
    %c0_85 = arith.constant 0 : index
    %c0_86 = arith.constant 0 : index
    %174 = vector.load %arg5[%c1_84, %c0_85, %c0_86] : memref<2x1x32xf32, #tpu.memory_space<vmem>>, vector<1x1x32xf32>
    %175 = vector.shape_cast %174 : vector<1x1x32xf32> to vector<1x32xf32>
    %176 = vector.broadcast %175 : vector<1x32xf32> to vector<16x32xf32>
    %177 = arith.addf %173, %176 : vector<16x32xf32>
    %c1_87 = arith.constant 1 : index
    %c0_88 = arith.constant 0 : index
    %c0_89 = arith.constant 0 : index
    %178 = vector.load %arg6[%c1_87, %c0_88, %c0_89] : memref<2x32x96xf32, #tpu.memory_space<vmem>>, vector<1x32x96xf32>
    %179 = vector.shape_cast %178 : vector<1x32x96xf32> to vector<32x96xf32>
    %cst_90 = arith.constant dense<0.000000e+00> : vector<16x96xf32>
    %180 = tpu.matmul %177, %179, %cst_90 {dimension_numbers = #tpu.dot_dimension_numbers<[1], [0], [0], [1], [0, 0, 1, 1], [], []>} : vector<16x32xf32>, vector<32x96xf32>, vector<16x96xf32> -> vector<16x96xf32>
    %c1_91 = arith.constant 1 : index
    %c0_92 = arith.constant 0 : index
    %c0_93 = arith.constant 0 : index
    %181 = vector.load %arg7[%c1_91, %c0_92, %c0_93] : memref<2x1x96xf32, #tpu.memory_space<vmem>>, vector<1x1x96xf32>
    %182 = vector.shape_cast %181 : vector<1x1x96xf32> to vector<1x96xf32>
    %183 = vector.broadcast %182 : vector<1x96xf32> to vector<16x96xf32>
    %184 = arith.addf %180, %183 : vector<16x96xf32>
    %185 = vector.shape_cast %184 : vector<16x96xf32> to vector<16x12x8xf32>
    %186 = tpu.transpose %185, [1, 0, 2] : vector<16x12x8xf32> -> vector<12x16x8xf32>
    %187 = vector.extract_strided_slice %186 {offsets = [0, 0, 0], sizes = [4, 16, 8], strides = [1, 1, 1]} : vector<12x16x8xf32> to vector<4x16x8xf32>
    %188 = vector.extract_strided_slice %186 {offsets = [4, 0, 0], sizes = [4, 16, 8], strides = [1, 1, 1]} : vector<12x16x8xf32> to vector<4x16x8xf32>
    %189 = vector.extract_strided_slice %186 {offsets = [8, 0, 0], sizes = [4, 16, 8], strides = [1, 1, 1]} : vector<12x16x8xf32> to vector<4x16x8xf32>
    "tpu.trace_start"() <{level = 10 : i32, message = "hqd,hkd->hqk"}> : () -> ()
    %cst_94 = arith.constant dense<0.000000e+00> : vector<4x16x16xf32>
    %190 = tpu.matmul %187, %188, %cst_94 {dimension_numbers = #tpu.dot_dimension_numbers<[2], [2], [1], [1], [0, 0, 0, 1, 1, 1], [0], [0]>} : vector<4x16x8xf32>, vector<4x16x8xf32>, vector<4x16x16xf32> -> vector<4x16x16xf32>
    "tpu.trace_stop"() : () -> ()
    %cst_95 = arith.constant 0.353553385 : f32
    %191 = vector.broadcast %cst_95 : f32 to vector<4x16x16xf32>
    %192 = arith.mulf %190, %191 : vector<4x16x16xf32>
    %193 = vector.broadcast %1 : vector<1x1x16xf32> to vector<4x16x16xf32>
    %194 = arith.addf %192, %193 : vector<4x16x16xf32>
    %cst_96 = arith.constant dense<0xFF800000> : vector<4x16xf32>
    %195 = vector.multi_reduction <maximumf>, %194, %cst_96 [2] : vector<4x16x16xf32> to vector<4x16xf32>
    %196 = vector.shape_cast %195 : vector<4x16xf32> to vector<4x16x1xf32>
    %197 = vector.broadcast %196 : vector<4x16x1xf32> to vector<4x16x16xf32>
    %198 = arith.subf %194, %197 : vector<4x16x16xf32>
    %199 = math.exp %198 : vector<4x16x16xf32>
    %cst_97 = arith.constant dense<0.000000e+00> : vector<4x16xf32>
    %200 = vector.multi_reduction <add>, %199, %cst_97 [2] : vector<4x16x16xf32> to vector<4x16xf32>
    %201 = vector.shape_cast %200 : vector<4x16xf32> to vector<4x16x1xf32>
    %202 = tpu.reciprocal %201 {approx = true} : vector<4x16x1xf32> -> vector<4x16x1xf32>
    %203 = vector.broadcast %202 : vector<4x16x1xf32> to vector<4x16x16xf32>
    %204 = arith.mulf %199, %203 : vector<4x16x16xf32>
    "tpu.trace_start"() <{level = 10 : i32, message = "hqk,hkd->hqd"}> : () -> ()
    %cst_98 = arith.constant dense<0.000000e+00> : vector<4x16x8xf32>
    %205 = tpu.matmul %204, %189, %cst_98 {dimension_numbers = #tpu.dot_dimension_numbers<[2], [1], [1], [2], [0, 0, 0, 1, 1, 2], [0], [0]>} : vector<4x16x16xf32>, vector<4x16x8xf32>, vector<4x16x8xf32> -> vector<4x16x8xf32>
    "tpu.trace_stop"() : () -> ()
    %206 = tpu.transpose %205, [1, 0, 2] : vector<4x16x8xf32> -> vector<16x4x8xf32>
    %207 = vector.shape_cast %206 : vector<16x4x8xf32> to vector<16x32xf32>
    %c1_99 = arith.constant 1 : index
    %c0_100 = arith.constant 0 : index
    %c0_101 = arith.constant 0 : index
    %208 = vector.load %arg8[%c1_99, %c0_100, %c0_101] : memref<2x32x32xf32, #tpu.memory_space<vmem>>, vector<1x32x32xf32>
    %209 = vector.shape_cast %208 : vector<1x32x32xf32> to vector<32x32xf32>
    %cst_102 = arith.constant dense<0.000000e+00> : vector<16x32xf32>
    %210 = tpu.matmul %207, %209, %cst_102 {dimension_numbers = #tpu.dot_dimension_numbers<[1], [0], [0], [1], [0, 0, 1, 1], [], []>} : vector<16x32xf32>, vector<32x32xf32>, vector<16x32xf32> -> vector<16x32xf32>
    %211 = arith.addf %151, %210 : vector<16x32xf32>
    %c1_103 = arith.constant 1 : index
    %c0_104 = arith.constant 0 : index
    %c0_105 = arith.constant 0 : index
    %212 = vector.load %arg9[%c1_103, %c0_104, %c0_105] : memref<2x1x32xf32, #tpu.memory_space<vmem>>, vector<1x1x32xf32>
    %213 = vector.shape_cast %212 : vector<1x1x32xf32> to vector<1x32xf32>
    %214 = vector.broadcast %213 : vector<1x32xf32> to vector<16x32xf32>
    %215 = arith.addf %211, %214 : vector<16x32xf32>
    %cst_106 = arith.constant dense<0.000000e+00> : vector<16xf32>
    %216 = vector.multi_reduction <add>, %215, %cst_106 [1] : vector<16x32xf32> to vector<16xf32>
    %217 = vector.shape_cast %216 : vector<16xf32> to vector<16x1xf32>
    %cst_107 = arith.constant 3.200000e+01 : f32
    %218 = vector.broadcast %cst_107 : f32 to vector<16x1xf32>
    %219 = arith.divf %217, %218 : vector<16x1xf32>
    %220 = vector.broadcast %219 : vector<16x1xf32> to vector<16x32xf32>
    %221 = arith.subf %215, %220 : vector<16x32xf32>
    %222 = arith.mulf %221, %221 : vector<16x32xf32>
    %cst_108 = arith.constant dense<0.000000e+00> : vector<16xf32>
    %223 = vector.multi_reduction <add>, %222, %cst_108 [1] : vector<16x32xf32> to vector<16xf32>
    %224 = vector.shape_cast %223 : vector<16xf32> to vector<16x1xf32>
    %cst_109 = arith.constant 3.200000e+01 : f32
    %225 = vector.broadcast %cst_109 : f32 to vector<16x1xf32>
    %226 = arith.divf %224, %225 : vector<16x1xf32>
    %227 = vector.broadcast %219 : vector<16x1xf32> to vector<16x32xf32>
    %228 = arith.subf %215, %227 : vector<16x32xf32>
    %cst_110 = arith.constant 9.99999997E-7 : f32
    %229 = vector.broadcast %cst_110 : f32 to vector<16x1xf32>
    %230 = arith.addf %226, %229 : vector<16x1xf32>
    %231 = math.rsqrt %230 : vector<16x1xf32>
    %232 = vector.broadcast %231 : vector<16x1xf32> to vector<16x32xf32>
    %233 = arith.mulf %228, %232 : vector<16x32xf32>
    %c1_111 = arith.constant 1 : index
    %c0_112 = arith.constant 0 : index
    %c0_113 = arith.constant 0 : index
    %234 = vector.load %arg10[%c1_111, %c0_112, %c0_113] : memref<2x1x32xf32, #tpu.memory_space<vmem>>, vector<1x1x32xf32>
    %235 = vector.shape_cast %234 : vector<1x1x32xf32> to vector<1x32xf32>
    %236 = vector.broadcast %235 : vector<1x32xf32> to vector<16x32xf32>
    %237 = arith.mulf %233, %236 : vector<16x32xf32>
    %c1_114 = arith.constant 1 : index
    %c0_115 = arith.constant 0 : index
    %c0_116 = arith.constant 0 : index
    %238 = vector.load %arg11[%c1_114, %c0_115, %c0_116] : memref<2x1x32xf32, #tpu.memory_space<vmem>>, vector<1x1x32xf32>
    %239 = vector.shape_cast %238 : vector<1x1x32xf32> to vector<1x32xf32>
    %240 = vector.broadcast %239 : vector<1x32xf32> to vector<16x32xf32>
    %241 = arith.addf %237, %240 : vector<16x32xf32>
    %c1_117 = arith.constant 1 : index
    %c0_118 = arith.constant 0 : index
    %c0_119 = arith.constant 0 : index
    %242 = vector.load %arg12[%c1_117, %c0_118, %c0_119] : memref<2x32x128xf32, #tpu.memory_space<vmem>>, vector<1x32x128xf32>
    %243 = vector.shape_cast %242 : vector<1x32x128xf32> to vector<32x128xf32>
    %cst_120 = arith.constant dense<0.000000e+00> : vector<16x128xf32>
    %244 = tpu.matmul %241, %243, %cst_120 {dimension_numbers = #tpu.dot_dimension_numbers<[1], [0], [0], [1], [0, 0, 1, 1], [], []>} : vector<16x32xf32>, vector<32x128xf32>, vector<16x128xf32> -> vector<16x128xf32>
    %c1_121 = arith.constant 1 : index
    %c0_122 = arith.constant 0 : index
    %c0_123 = arith.constant 0 : index
    %245 = vector.load %arg13[%c1_121, %c0_122, %c0_123] : memref<2x1x128xf32, #tpu.memory_space<vmem>>, vector<1x1x128xf32>
    %246 = vector.shape_cast %245 : vector<1x1x128xf32> to vector<1x128xf32>
    %247 = vector.broadcast %246 : vector<1x128xf32> to vector<16x128xf32>
    %248 = arith.addf %244, %247 : vector<16x128xf32>
    %cst_124 = arith.constant 5.000000e-01 : f32
    %249 = vector.broadcast %cst_124 : f32 to vector<16x128xf32>
    %250 = arith.mulf %249, %248 : vector<16x128xf32>
    %cst_125 = arith.constant 0.707106769 : f32
    %251 = vector.broadcast %cst_125 : f32 to vector<16x128xf32>
    %252 = arith.mulf %248, %251 : vector<16x128xf32>
    %cst_126 = arith.constant 0.000000e+00 : f32
    %253 = vector.broadcast %cst_126 : f32 to vector<16x128xf32>
    %254 = arith.cmpf oge, %252, %253 : vector<16x128xf32>
    %cst_127 = arith.constant 1.000000e+00 : f32
    %cst_128 = arith.constant -1.000000e+00 : f32
    %255 = vector.broadcast %cst_127 : f32 to vector<16x128xf32>
    %256 = vector.broadcast %cst_128 : f32 to vector<16x128xf32>
    %257 = arith.select %254, %255, %256 : vector<16x128xi1>, vector<16x128xf32>
    %258 = math.absf %252 : vector<16x128xf32>
    %cst_129 = arith.constant 0.327591091 : f32
    %259 = vector.broadcast %cst_129 : f32 to vector<16x128xf32>
    %260 = arith.mulf %259, %258 : vector<16x128xf32>
    %cst_130 = arith.constant 1.000000e+00 : f32
    %261 = vector.broadcast %cst_130 : f32 to vector<16x128xf32>
    %262 = arith.addf %261, %260 : vector<16x128xf32>
    %cst_131 = arith.constant 1.000000e+00 : f32
    %263 = vector.broadcast %cst_131 : f32 to vector<16x128xf32>
    %264 = arith.divf %263, %262 : vector<16x128xf32>
    %cst_132 = arith.constant 1.06140542 : f32
    %265 = vector.broadcast %cst_132 : f32 to vector<16x128xf32>
    %266 = arith.mulf %265, %264 : vector<16x128xf32>
    %cst_133 = arith.constant -1.45315206 : f32
    %267 = vector.broadcast %cst_133 : f32 to vector<16x128xf32>
    %268 = arith.addf %266, %267 : vector<16x128xf32>
    %269 = arith.mulf %268, %264 : vector<16x128xf32>
    %cst_134 = arith.constant 1.42141378 : f32
    %270 = vector.broadcast %cst_134 : f32 to vector<16x128xf32>
    %271 = arith.addf %269, %270 : vector<16x128xf32>
    %272 = arith.mulf %271, %264 : vector<16x128xf32>
    %cst_135 = arith.constant -0.284496725 : f32
    %273 = vector.broadcast %cst_135 : f32 to vector<16x128xf32>
    %274 = arith.addf %272, %273 : vector<16x128xf32>
    %275 = arith.mulf %274, %264 : vector<16x128xf32>
    %cst_136 = arith.constant 0.254829586 : f32
    %276 = vector.broadcast %cst_136 : f32 to vector<16x128xf32>
    %277 = arith.addf %275, %276 : vector<16x128xf32>
    %278 = arith.mulf %277, %264 : vector<16x128xf32>
    %cst_137 = arith.constant 0.000000e+00 : f32
    %279 = vector.broadcast %cst_137 : f32 to vector<16x128xf32>
    %280 = arith.subf %279, %258 : vector<16x128xf32>
    %281 = arith.mulf %280, %258 : vector<16x128xf32>
    %282 = math.exp %281 : vector<16x128xf32>
    %283 = arith.mulf %278, %282 : vector<16x128xf32>
    %cst_138 = arith.constant 1.000000e+00 : f32
    %284 = vector.broadcast %cst_138 : f32 to vector<16x128xf32>
    %285 = arith.subf %284, %283 : vector<16x128xf32>
    %286 = arith.mulf %257, %285 : vector<16x128xf32>
    %cst_139 = arith.constant 1.000000e+00 : f32
    %287 = vector.broadcast %cst_139 : f32 to vector<16x128xf32>
    %288 = arith.addf %287, %286 : vector<16x128xf32>
    %289 = arith.mulf %250, %288 : vector<16x128xf32>
    %c1_140 = arith.constant 1 : index
    %c0_141 = arith.constant 0 : index
    %c0_142 = arith.constant 0 : index
    %290 = vector.load %arg14[%c1_140, %c0_141, %c0_142] : memref<2x128x32xf32, #tpu.memory_space<vmem>>, vector<1x128x32xf32>
    %291 = vector.shape_cast %290 : vector<1x128x32xf32> to vector<128x32xf32>
    %cst_143 = arith.constant dense<0.000000e+00> : vector<16x32xf32>
    %292 = tpu.matmul %289, %291, %cst_143 {dimension_numbers = #tpu.dot_dimension_numbers<[1], [0], [0], [1], [0, 0, 1, 1], [], []>} : vector<16x128xf32>, vector<128x32xf32>, vector<16x32xf32> -> vector<16x32xf32>
    %293 = arith.addf %215, %292 : vector<16x32xf32>
    %c1_144 = arith.constant 1 : index
    %c0_145 = arith.constant 0 : index
    %c0_146 = arith.constant 0 : index
    %294 = vector.load %arg15[%c1_144, %c0_145, %c0_146] : memref<2x1x32xf32, #tpu.memory_space<vmem>>, vector<1x1x32xf32>
    %295 = vector.shape_cast %294 : vector<1x1x32xf32> to vector<1x32xf32>
    %296 = vector.broadcast %295 : vector<1x32xf32> to vector<16x32xf32>
    %297 = arith.addf %293, %296 : vector<16x32xf32>
    %298 = vector.extract_strided_slice %297 {offsets = [9, 0], sizes = [4, 32], strides = [1, 1]} : vector<16x32xf32> to vector<4x32xf32>
    %299 = vector.shape_cast %298 : vector<4x32xf32> to vector<1x4x32xf32>
    %c0_147 = arith.constant 0 : index
    %c0_148 = arith.constant 0 : index
    %c0_149 = arith.constant 0 : index
    %300 = vector.load %arg16[%c0_147, %c0_148, %c0_149] : memref<1x4x32xf32, #tpu.memory_space<vmem>>, vector<1x4x32xf32>
    tpu.vector_store %arg16[%c0_147, %c0_148, %c0_149], %299 {strides = array<i32>} : memref<1x4x32xf32, #tpu.memory_space<vmem>>, vector<1x4x32xf32>,
    return
  }
  func.func @transform_0(%arg0: i32) -> (i32, i32, i32) {
    %c0_i32 = arith.constant 0 : i32
    %c0_i32_0 = arith.constant 0 : i32
    %c0_i32_1 = arith.constant 0 : i32
    return %arg0, %c0_i32, %c0_i32_0 : i32, i32, i32
  }
  func.func @transform_1(%arg0: i32) -> (i32, i32, i32) {
    %c0_i32 = arith.constant 0 : i32
    %c0_i32_0 = arith.constant 0 : i32
    %c0_i32_1 = arith.constant 0 : i32
    return %arg0, %c0_i32, %c0_i32_0 : i32, i32, i32
  }
  func.func @transform_2(%arg0: i32) -> (i32, i32) {
    %c0_i32 = arith.constant 0 : i32
    %c0_i32_0 = arith.constant 0 : i32
    %c0_i32_1 = arith.constant 0 : i32
    return %c0_i32, %c0_i32_0 : i32, i32
  }
  func.func @transform_3(%arg0: i32) -> (i32, i32, i32) {
    %c0_i32 = arith.constant 0 : i32
    %c0_i32_0 = arith.constant 0 : i32
    %c0_i32_1 = arith.constant 0 : i32
    %c0_i32_2 = arith.constant 0 : i32
    return %c0_i32, %c0_i32_0, %c0_i32_1 : i32, i32, i32
  }
  func.func @transform_4(%arg0: i32) -> (i32, i32, i32) {
    %c0_i32 = arith.constant 0 : i32
    %c0_i32_0 = arith.constant 0 : i32
    %c0_i32_1 = arith.constant 0 : i32
    %c0_i32_2 = arith.constant 0 : i32
    return %c0_i32, %c0_i32_0, %c0_i32_1 : i32, i32, i32
  }
  func.func @transform_5(%arg0: i32) -> (i32, i32, i32) {
    %c0_i32 = arith.constant 0 : i32
    %c0_i32_0 = arith.constant 0 : i32
    %c0_i32_1 = arith.constant 0 : i32
    %c0_i32_2 = arith.constant 0 : i32
    return %c0_i32, %c0_i32_0, %c0_i32_1 : i32, i32, i32
  }
  func.func @transform_6(%arg0: i32) -> (i32, i32, i32) {
    %c0_i32 = arith.constant 0 : i32
    %c0_i32_0 = arith.constant 0 : i32
    %c0_i32_1 = arith.constant 0 : i32
    %c0_i32_2 = arith.constant 0 : i32
    return %c0_i32, %c0_i32_0, %c0_i32_1 : i32, i32, i32
  }
  func.func @transform_7(%arg0: i32) -> (i32, i32, i32) {
    %c0_i32 = arith.constant 0 : i32
    %c0_i32_0 = arith.constant 0 : i32
    %c0_i32_1 = arith.constant 0 : i32
    %c0_i32_2 = arith.constant 0 : i32
    return %c0_i32, %c0_i32_0, %c0_i32_1 : i32, i32, i32
  }
  func.func @transform_8(%arg0: i32) -> (i32, i32, i32) {
    %c0_i32 = arith.constant 0 : i32
    %c0_i32_0 = arith.constant 0 : i32
    %c0_i32_1 = arith.constant 0 : i32
    %c0_i32_2 = arith.constant 0 : i32
    return %c0_i32, %c0_i32_0, %c0_i32_1 : i32, i32, i32
  }
  func.func @transform_9(%arg0: i32) -> (i32, i32, i32) {
    %c0_i32 = arith.constant 0 : i32
    %c0_i32_0 = arith.constant 0 : i32
    %c0_i32_1 = arith.constant 0 : i32
    %c0_i32_2 = arith.constant 0 : i32
    return %c0_i32, %c0_i32_0, %c0_i32_1 : i32, i32, i32
  }
  func.func @transform_10(%arg0: i32) -> (i32, i32, i32) {
    %c0_i32 = arith.constant 0 : i32
    %c0_i32_0 = arith.constant 0 : i32
    %c0_i32_1 = arith.constant 0 : i32
    %c0_i32_2 = arith.constant 0 : i32
    return %c0_i32, %c0_i32_0, %c0_i32_1 : i32, i32, i32
  }
  func.func @transform_11(%arg0: i32) -> (i32, i32, i32) {
    %c0_i32 = arith.constant 0 : i32
    %c0_i32_0 = arith.constant 0 : i32
    %c0_i32_1 = arith.constant 0 : i32
    %c0_i32_2 = arith.constant 0 : i32
    return %c0_i32, %c0_i32_0, %c0_i32_1 : i32, i32, i32
  }
  func.func @transform_12(%arg0: i32) -> (i32, i32, i32) {
    %c0_i32 = arith.constant 0 : i32
    %c0_i32_0 = arith.constant 0 : i32
    %c0_i32_1 = arith.constant 0 : i32
    %c0_i32_2 = arith.constant 0 : i32
    return %c0_i32, %c0_i32_0, %c0_i32_1 : i32, i32, i32
  }
  func.func @transform_13(%arg0: i32) -> (i32, i32, i32) {
    %c0_i32 = arith.constant 0 : i32
    %c0_i32_0 = arith.constant 0 : i32
    %c0_i32_1 = arith.constant 0 : i32
    %c0_i32_2 = arith.constant 0 : i32
    return %c0_i32, %c0_i32_0, %c0_i32_1 : i32, i32, i32
  }
  func.func @transform_14(%arg0: i32) -> (i32, i32, i32) {
    %c0_i32 = arith.constant 0 : i32
    %c0_i32_0 = arith.constant 0 : i32
    %c0_i32_1 = arith.constant 0 : i32
    %c0_i32_2 = arith.constant 0 : i32
    return %c0_i32, %c0_i32_0, %c0_i32_1 : i32, i32, i32
  }
  func.func @transform_15(%arg0: i32) -> (i32, i32, i32) {
    %c0_i32 = arith.constant 0 : i32
    %c0_i32_0 = arith.constant 0 : i32
    %c0_i32_1 = arith.constant 0 : i32
    return %arg0, %c0_i32, %c0_i32_0 : i32, i32, i32
  }
}

</mosaic_0001>

<bundles_post_ra>
// kernel: custom-call.6
= control target key start
LH: loop header
LB: loop body
LE: loop exit
PB: predicated region body
PF: predicated region fallthrough
CT: control target
= control target key end

     0   :  { %s6_s0 = inlined_call_operand.vmem [shape: f32[2,64], index: 0, kind: output, shape index: {}]  }

// kernel: neg.1
= control target key start
LH: loop header
LB: loop body
LE: loop exit
PB: predicated region body
PF: predicated region fallthrough
CT: control target
= control target key end

     0   :  { %s40_s0 = inlined_call_operand.vmem [shape: f32[2,8,64], index: 0, kind: input, shape index: {}]   ;;  %s41_s1 = inlined_call_operand.vmem [shape: f32[2,8,64], index: 1, kind: output, shape index: {}]  }
   0x1   :  { %v2_v0 = vld [vmem:[%s40_s0] sm:$0xff]  ;;  %v16_v1 = vld [vmem:[%s40_s0 + $0x8] sm:$0xff] }
   0x2   :  { %v5_v2 = vxor.u32 2147483648, %v2_v0  ;;  %v12_v3 = vxor.u32 2147483648, %v16_v1 }
   0x4   :  { %7 = vst [vmem:[%s41_s1] sm:$0xff] %v5_v2  ;;  %17 = vst [vmem:[%s41_s1 + $0x8] sm:$0xff] %v12_v3 }

// kernel: point_transformer_mae_forward.2
= control target key start
LH: loop header
LB: loop body
LE: loop exit
PB: predicated region body
PF: predicated region fallthrough
CT: control target
= control target key end

     0   :  { %s4057_s24 = smov 0   ;;  %s5172_s0 = inlined_call_operand.vmem [shape: f32[128,3], index: 0, kind: input, shape index: {}]   ;;  %s5173_s1 = inlined_call_operand.vmem [shape: f32[16,3], index: 1, kind: input, shape index: {}]   ;;  %s5174_s2 = inlined_call_operand.vmem [shape: f32[3,128], index: 2, kind: input, shape index: {}]   ;;  %s5175_s3 = inlined_call_operand.vmem [shape: f32[1,128], index: 3, kind: input, shape index: {}]   ;;  %s5176_s4 = inlined_call_operand.vmem [shape: bf16[128,256], index: 4, kind: input, shape index: {}]   ;;  %s5177_s5 = inlined_call_operand.vmem [shape: f32[1,256], index: 5, kind: input, shape index: {}]   ;;  %s5178_s6 = inlined_call_operand.vmem [shape: bf16[256,512], index: 6, kind: input, shape index: {}]   ;;  %s5179_s7 = inlined_call_operand.vmem [shape: bf16[256,512], index: 7, kind: input, shape index: {}]   ;;  %s5180_s8 = inlined_call_operand.vmem [shape: f32[1,512], index: 8, kind: input, shape index: {}]   ;;  %s5181_s9 = inlined_call_operand.vmem [shape: bf16[512,64], index: 9, kind: input, shape index: {}]   ;;  %s5182_s10 = inlined_call_operand.vmem [shape: f32[1,64], index: 10, kind: input, shape index: {}]   ;;  %s5183_s11 = inlined_call_operand.vmem [shape: f32[64,32], index: 11, kind: input, shape index: {}]   ;;  %s5184_s12 = inlined_call_operand.vmem [shape: f32[1,32], index: 12, kind: input, shape index: {}]   ;;  %s5185_s13 = inlined_call_operand.vmem [shape: f32[3,128], index: 13, kind: input, shape index: {}]   ;;  %s5186_s14 = inlined_call_operand.vmem [shape: f32[1,128], index: 14, kind: input, shape index: {}]   ;;  %s5187_s15 = inlined_call_operand.vmem [shape: f32[128,32], index: 15, kind: input, shape index: {}]   ;;  %s5188_s16 = inlined_call_operand.vmem [shape: f32[1,32], index: 16, kind: input, shape index: {}]   ;;  %s5189_s17 = inlined_call_operand.vmem [shape: f32[16,64], index: 17, kind: output, shape index: {}]  }
   0x1   :  { %5192 = sst [smem:[#allocation2_spill]] %s5172_s0 }
   0x2   :  { %5193 = sst [smem:[#allocation3_spill]] %s5173_s1 }
   0x3 LB: > { %s4063_s25 = sadd.s32 4294967295, %s3956_s24   ;;  %p3271_p0 = scmp.ge.s32.totalorder %s3956_s24, 1  ;;  %s3956_s24 = sphi %s4057_s24, %s27_s24  }
   0x4   : > { %p497_p1 = scmp.lt.s32.totalorder %s3956_s24, 3 }
   0x6   : > { %p498_p2 = pnand %p3271_p0, %p497_p1 }
   0x7   : > { %s3272_s26 = sshll.u32 (!%p498_p2), %s4063_s25, 3  ;;  %v3958_v0 = vmov (!%p498_p2), 1   ;;  %v3959_v1 = vmov (!%p498_p2), 0   ;;  %v3698_v2 = vld [vmem:[%s5176_s4 + $0x4] ss:$8 sps:$4 sm:$0xff] (!%p498_p2)   ;;  %s5194_s23 = sld [smem:[#allocation2_spill]] (!%p498_p2) }
   0x8   : > { %501 = sbr.rel (%p498_p2) target bundleno = 1227 (0x4cb), region = 88  ;;  %3680 = vset.pattern.permute.xlu1 (!%p498_p2), %v3958_v0  ;;  %3679 = vset.pattern.permute.xlu0 (!%p498_p2), %v3959_v1  ;;  %p553_p3 = scmp.lt.s32.totalorder (!%p498_p2), %s3272_s26, 15  ;;  %v3700_v3 = vld [vmem:[%s5176_s4] ss:$8 sps:$4 sm:$0xff] (!%p498_p2)   ;;  %v3701_v4 = vld [vmem:[%s5176_s4 + $0x14] ss:$8 sps:$4 sm:$0xff] (!%p498_p2)  }
   0x9   : > { %901 = vmatprep.mubr.bf16.mxu0 (!%p498_p2), %v3959_v1  ;;  %869 = vmatprep.subr.bf16.mxu0 (!%p498_p2), %v3698_v2  ;;  %v3703_v5 = vld [vmem:[%s5176_s4 + $0x10] ss:$8 sps:$4 sm:$0xff] (!%p498_p2)   ;;  %v3704_v6 = vld [vmem:[%s5176_s4 + $0x24] ss:$8 sps:$4 sm:$0xff] (!%p498_p2)   ;;  %v3706_v9 = vld [vmem:[%s5176_s4 + $0x20] ss:$8 sps:$4 sm:$0xff] (!%p498_p2)  }
   0xa   : > { %870 = vmatpush1.bf16.msra.mxu0 (!%p498_p2), %v3700_v3  ;;  %v3707_v10 = vld [vmem:[%s5176_s4 + $0x34] ss:$8 sps:$4 sm:$0xff] (!%p498_p2)   ;;  %v3709_v12 = vld [vmem:[%s5176_s4 + $0x30] ss:$8 sps:$4 sm:$0xff] (!%p498_p2)   ;;  %v3710_v13 = vld [vmem:[%s5176_s4 + $0x44] ss:$8 sps:$4 sm:$0xff] (!%p498_p2)  }
   0xb   : > { %871 = vmatprep.subr.bf16.mxu0 (!%p498_p2), %v3701_v4  ;;  %v3960_v14 = vmov (!%p498_p2), 2   ;;  %v3712_v16 = vld [vmem:[%s5176_s4 + $0x40] ss:$8 sps:$4 sm:$0xff] (!%p498_p2)   ;;  %v3713_v17 = vld [vmem:[%s5176_s4 + $0x54] ss:$8 sps:$4 sm:$0xff] (!%p498_p2)   ;;  %vm1150_vm0 = vcmask (!%p498_p2), 1041409  }
   0xc   : > { %v3715_v18 = vld [vmem:[%s5176_s4 + $0x50] ss:$8 sps:$4 sm:$0xff] (!%p498_p2)   ;;  %v3716_v19 = vld [vmem:[%s5176_s4 + $0x64] ss:$8 sps:$4 sm:$0xff] (!%p498_p2)   ;;  %v3718_v20 = vld [vmem:[%s5176_s4 + $0x60] ss:$8 sps:$4 sm:$0xff] (!%p498_p2)  }
   0xd   : > { %v3719_v22 = vld [vmem:[%s5176_s4 + $0x74] ss:$8 sps:$4 sm:$0xff] (!%p498_p2)   ;;  %v3721_v23 = vld [vmem:[%s5176_s4 + $0x70] ss:$8 sps:$4 sm:$0xff] (!%p498_p2)   ;;  %v4150_v31 = vld [vmem:[%s5174_s2 + $0x1] ss:$0 sm:$0xff] (!%p498_p2) }
   0xe   : > { %872 = vmatpush1.bf16.msra.mxu0 (!%p498_p2), %v3703_v5  ;;  %v4155_v32 = vld [vmem:[%s5174_s2] ss:$0 sm:$0xff] (!%p498_p2)  ;;  %v4162_v35 = vld [vmem:[%s5174_s2 + $0x2] ss:$0 sm:$0xff] (!%p498_p2)  ;;  %vm1152_vm1 = vcmask (!%p498_p2), 1042434   ;;  %vm1154_vm2 = vcmask (!%p498_p2), 1043459  }
   0xf   : > { %s5216_s26 = smov (!%p553_p3, %s3272_s26), 15  ;;  %873 = vmatprep.subr.bf16.mxu0 %v3704_v6  ;;  %v4170_v43 = vld [vmem:[%s5175_s3] ss:$0 sm:$0xff]  ;;  %p558_p4 = scmp.lt.s32.totalorder %s4063_s25, 1  ;;  %vm1156_vm3 = vcmask 1044484   ;;  %vm1158_vm4 = vcmask 1045509  }
  0x10   : > { %s3273_s20 = sshll.u32 %s5216_s26, 3  ;;  %s5195_s29 = sld [smem:[#allocation3_spill]]  ;;  %vm1160_vm5 = vcmask 1046534   ;;  %vm1162_vm6 = vcmask 1047559   ;;  %vm3964_vm8 = vmmov 0   ;;  %vm2874_vm9 = vcmask 523264  }
  0x11   : > { %s4086_s27 = scalar_lea.vmem %s5194_s23, %s3273_s20  ;;  %s5218_s25 = smov (!%p558_p4, %s4063_s25), 1  ;;  %vm3199_vm10 = vcmask 261120  }
  0x12   : > { %v567_v7 = vld [vmem:[%s4086_s27] sm:$0xff]  ;;  %v568_v8 = vld [vmem:[%s4086_s27 + $0x8] sm:$0xff]  ;;  %v570_v11 = vld [vmem:[%s4086_s27 + $0x18] sm:$0xff]  ;;  %874 = vmatpush1.bf16.msra.mxu0 %v3706_v9  ;;  %s3274_s23 = sshll.u32 %s5218_s25, 3 }
  0x13   : > { %630 = vperm.xlu1 %3680, %v567_v7   ;;  %578 = vperm.xlu0 %3679, %v567_v7   ;;  %v569_v15 = vld [vmem:[%s4086_s27 + $0x10] sm:$0xff]  ;;  %v571_v21 = vld [vmem:[%s4086_s27 + $0x20] sm:$0xff]  ;;  %v572_v24 = vld [vmem:[%s4086_s27 + $0x28] sm:$0xff]  ;;  %s565_s19 = scalar_lea.vmem %s5189_s17, %s3274_s23 }
  0x14   : > { %875 = vmatprep.subr.bf16.mxu0 %v3707_v10  ;;  %v574_v25 = vld [vmem:[%s4086_s27 + $0x38] sm:$0xff]  ;;  %v573_v26 = vld [vmem:[%s4086_s27 + $0x30] sm:$0xff] }
  0x16   : > { %876 = vmatpush1.bf16.msra.mxu0 %v3709_v12  ;;  %s561_s26 = scalar_lea.vmem %s5195_s29, %s3274_s23  ;;  %s3966_s29 = smov 32  }
  0x17   : > { %634 = vperm.xlu1 %3680, %v568_v8   ;;  %583 = vperm.xlu0 %3679, %v568_v8  }
  0x18   : > { %877 = vmatprep.subr.bf16.mxu0 %v3710_v13 }
  0x1a   : > { %878 = vmatpush1.bf16.msra.mxu0 %v3712_v16 }
  0x1b   : > { %3681 = vset.pattern.permute.xlu1 %v3960_v14  ;;  %593 = vperm.xlu0 %3679, %v570_v11  }
  0x1c   : > { %687 = vperm.xlu1 %3681, %v568_v8   ;;  %879 = vmatprep.subr.bf16.mxu0 %v3713_v17 }
  0x1e   : > { %880 = vmatpush1.bf16.msra.mxu0 %v3715_v18 }
  0x1f   : > { %3683 = vset.pattern.permute.xlu0 %v3960_v14  ;;  %881 = vmatprep.subr.bf16.mxu0 %v3716_v19 }
  0x20   : > { %3682 = vset.pattern.permute.xlu1 %v3959_v1  ;;  %683 = vperm.xlu0 %3683, %v567_v7  }
  0x21   : > { %588 = vperm.xlu1 %3682, %v569_v15  }
  0x22   : > { %882 = vmatpush1.bf16.msra.mxu0 %v3718_v20 }
  0x23   : > { %883 = vmatprep.subr.bf16.mxu0 %v3719_v22 }
  0x24   : > { %691 = vperm.xlu0 %3683, %v569_v15  }
  0x25   : > { %3684 = vset.pattern.permute.xlu1 %v3958_v0 }
  0x26   : > { %638 = vperm.xlu1 %3684, %v569_v15   ;;  %884 = vmatpush1.bf16.msra.mxu0 %v3721_v23 }
  0x28   : > { %699 = vperm.xlu0 %3683, %v571_v21  }
  0x2a   : > { %642 = vperm.xlu1 %3684, %v570_v11  }
  0x2c   : > { %3688 = vset.pattern.permute.xlu0 %v3959_v1 }
  0x2d   : > { %603 = vperm.xlu0 %3688, %v572_v24  }
  0x2e   : > { %3685 = vset.pattern.permute.xlu1 %v3960_v14 }
  0x2f   : > { %695 = vperm.xlu1 %3685, %v570_v11  }
  0x31   : > { %613 = vperm.xlu0 %3688, %v574_v25  }
  0x33   : > { %3686 = vset.pattern.permute.xlu1 %v3959_v1 }
  0x34   : > { %598 = vperm.xlu1 %3686, %v571_v21  }
  0x35   : > { %3692 = vset.pattern.permute.xlu0 %v3960_v14 }
  0x36   : > { %707 = vperm.xlu0 %3692, %v573_v26  }
  0x38   : > { %3687 = vset.pattern.permute.xlu1 %v3958_v0 }
  0x39   : > { %646 = vperm.xlu1 %3687, %v571_v21  }
  0x3a   : > { %3695 = vset.pattern.permute.xlu0 %v3958_v0 }
  0x3d   : > { %650 = vperm.xlu1 %3687, %v572_v24  }
  0x41   : > { %3689 = vset.pattern.permute.xlu1 %v3960_v14 }
  0x42   : > { %703 = vperm.xlu1 %3689, %v572_v24  }
  0x46   : > { %3690 = vset.pattern.permute.xlu1 %v3959_v1 }
  0x47   : > { %608 = vperm.xlu1 %3690, %v573_v26  }
  0x4b   : > { %3691 = vset.pattern.permute.xlu1 %v3958_v0 }
  0x4c   : > { %654 = vperm.xlu1 %3691, %v573_v26  }
  0x50   : > { %658 = vperm.xlu1 %3691, %v574_v25  }
  0x54   : > { %3693 = vset.pattern.permute.xlu1 %v3960_v14 }
  0x55   : > { %711 = vperm.xlu1 %3693, %v574_v25  }
  0x59   : > { %3694 = vset.pattern.permute.xlu1 %v3959_v1 }
  0x92   : > { %v631_v27 = vpop.permute.xlu1 %630  ;;  %v579_v28 = vpop.permute.xlu0 %578 }
  0x93   : > { %v665_v38 = vmul.f32 %v4150_v31, %v631_v27  ;;  %v620_v39 = vmul.f32 %v4155_v32, %v579_v28 }
  0x95   : > { %v673_v45 = vadd.f32 %v665_v38, %v620_v39 }
  0x96   : > { %v635_v29 = vpop.permute.xlu1 %634  ;;  %v584_v30 = vpop.permute.xlu0 %583 }
  0x97   : > { %v666_v33 = vmul.f32 %v4150_v31, %v635_v29  ;;  %v621_v34 = vmul.f32 %v4155_v32, %v584_v30 }
  0x99   : > { %v674_v40 = vadd.f32 %v666_v33, %v621_v34 }
  0x9a   : > { %v594_v36 = vpop.permute.xlu0 %593 }
  0x9b   : > { %v688_v37 = vpop.permute.xlu1 %687  ;;  %v623_v61 = vmul.f32 %v4155_v32, %v594_v36 }
  0x9c   : > { %v719_v41 = vmul.f32 %v4162_v35, %v688_v37 }
  0x9e   : > { %v727_v42 = vadd.f32 %v719_v41, %v674_v40 }
  0x9f   : > { %v684_v44 = vpop.permute.xlu0 %683 }
  0xa0   : > { %v718_v46 = vmul.f32 %v4162_v35, %v684_v44  ;;  %v589_v47 = vpop.permute.xlu1 %588  ;;  %v742_v48 = vadd.f32 %v4170_v43, %v727_v42 }
  0xa1   : > { %v622_v56 = vmul.f32 %v4155_v32, %v589_v47 }
  0xa2   : > { %v726_v49 = vadd.f32 %v718_v46, %v673_v45  ;;  %v750_v52 = vmax.f32 %v742_v48, 0.0 }
  0xa3   : > { %v692_v55 = vpop.permute.xlu0 %691 }
  0xa4   : > { %v741_v50 = vadd.f32 %v4170_v43, %v726_v49  ;;  %v720_v59 = vmul.f32 %v4162_v35, %v692_v55 }
  0xa5   : > { %v639_v51 = vpop.permute.xlu1 %638 }
  0xa6   : > { %v749_v53 = vmax.f32 %v741_v50, 0.0  ;;  %v667_v54 = vmul.f32 %v4150_v31, %v639_v51 }
  0xa7   : > { %v700_v10 = vpop.permute.xlu0 %699 }
  0xa8   : > { %v757_v57 = vpack.c.bf16 %v750_v52, %v749_v53  ;;  %v675_v58 = vadd.f32 %v667_v54, %v622_v56  ;;  %v722_v18 = vmul.f32 %v4162_v35, %v700_v10  ;;  %v3728_v56 = vld [vmem:[%s5178_s6 + $0x24] ss:$16 sps:$4 sm:$0xff]   ;;  %v3756_v10 = vld [vmem:[%s5178_s6 + $0xac] ss:$16 sps:$4 sm:$0xff]  }
  0xa9   : > { %v643_v60 = vpop.permute.xlu1 %642 }
  0xaa   : > { %902 = vmatmul.mubr.bf16.vlgmr.msra.gmra.mrb[0].mxu0 %v757_v57  ;;  %v668_v62 = vmul.f32 %v4150_v31, %v643_v60  ;;  %v728_v63 = vadd.f32 %v720_v59, %v675_v58  ;;  %v3732_v57 = vld [vmem:[%s5178_s6 + $0x2c] ss:$16 sps:$4 sm:$0xff]   ;;  %v3730_v58 = vld [vmem:[%s5178_s6 + $0x28] ss:$16 sps:$4 sm:$0xff]   ;;  %v3733_v59 = vld [vmem:[%s5178_s6 + $0x20] ss:$16 sps:$4 sm:$0xff]  }
  0xab   : > { %911 = vmatprep.mubr.bf16.mxu0 %v3959_v1  ;;  %v3734_v60 = vld [vmem:[%s5178_s6 + $0x44] ss:$16 sps:$4 sm:$0xff]  }
  0xac   : > { %v676_v2 = vadd.f32 %v668_v62, %v623_v61  ;;  %v743_v4 = vadd.f32 %v4170_v43, %v728_v63  ;;  %v604_v16 = vpop.permute.xlu0 %603  ;;  %v3738_v61 = vld [vmem:[%s5178_s6 + $0x4c] ss:$16 sps:$4 sm:$0xff]   ;;  %v3736_v62 = vld [vmem:[%s5178_s6 + $0x48] ss:$16 sps:$4 sm:$0xff]   ;;  %v3739_v63 = vld [vmem:[%s5178_s6 + $0x40] ss:$16 sps:$4 sm:$0xff]  }
  0xad   : > { %v625_v21 = vmul.f32 %v4155_v32, %v604_v16  ;;  %v3760_v16 = vld [vmem:[%s5178_s6 + $0xc8] ss:$16 sps:$4 sm:$0xff]  }
  0xae   : > { %v696_v0 = vpop.permute.xlu1 %695  ;;  %v751_v8 = vmax.f32 %v743_v4, 0.0  ;;  %v3745_v4 = vld [vmem:[%s5178_s6 + $0x60] ss:$16 sps:$4 sm:$0xff]  }
  0xaf   : > { %v721_v3 = vmul.f32 %v4162_v35, %v696_v0  ;;  %v3740_v0 = vld [vmem:[%s5178_s6 + $0x64] ss:$16 sps:$4 sm:$0xff]  }
  0xb0   : > { %v614_v30 = vpop.permute.xlu0 %613 }
  0xb1   : > { %v729_v5 = vadd.f32 %v721_v3, %v676_v2  ;;  %v627_v46 = vmul.f32 %v4155_v32, %v614_v30  ;;  %v3744_v2 = vld [vmem:[%s5178_s6 + $0x6c] ss:$16 sps:$4 sm:$0xff]   ;;  %v3742_v3 = vld [vmem:[%s5178_s6 + $0x68] ss:$16 sps:$4 sm:$0xff]   ;;  %v3782_v30 = vld [vmem:[%s5178_s6 + $0x144] ss:$16 sps:$4 sm:$0xff]  }
  0xb3   : > { %v744_v6 = vadd.f32 %v4170_v43, %v729_v5  ;;  %v599_v7 = vpop.permute.xlu1 %598  ;;  %v3746_v5 = vld [vmem:[%s5178_s6 + $0x84] ss:$16 sps:$4 sm:$0xff]  }
  0xb4   : > { %v624_v15 = vmul.f32 %v4155_v32, %v599_v7  ;;  %v3748_v7 = vld [vmem:[%s5178_s6 + $0x88] ss:$16 sps:$4 sm:$0xff]  }
  0xb5   : > { %v752_v9 = vmax.f32 %v744_v6, 0.0  ;;  %v708_v39 = vpop.permute.xlu0 %707  ;;  %v3750_v6 = vld [vmem:[%s5178_s6 + $0x8c] ss:$16 sps:$4 sm:$0xff]  }
  0xb6   : > { %v724_v42 = vmul.f32 %v4162_v35, %v708_v39  ;;  %v3790_v39 = vld [vmem:[%s5178_s6 + $0x168] ss:$16 sps:$4 sm:$0xff]  }
  0xb7   : > { %v758_v11 = vpack.c.bf16 %v752_v9, %v751_v8  ;;  %v3751_v8 = vld [vmem:[%s5178_s6 + $0x80] ss:$16 sps:$4 sm:$0xff]   ;;  %v3752_v9 = vld [vmem:[%s5178_s6 + $0xa4] ss:$16 sps:$4 sm:$0xff]  }
  0xb8   : > { %v647_v12 = vpop.permute.xlu1 %646 }
  0xb9   : > { %v669_v13 = vmul.f32 %v4150_v31, %v647_v12  ;;  %912 = vmatmul.mubr.bf16.gmra.mrb[4].mxu0 %v758_v11  ;;  %v3754_v11 = vld [vmem:[%s5178_s6 + $0xa8] ss:$16 sps:$4 sm:$0xff]   ;;  %v3757_v12 = vld [vmem:[%s5178_s6 + $0xa0] ss:$16 sps:$4 sm:$0xff]  }
  0xba   : > { %921 = vmatprep.mubr.bf16.mxu0 %v3959_v1 }
  0xbb   : > { %v677_v17 = vadd.f32 %v669_v13, %v624_v15  ;;  %v3758_v13 = vld [vmem:[%s5178_s6 + $0xc4] ss:$16 sps:$4 sm:$0xff]   ;;  %v3762_v15 = vld [vmem:[%s5178_s6 + $0xcc] ss:$16 sps:$4 sm:$0xff]  }
  0xbc   : > { %v651_v19 = vpop.permute.xlu1 %650 }
  0xbd   : > { %v670_v20 = vmul.f32 %v4150_v31, %v651_v19  ;;  %v730_v22 = vadd.f32 %v722_v18, %v677_v17  ;;  %v3763_v17 = vld [vmem:[%s5178_s6 + $0xc0] ss:$16 sps:$4 sm:$0xff]   ;;  %v3764_v18 = vld [vmem:[%s5178_s6 + $0xe4] ss:$16 sps:$4 sm:$0xff]   ;;  %v3768_v19 = vld [vmem:[%s5178_s6 + $0xec] ss:$16 sps:$4 sm:$0xff]  }
  0xbf   : > { %v678_v24 = vadd.f32 %v670_v20, %v625_v21  ;;  %v745_v26 = vadd.f32 %v4170_v43, %v730_v22  ;;  %v3766_v20 = vld [vmem:[%s5178_s6 + $0xe8] ss:$16 sps:$4 sm:$0xff]   ;;  %v3769_v21 = vld [vmem:[%s5178_s6 + $0xe0] ss:$16 sps:$4 sm:$0xff]   ;;  %v3770_v22 = vld [vmem:[%s5178_s6 + $0x104] ss:$16 sps:$4 sm:$0xff]  }
  0xc1   : > { %v704_v23 = vpop.permute.xlu1 %703  ;;  %v753_v33 = vmax.f32 %v745_v26, 0.0  ;;  %v3776_v26 = vld [vmem:[%s5178_s6 + $0x124] ss:$16 sps:$4 sm:$0xff]  }
  0xc2   : > { %v723_v25 = vmul.f32 %v4162_v35, %v704_v23  ;;  %v3774_v23 = vld [vmem:[%s5178_s6 + $0x10c] ss:$16 sps:$4 sm:$0xff]  }
  0xc4   : > { %v731_v27 = vadd.f32 %v723_v25, %v678_v24  ;;  %v3772_v24 = vld [vmem:[%s5178_s6 + $0x108] ss:$16 sps:$4 sm:$0xff]   ;;  %v3775_v25 = vld [vmem:[%s5178_s6 + $0x100] ss:$16 sps:$4 sm:$0xff]  }
  0xc6   : > { %v746_v28 = vadd.f32 %v4170_v43, %v731_v27  ;;  %v609_v29 = vpop.permute.xlu1 %608  ;;  %v3780_v27 = vld [vmem:[%s5178_s6 + $0x12c] ss:$16 sps:$4 sm:$0xff]  }
  0xc7   : > { %v626_v40 = vmul.f32 %v4155_v32, %v609_v29  ;;  %v3726_v32 = vld [vmem:[%s5178_s6 + $0xc] ss:$16 sps:$4 sm:$0xff]   ;;  %v3781_v29 = vld [vmem:[%s5178_s6 + $0x120] ss:$16 sps:$4 sm:$0xff]  }
  0xc8   : > { %v754_v34 = vmax.f32 %v746_v28, 0.0  ;;  %1536 = vmatprep.subr.bf16.mxu0 %v3726_v32  ;;  %v3778_v28 = vld [vmem:[%s5178_s6 + $0x128] ss:$16 sps:$4 sm:$0xff]   ;;  %v3820_v32 = vld [vmem:[%s5179_s7 + $0x4] ss:$16 sps:$4 sm:$0xff]  }
  0xca   : > { %v759_v36 = vpack.c.bf16 %v754_v34, %v753_v33  ;;  %v3786_v33 = vld [vmem:[%s5178_s6 + $0x14c] ss:$16 sps:$4 sm:$0xff]   ;;  %v3784_v34 = vld [vmem:[%s5178_s6 + $0x148] ss:$16 sps:$4 sm:$0xff]  }
  0xcb   : > { %v655_v37 = vpop.permute.xlu1 %654 }
  0xcc   : > { %v671_v38 = vmul.f32 %v4150_v31, %v655_v37  ;;  %922 = vmatmul.mubr.bf16.gmra.mrb[8].mxu0 %v759_v36  ;;  %v3787_v36 = vld [vmem:[%s5178_s6 + $0x140] ss:$16 sps:$4 sm:$0xff]   ;;  %v3788_v37 = vld [vmem:[%s5178_s6 + $0x164] ss:$16 sps:$4 sm:$0xff]  }
  0xcd   : > { %931 = vmatprep.mubr.bf16.mxu0 %v3959_v1 }
  0xce   : > { %v679_v41 = vadd.f32 %v671_v38, %v626_v40  ;;  %v3792_v38 = vld [vmem:[%s5178_s6 + $0x16c] ss:$16 sps:$4 sm:$0xff]   ;;  %v3793_v40 = vld [vmem:[%s5178_s6 + $0x160] ss:$16 sps:$4 sm:$0xff]  }
  0xcf   : > { %v659_v44 = vpop.permute.xlu1 %658 }
  0xd0   : > { %v672_v45 = vmul.f32 %v4150_v31, %v659_v44  ;;  %v732_v47 = vadd.f32 %v724_v42, %v679_v41  ;;  %v3722_v31 = vld [vmem:[%s5178_s6 + $0x4] ss:$16 sps:$4 sm:$0xff]   ;;  %v3798_v42 = vld [vmem:[%s5178_s6 + $0x18c] ss:$16 sps:$4 sm:$0xff]   ;;  %v3796_v44 = vld [vmem:[%s5178_s6 + $0x188] ss:$16 sps:$4 sm:$0xff]  }
  0xd1   : > { %1495 = vmatprep.subr.bf16.mxu1 %v3722_v31  ;;  %v3794_v41 = vld [vmem:[%s5178_s6 + $0x184] ss:$16 sps:$4 sm:$0xff]   ;;  %v3817_v31 = vld [vmem:[%s5178_s6 + $0x1e0] ss:$16 sps:$4 sm:$0xff]  }
  0xd2   : > { %v680_v49 = vadd.f32 %v672_v45, %v627_v46  ;;  %v747_v51 = vadd.f32 %v4170_v43, %v732_v47  ;;  %v3799_v45 = vld [vmem:[%s5178_s6 + $0x180] ss:$16 sps:$4 sm:$0xff]   ;;  %v3800_v46 = vld [vmem:[%s5178_s6 + $0x1a4] ss:$16 sps:$4 sm:$0xff]   ;;  %v3804_v47 = vld [vmem:[%s5178_s6 + $0x1ac] ss:$16 sps:$4 sm:$0xff]  }
  0xd4   : > { %v712_v48 = vpop.permute.xlu1 %711  ;;  %v755_v54 = vmax.f32 %v747_v51, 0.0  ;;  %v3810_v51 = vld [vmem:[%s5178_s6 + $0x1cc] ss:$16 sps:$4 sm:$0xff]  }
  0xd5   : > { %v725_v50 = vmul.f32 %v4162_v35, %v712_v48  ;;  %v3724_v35 = vld [vmem:[%s5178_s6 + $0x8] ss:$16 sps:$4 sm:$0xff]  }
  0xd6   : > { %1537 = vmatpush1.bf16.msra.mxu0 %v3724_v35  ;;  %v3802_v48 = vld [vmem:[%s5178_s6 + $0x1a8] ss:$16 sps:$4 sm:$0xff]   ;;  %v3823_v35 = vld [vmem:[%s5179_s7 + $0xc] ss:$16 sps:$4 sm:$0xff]  }
  0xd7   : > { %v733_v52 = vadd.f32 %v725_v50, %v680_v49  ;;  %1538 = vmatprep.subr.bf16.mxu0 %v3732_v57  ;;  %v3805_v49 = vld [vmem:[%s5178_s6 + $0x1a0] ss:$16 sps:$4 sm:$0xff]   ;;  %v3806_v50 = vld [vmem:[%s5178_s6 + $0x1c4] ss:$16 sps:$4 sm:$0xff]  }
  0xd9   : > { %v748_v53 = vadd.f32 %v4170_v43, %v733_v52  ;;  %v3727_v43 = vld [vmem:[%s5178_s6] ss:$16 sps:$4 sm:$0xff]   ;;  %v3808_v52 = vld [vmem:[%s5178_s6 + $0x1c8] ss:$16 sps:$4 sm:$0xff]  }
  0xda   : > { %1496 = vmatpush1.bf16.msra.mxu1 %v3727_v43  ;;  %1539 = vmatpush1.bf16.msra.mxu0 %v3730_v58  ;;  %v779_v43 = vlaneseq  ;;  %v777_v58 = vld [vmem:[%s5177_s5] sm:$0x3] }
  0xdb   : > { %v756_v1 = vmax.f32 %v748_v53, 0.0  ;;  %1497 = vmatprep.subr.bf16.mxu1 %v3728_v56  ;;  %1540 = vmatprep.subr.bf16.mxu0 %v3738_v61  ;;  %v3811_v53 = vld [vmem:[%s5178_s6 + $0x1c0] ss:$16 sps:$4 sm:$0xff]  }
  0xdc   : > { %v4400_v56 = vshrl.u32 %v779_v43, 7 }
  0xdd   : > { %v760_v55 = vpack.c.bf16 %v756_v1, %v755_v54  ;;  %v3812_v54 = vld [vmem:[%s5178_s6 + $0x1e4] ss:$16 sps:$4 sm:$0xff]   ;;  %v3816_v1 = vld [vmem:[%s5178_s6 + $0x1ec] ss:$16 sps:$4 sm:$0xff]  }
  0xde   : > { %1498 = vmatpush1.bf16.msra.mxu1 %v3733_v59  ;;  %1541 = vmatpush1.bf16.msra.mxu0 %v3736_v62  ;;  %v4403_v57 = vsub.s32 0, %v4400_v56  ;;  %v4409_v59 = vsub.s32 1, %v4400_v56 }
  0xdf   : > { %932 = vmatmul.mubr.bf16.gmra.mrb[12].mxu0 %v760_v55  ;;  %1499 = vmatprep.subr.bf16.mxu1 %v3734_v60  ;;  %v3814_v55 = vld [vmem:[%s5178_s6 + $0x1e8] ss:$16 sps:$4 sm:$0xff]  }
  0xe0   : > { %1542 = vmatprep.subr.bf16.mxu0 %v3744_v2  ;;  %v4412_v60 = vrot.slane %v777_v58, %v4403_v57  ;;  %v4415_v61 = vrot.slane %v777_v58, %v4409_v59 }
  0xe2   : > { %1500 = vmatpush1.bf16.msra.mxu1 %v3739_v63  ;;  %1543 = vmatpush1.bf16.msra.mxu0 %v3742_v3 }
  0xe3   : > { %1501 = vmatprep.subr.bf16.mxu1 %v3740_v0  ;;  %1544 = vmatprep.subr.bf16.mxu0 %v3750_v6 }
  0xe6   : > { %1502 = vmatpush1.bf16.msra.mxu1 %v3745_v4  ;;  %1545 = vmatpush1.bf16.msra.mxu0 %v3748_v7 }
  0xe7   : > { %1503 = vmatprep.subr.bf16.mxu1 %v3746_v5  ;;  %1546 = vmatprep.subr.bf16.mxu0 %v3756_v10 }
  0xea   : > { %1504 = vmatpush1.bf16.msra.mxu1 %v3751_v8  ;;  %1547 = vmatpush1.bf16.msra.mxu0 %v3754_v11 }
  0xeb   : > { %1505 = vmatprep.subr.bf16.mxu1 %v3752_v9  ;;  %1548 = vmatprep.subr.bf16.mxu0 %v3762_v15 }
  0xee   : > { %1506 = vmatpush1.bf16.msra.mxu1 %v3757_v12  ;;  %1549 = vmatpush1.bf16.msra.mxu0 %v3760_v16 }
  0xef   : > { %1507 = vmatprep.subr.bf16.mxu1 %v3758_v13  ;;  %1550 = vmatprep.subr.bf16.mxu0 %v3768_v19 }
  0xf2   : > { %1508 = vmatpush1.bf16.msra.mxu1 %v3763_v17  ;;  %1551 = vmatpush1.bf16.msra.mxu0 %v3766_v20 }
  0xf3   : > { %1509 = vmatprep.subr.bf16.mxu1 %v3764_v18  ;;  %1552 = vmatprep.subr.bf16.mxu0 %v3774_v23 }
  0xf6   : > { %1510 = vmatpush1.bf16.msra.mxu1 %v3769_v21  ;;  %1553 = vmatpush1.bf16.msra.mxu0 %v3772_v24 }
  0xf7   : > { %1511 = vmatprep.subr.bf16.mxu1 %v3770_v22  ;;  %1554 = vmatprep.subr.bf16.mxu0 %v3780_v27 }
  0xfa   : > { %1512 = vmatpush1.bf16.msra.mxu1 %v3775_v25  ;;  %1555 = vmatpush1.bf16.msra.mxu0 %v3778_v28 }
  0xfb   : > { %1513 = vmatprep.subr.bf16.mxu1 %v3776_v26  ;;  %1556 = vmatprep.subr.bf16.mxu0 %v3786_v33 }
  0xfe   : > { %1514 = vmatpush1.bf16.msra.mxu1 %v3781_v29  ;;  %1557 = vmatpush1.bf16.msra.mxu0 %v3784_v34 }
  0xff   : > { %1515 = vmatprep.subr.bf16.mxu1 %v3782_v30  ;;  %1558 = vmatprep.subr.bf16.mxu0 %v3792_v38 }
 0x102   : > { %1516 = vmatpush1.bf16.msra.mxu1 %v3787_v36  ;;  %1559 = vmatpush1.bf16.msra.mxu0 %v3790_v39 }
 0x103   : > { %1517 = vmatprep.subr.bf16.mxu1 %v3788_v37  ;;  %1560 = vmatprep.subr.bf16.mxu0 %v3798_v42 }
 0x106   : > { %1518 = vmatpush1.bf16.msra.mxu1 %v3793_v40  ;;  %1561 = vmatpush1.bf16.msra.mxu0 %v3796_v44 }
 0x107   : > { %1519 = vmatprep.subr.bf16.mxu1 %v3794_v41  ;;  %1562 = vmatprep.subr.bf16.mxu0 %v3804_v47 }
 0x10a   : > { %1520 = vmatpush1.bf16.msra.mxu1 %v3799_v45  ;;  %1563 = vmatpush1.bf16.msra.mxu0 %v3802_v48 }
 0x10b   : > { %1521 = vmatprep.subr.bf16.mxu1 %v3800_v46  ;;  %1564 = vmatprep.subr.bf16.mxu0 %v3810_v51 }
 0x10e   : > { %1522 = vmatpush1.bf16.msra.mxu1 %v3805_v49  ;;  %1565 = vmatpush1.bf16.msra.mxu0 %v3808_v52 }
 0x10f   : > { %1523 = vmatprep.subr.bf16.mxu1 %v3806_v50  ;;  %1566 = vmatprep.subr.bf16.mxu0 %v3816_v1 }
 0x112   : > { %1524 = vmatpush1.bf16.msra.mxu1 %v3811_v53  ;;  %1567 = vmatpush1.bf16.msra.mxu0 %v3814_v55 }
 0x113   : > { %1525 = vmatprep.subr.bf16.mxu1 %v3812_v54  ;;  %2042 = vmatprep.subr.bf16.mxu0 %v3823_v35 }
 0x116   : > { %1526 = vmatpush1.bf16.msra.mxu1 %v3817_v31 }
 0x117   : > { %1969 = vmatprep.subr.bf16.mxu1 %v3820_v32 }
 0x17d   : > { %v903_v62 = vpop.f32.mrb[0].mxu0 }
 0x17e   : > { %v904_v63 = vadd.f32 %v903_v62, %v4412_v60  ;;  %v905_v0 = vpop.f32.mrb[1].mxu0 }
 0x17f   : > { %v906_v2 = vadd.f32 %v905_v0, %v4415_v61  ;;  %v907_v3 = vpop.f32.mrb[2].mxu0 }
 0x180   : > { %v942_v4 = vrot.slane %v904_v63, 4  ;;  %v908_v5 = vadd.f32 %v907_v3, %v4412_v60  ;;  %v909_v6 = vpop.f32.mrb[3].mxu0 }
 0x181   : > { %v948_v7 = vrot.slane %v906_v2, 4  ;;  %v910_v8 = vadd.f32 %v909_v6, %v4415_v61 }
 0x182   : > { %v943_v9 = vmax.f32 %v904_v63, %v942_v4  ;;  %v954_v10 = vrot.slane %v908_v5, 4  ;;  %v4421_v11 = vpack.c.bf16 %v908_v5, %v904_v63 }
 0x183   : > { %v949_v12 = vmax.f32 %v906_v2, %v948_v7  ;;  %v960_v13 = vrot.slane %v910_v8, 4  ;;  %v4423_v15 = vpack.c.bf16 %v910_v8, %v906_v2 }
 0x184   : > { %v944_v16 = vrot.slane %v943_v9, 2  ;;  %v955_v17 = vmax.f32 %v908_v5, %v954_v10 }
 0x185   : > { %v950_v18 = vrot.slane %v949_v12, 2  ;;  %v961_v19 = vmax.f32 %v910_v8, %v960_v13 }
 0x186   : > { %v945_v20 = vmax.f32 %v943_v9, %v944_v16  ;;  %v956_v21 = vrot.slane %v955_v17, 2 }
 0x187   : > { %v951_v22 = vmax.f32 %v949_v12, %v950_v18  ;;  %v962_v23 = vrot.slane %v961_v19, 2 }
 0x188   : > { %v946_v24 = vrot.slane %v945_v20, 1  ;;  %v957_v25 = vmax.f32 %v955_v17, %v956_v21 }
 0x189   : > { %v952_v26 = vrot.slane %v951_v22, 1  ;;  %v963_v27 = vmax.f32 %v961_v19, %v962_v23 }
 0x18a   : > { %v947_v28 = vmax.f32 %v945_v20, %v946_v24  ;;  %v958_v29 = vrot.slane %v957_v25, 1 }
 0x18b   : > { %v953_v30 = vmax.f32 %v951_v22, %v952_v26  ;;  %v964_v33 = vrot.slane %v963_v27, 1 }
 0x18c   : > { %v1038_v34 = vpack.c.bf16 %v947_v28, %v947_v28  ;;  %v959_v36 = vmax.f32 %v957_v25, %v958_v29  ;;  %v913_v37 = vpop.f32.mrb[4].mxu0 }
 0x18d   : > { %v1039_v38 = vpack.c.bf16 %v953_v30, %v953_v30  ;;  %v965_v39 = vmax.f32 %v963_v27, %v964_v33  ;;  %v914_v40 = vadd.f32 %v913_v37, %v4412_v60  ;;  %v915_v41 = vpop.f32.mrb[5].mxu0 }
 0x18e   : > { %v1040_v42 = vpack.c.bf16 %v959_v36, %v959_v36  ;;  %v916_v44 = vadd.f32 %v915_v41, %v4415_v61  ;;  %v917_v45 = vpop.f32.mrb[6].mxu0  ;;  %v1134_v46 = vunpack.c.l.b16 %v1038_v34 }
 0x18f   : > { %v1041_v47 = vpack.c.bf16 %v965_v39, %v965_v39  ;;  %v966_v48 = vrot.slane %v914_v40, 4  ;;  %v918_v49 = vadd.f32 %v917_v45, %v4412_v60  ;;  %v919_v50 = vpop.f32.mrb[7].mxu0  ;;  %v1135_v51 = vunpack.c.l.b16 %v1039_v38 }
 0x190   : > { %v1136_v52 = vunpack.c.l.b16 %v1040_v42  ;;  %v972_v53 = vrot.slane %v916_v44, 4  ;;  %v920_v54 = vadd.f32 %v919_v50, %v4415_v61 }
 0x191   : > { %v1137_v1 = vunpack.c.l.b16 %v1041_v47  ;;  %v967_v55 = vmax.f32 %v914_v40, %v966_v48  ;;  %v978_v31 = vrot.slane %v918_v49, 4  ;;  %v4429_v32 = vpack.c.bf16 %v918_v49, %v914_v40 }
 0x192   : > { %v1151_v35 = vsel %vm1150_vm0, %v1136_v52, %v1134_v46  ;;  %v973_v43 = vmax.f32 %v916_v44, %v972_v53  ;;  %v984_v58 = vrot.slane %v920_v54, 4  ;;  %v4432_v62 = vpack.c.bf16 %v920_v54, %v916_v44 }
 0x193   : > { %v1164_v63 = vsel %vm1150_vm0, %v1137_v1, %v1135_v51  ;;  %v968_v0 = vrot.slane %v967_v55, 2  ;;  %v979_v2 = vmax.f32 %v918_v49, %v978_v31 }
 0x194   : > { %v974_v3 = vrot.slane %v973_v43, 2  ;;  %v985_v4 = vmax.f32 %v920_v54, %v984_v58 }
 0x195   : > { %v969_v5 = vmax.f32 %v967_v55, %v968_v0  ;;  %v980_v6 = vrot.slane %v979_v2, 2 }
 0x196   : > { %v975_v7 = vmax.f32 %v973_v43, %v974_v3  ;;  %v986_v8 = vrot.slane %v985_v4, 2  ;;  %v3033_v3 = vld [vmem:[%s561_s26] sm:$0xff] }
 0x197   : > { %v970_v9 = vrot.slane %v969_v5, 1  ;;  %v981_v10 = vmax.f32 %v979_v2, %v980_v6  ;;  %3037 = vperm.xlu1 %3694, %v3033_v3   ;;  %3047 = vperm.xlu0 %3695, %v3033_v3  }
 0x198   : > { %v976_v12 = vrot.slane %v975_v7, 1  ;;  %v987_v13 = vmax.f32 %v985_v4, %v986_v8 }
 0x199   : > { %v971_v16 = vmax.f32 %v969_v5, %v970_v9  ;;  %v982_v17 = vrot.slane %v981_v10, 1 }
 0x19a   : > { %v977_v18 = vmax.f32 %v975_v7, %v976_v12  ;;  %v988_v19 = vrot.slane %v987_v13, 1 }
 0x19b   : > { %v1042_v20 = vpack.c.bf16 %v971_v16, %v971_v16  ;;  %v983_v21 = vmax.f32 %v981_v10, %v982_v17  ;;  %3696 = vset.pattern.permute.xlu1 %v3960_v14  ;;  %3697 = vset.pattern.permute.xlu0 %v3960_v14 }
 0x19c   : > { %v1043_v22 = vpack.c.bf16 %v977_v18, %v977_v18  ;;  %v989_v23 = vmax.f32 %v987_v13, %v988_v19  ;;  %3058 = vperm.xlu1 %3696, %v3033_v3  }
 0x19d   : > { %v1138_v24 = vunpack.c.l.b16 %v1042_v20  ;;  %v1044_v25 = vpack.c.bf16 %v983_v21, %v983_v21 }
 0x19e   : > { %v1139_v26 = vunpack.c.l.b16 %v1043_v22  ;;  %v1045_v27 = vpack.c.bf16 %v989_v23, %v989_v23 }
 0x19f   : > { %v1153_v28 = vsel %vm1152_vm1, %v1138_v24, %v1151_v35  ;;  %v1140_v29 = vunpack.c.l.b16 %v1044_v25  ;;  %v923_v30 = vpop.f32.mrb[8].mxu0 }
 0x1a0   : > { %v1141_v33 = vunpack.c.l.b16 %v1045_v27  ;;  %v924_v34 = vadd.f32 %v923_v30, %v4412_v60  ;;  %v925_v36 = vpop.f32.mrb[9].mxu0  ;;  %v1165_v37 = vsel %vm1152_vm1, %v1139_v26, %v1164_v63 }
 0x1a1   : > { %v926_v38 = vadd.f32 %v925_v36, %v4415_v61  ;;  %v927_v39 = vpop.f32.mrb[10].mxu0  ;;  %v1155_v40 = vsel %vm1154_vm2, %v1140_v29, %v1153_v28 }
 0x1a2   : > { %v990_v41 = vrot.slane %v924_v34, 4  ;;  %v928_v42 = vadd.f32 %v927_v39, %v4412_v60  ;;  %v929_v44 = vpop.f32.mrb[11].mxu0  ;;  %v1166_v45 = vsel %vm1154_vm2, %v1141_v33, %v1165_v37 }
 0x1a3   : > { %v996_v46 = vrot.slane %v926_v38, 4  ;;  %v930_v47 = vadd.f32 %v929_v44, %v4415_v61 }
 0x1a4   : > { %v991_v48 = vmax.f32 %v924_v34, %v990_v41  ;;  %v1002_v49 = vrot.slane %v928_v42, 4  ;;  %v4443_v50 = vpack.c.bf16 %v928_v42, %v924_v34 }
 0x1a5   : > { %v997_v51 = vmax.f32 %v926_v38, %v996_v46  ;;  %v1008_v52 = vrot.slane %v930_v47, 4  ;;  %v4446_v53 = vpack.c.bf16 %v930_v47, %v926_v38 }
 0x1a6   : > { %v992_v54 = vrot.slane %v991_v48, 2  ;;  %v1003_v1 = vmax.f32 %v928_v42, %v1002_v49 }
 0x1a7   : > { %v998_v55 = vrot.slane %v997_v51, 2  ;;  %v1009_v31 = vmax.f32 %v930_v47, %v1008_v52 }
 0x1a8   : > { %v993_v35 = vmax.f32 %v991_v48, %v992_v54  ;;  %v1004_v43 = vrot.slane %v1003_v1, 2 }
 0x1a9   : > { %v999_v58 = vmax.f32 %v997_v51, %v998_v55  ;;  %v1010_v63 = vrot.slane %v1009_v31, 2 }
 0x1aa   : > { %v994_v0 = vrot.slane %v993_v35, 1  ;;  %v1005_v2 = vmax.f32 %v1003_v1, %v1004_v43 }
 0x1ab   : > { %v1000_v4 = vrot.slane %v999_v58, 1  ;;  %v1011_v5 = vmax.f32 %v1009_v31, %v1010_v63 }
 0x1ac   : > { %v995_v6 = vmax.f32 %v993_v35, %v994_v0  ;;  %v1006_v7 = vrot.slane %v1005_v2, 1 }
 0x1ad   : > { %v1001_v8 = vmax.f32 %v999_v58, %v1000_v4  ;;  %v1012_v9 = vrot.slane %v1011_v5, 1 }
 0x1ae   : > { %v1046_v10 = vpack.c.bf16 %v995_v6, %v995_v6  ;;  %v1007_v12 = vmax.f32 %v1005_v2, %v1006_v7 }
 0x1af   : > { %v1047_v13 = vpack.c.bf16 %v1001_v8, %v1001_v8  ;;  %v1013_v16 = vmax.f32 %v1011_v5, %v1012_v9 }
 0x1b0   : > { %v1142_v17 = vunpack.c.l.b16 %v1046_v10  ;;  %v1048_v18 = vpack.c.bf16 %v1007_v12, %v1007_v12 }
 0x1b1   : > { %v1143_v19 = vunpack.c.l.b16 %v1047_v13  ;;  %v1049_v20 = vpack.c.bf16 %v1013_v16, %v1013_v16 }
 0x1b2   : > { %v1144_v21 = vunpack.c.l.b16 %v1048_v18  ;;  %v933_v22 = vpop.f32.mrb[12].mxu0  ;;  %v1157_v23 = vsel %vm1156_vm3, %v1142_v17, %v1155_v40 }
 0x1b3   : > { %v1145_v24 = vunpack.c.l.b16 %v1049_v20  ;;  %v934_v25 = vadd.f32 %v933_v22, %v4412_v60  ;;  %v935_v26 = vpop.f32.mrb[13].mxu0  ;;  %v1167_v27 = vsel %vm1156_vm3, %v1143_v19, %v1166_v45  ;;  %v3818_v19 = vld [vmem:[%s5179_s7] ss:$16 sps:$4 sm:$0xff]   ;;  %v3821_v20 = vld [vmem:[%s5179_s7 + $0x8] ss:$16 sps:$4 sm:$0xff]  }
 0x1b4   : > { %v936_v28 = vadd.f32 %v935_v26, %v4415_v61  ;;  %v937_v29 = vpop.f32.mrb[14].mxu0  ;;  %v1159_v14 = vsel %vm1158_vm4, %v1144_v21, %v1157_v23  ;;  %v3826_v22 = vld [vmem:[%s5179_s7 + $0x24] ss:$16 sps:$4 sm:$0xff]   ;;  %v3829_v23 = vld [vmem:[%s5179_s7 + $0x2c] ss:$16 sps:$4 sm:$0xff]  }
 0x1b5   : > { %v1014_v30 = vrot.slane %v934_v25, 4  ;;  %v938_v33 = vadd.f32 %v937_v29, %v4412_v60  ;;  %v939_v34 = vpop.f32.mrb[15].mxu0  ;;  %v1168_v36 = vsel %vm1158_vm4, %v1145_v24, %v1167_v27  ;;  %v3824_v24 = vld [vmem:[%s5179_s7 + $0x20] ss:$16 sps:$4 sm:$0xff]   ;;  %v3832_v26 = vld [vmem:[%s5179_s7 + $0x44] ss:$16 sps:$4 sm:$0xff]  }
 0x1b6   : > { %v1020_v37 = vrot.slane %v936_v28, 4  ;;  %v940_v38 = vadd.f32 %v939_v34, %v4415_v61  ;;  %v3835_v27 = vld [vmem:[%s5179_s7 + $0x4c] ss:$16 sps:$4 sm:$0xff]   ;;  %v3838_v29 = vld [vmem:[%s5179_s7 + $0x64] ss:$16 sps:$4 sm:$0xff]  }
 0x1b7   : > { %v1015_v39 = vmax.f32 %v934_v25, %v1014_v30  ;;  %v1026_v40 = vrot.slane %v938_v33, 4  ;;  %v4467_v41 = vpack.c.bf16 %v938_v33, %v934_v25  ;;  %v3827_v25 = vld [vmem:[%s5179_s7 + $0x28] ss:$16 sps:$4 sm:$0xff]   ;;  %v3836_v30 = vld [vmem:[%s5179_s7 + $0x60] ss:$16 sps:$4 sm:$0xff]  }
 0x1b8   : > { %v1021_v42 = vmax.f32 %v936_v28, %v1020_v37  ;;  %v1032_v44 = vrot.slane %v940_v38, 4  ;;  %v4469_v45 = vpack.c.bf16 %v940_v38, %v936_v28  ;;  %v3830_v28 = vld [vmem:[%s5179_s7 + $0x40] ss:$16 sps:$4 sm:$0xff]   ;;  %v3844_v34 = vld [vmem:[%s5179_s7 + $0x84] ss:$16 sps:$4 sm:$0xff]  }
 0x1b9   : > { %v1016_v46 = vrot.slane %v1015_v39, 2  ;;  %v1027_v47 = vmax.f32 %v938_v33, %v1026_v40  ;;  %v3839_v33 = vld [vmem:[%s5179_s7 + $0x68] ss:$16 sps:$4 sm:$0xff]   ;;  %v3842_v37 = vld [vmem:[%s5179_s7 + $0x80] ss:$16 sps:$4 sm:$0xff]  }
 0x1ba   : > { %v1022_v48 = vrot.slane %v1021_v42, 2  ;;  %v1033_v49 = vmax.f32 %v940_v38, %v1032_v44  ;;  %v3845_v38 = vld [vmem:[%s5179_s7 + $0x88] ss:$16 sps:$4 sm:$0xff]   ;;  %v3853_v40 = vld [vmem:[%s5179_s7 + $0xac] ss:$16 sps:$4 sm:$0xff]  }
 0x1bb   : > { %v1017_v51 = vmax.f32 %v1015_v39, %v1016_v46  ;;  %v1028_v60 = vrot.slane %v1027_v47, 2  ;;  %v3850_v39 = vld [vmem:[%s5179_s7 + $0xa4] ss:$16 sps:$4 sm:$0xff]   ;;  %v3851_v44 = vld [vmem:[%s5179_s7 + $0xa8] ss:$16 sps:$4 sm:$0xff]  }
 0x1bc   : > { %v1023_v52 = vmax.f32 %v1021_v42, %v1022_v48  ;;  %v1034_v54 = vrot.slane %v1033_v49, 2  ;;  %v3848_v42 = vld [vmem:[%s5179_s7 + $0xa0] ss:$16 sps:$4 sm:$0xff]   ;;  %v3856_v46 = vld [vmem:[%s5179_s7 + $0xc4] ss:$16 sps:$4 sm:$0xff]  }
 0x1bd   : > { %v1018_v1 = vrot.slane %v1017_v51, 1  ;;  %v1029_v55 = vmax.f32 %v1027_v47, %v1028_v60  ;;  %v3859_v47 = vld [vmem:[%s5179_s7 + $0xcc] ss:$16 sps:$4 sm:$0xff]   ;;  %v3854_v48 = vld [vmem:[%s5179_s7 + $0xc0] ss:$16 sps:$4 sm:$0xff]  }
 0x1be   : > { %v1024_v31 = vrot.slane %v1023_v52, 1  ;;  %v1035_v61 = vmax.f32 %v1033_v49, %v1034_v54  ;;  %v3857_v49 = vld [vmem:[%s5179_s7 + $0xc8] ss:$16 sps:$4 sm:$0xff]   ;;  %v3865_v60 = vld [vmem:[%s5179_s7 + $0xec] ss:$16 sps:$4 sm:$0xff]  }
 0x1bf   : > { %v1019_v35 = vmax.f32 %v1017_v51, %v1018_v1  ;;  %v1030_v43 = vrot.slane %v1029_v55, 1  ;;  %v3862_v51 = vld [vmem:[%s5179_s7 + $0xe4] ss:$16 sps:$4 sm:$0xff]   ;;  %v3863_v54 = vld [vmem:[%s5179_s7 + $0xe8] ss:$16 sps:$4 sm:$0xff]  }
 0x1c0   : > { %v1025_v58 = vmax.f32 %v1023_v52, %v1024_v31  ;;  %v1036_v63 = vrot.slane %v1035_v61, 1  ;;  %v3860_v52 = vld [vmem:[%s5179_s7 + $0xe0] ss:$16 sps:$4 sm:$0xff]   ;;  %v3868_v1 = vld [vmem:[%s5179_s7 + $0x104] ss:$16 sps:$4 sm:$0xff]  }
 0x1c1   : > { %v1050_v0 = vpack.c.bf16 %v1019_v35, %v1019_v35  ;;  %v1031_v2 = vmax.f32 %v1029_v55, %v1030_v43  ;;  %v3871_v55 = vld [vmem:[%s5179_s7 + $0x10c] ss:$16 sps:$4 sm:$0xff]   ;;  %v3866_v31 = vld [vmem:[%s5179_s7 + $0x100] ss:$16 sps:$4 sm:$0xff]   ;;  %v3874_v35 = vld [vmem:[%s5179_s7 + $0x124] ss:$16 sps:$4 sm:$0xff]  }
 0x1c2   : > { %v1037_v3 = vmax.f32 %v1035_v61, %v1036_v63  ;;  %v1051_v4 = vpack.c.bf16 %v1025_v58, %v1025_v58  ;;  %v3869_v61 = vld [vmem:[%s5179_s7 + $0x108] ss:$16 sps:$4 sm:$0xff]   ;;  %v3877_v43 = vld [vmem:[%s5179_s7 + $0x12c] ss:$16 sps:$4 sm:$0xff]   ;;  %v3872_v58 = vld [vmem:[%s5179_s7 + $0x120] ss:$16 sps:$4 sm:$0xff]  }
 0x1c3   : > { %v1146_v5 = vunpack.c.l.b16 %v1050_v0  ;;  %v1052_v6 = vpack.c.bf16 %v1031_v2, %v1031_v2  ;;  %v3875_v63 = vld [vmem:[%s5179_s7 + $0x128] ss:$16 sps:$4 sm:$0xff]   ;;  %v3880_v0 = vld [vmem:[%s5179_s7 + $0x144] ss:$16 sps:$4 sm:$0xff]   ;;  %v3883_v2 = vld [vmem:[%s5179_s7 + $0x14c] ss:$16 sps:$4 sm:$0xff]  }
 0x1c4   : > { %v1053_v7 = vpack.c.bf16 %v1037_v3, %v1037_v3  ;;  %v1147_v8 = vunpack.c.l.b16 %v1051_v4  ;;  %v3878_v3 = vld [vmem:[%s5179_s7 + $0x140] ss:$16 sps:$4 sm:$0xff]   ;;  %v3881_v4 = vld [vmem:[%s5179_s7 + $0x148] ss:$16 sps:$4 sm:$0xff]  }
 0x1c5   : > { %v1148_v9 = vunpack.c.l.b16 %v1052_v6  ;;  %v1161_v10 = vsel %vm1160_vm5, %v1146_v5, %v1159_v14  ;;  %v3841_v14 = vld [vmem:[%s5179_s7 + $0x6c] ss:$16 sps:$4 sm:$0xff]   ;;  %v3886_v5 = vld [vmem:[%s5179_s7 + $0x164] ss:$16 sps:$4 sm:$0xff]  }
 0x1c6   : > { %v1149_v12 = vunpack.c.l.b16 %v1053_v7  ;;  %v1169_v13 = vsel %vm1160_vm5, %v1147_v8, %v1168_v36  ;;  %v3847_v36 = vld [vmem:[%s5179_s7 + $0x8c] ss:$16 sps:$4 sm:$0xff]   ;;  %v3884_v7 = vld [vmem:[%s5179_s7 + $0x160] ss:$16 sps:$4 sm:$0xff]   ;;  %v3887_v8 = vld [vmem:[%s5179_s7 + $0x168] ss:$16 sps:$4 sm:$0xff]  }
 0x1c7   : > { %v1163_v16 = vsel %vm1162_vm6, %v1148_v9, %v1161_v10  ;;  %v3889_v6 = vld [vmem:[%s5179_s7 + $0x16c] ss:$16 sps:$4 sm:$0xff]   ;;  %v3892_v9 = vld [vmem:[%s5179_s7 + $0x184] ss:$16 sps:$4 sm:$0xff]  }
 0x1c8   : > { %v1170_v17 = vsel %vm1162_vm6, %v1149_v12, %v1169_v13  ;;  %v1171_v21 = vpack.c.b16 %v1163_v16, %v1163_v16  ;;  %v3895_v10 = vld [vmem:[%s5179_s7 + $0x18c] ss:$16 sps:$4 sm:$0xff]   ;;  %v3890_v12 = vld [vmem:[%s5179_s7 + $0x180] ss:$16 sps:$4 sm:$0xff]   ;;  %v3893_v13 = vld [vmem:[%s5179_s7 + $0x188] ss:$16 sps:$4 sm:$0xff]  }
 0x1c9   : > { %v1172_v18 = vpack.c.b16 %v1170_v17, %v1170_v17  ;;  %v3898_v16 = vld [vmem:[%s5179_s7 + $0x1a4] ss:$16 sps:$4 sm:$0xff]   ;;  %v3901_v17 = vld [vmem:[%s5179_s7 + $0x1ac] ss:$16 sps:$4 sm:$0xff]  }
 0x1cb   : > { %1527 = vmatprep.mubr.bf16.mxu1 %v1172_v18  ;;  %1568 = vmatprep.mubr.bf16.mxu0 %v1172_v18  ;;  %v3896_v18 = vld [vmem:[%s5179_s7 + $0x1a0] ss:$16 sps:$4 sm:$0xff]  }
 0x1cc   : > { %1528 = vmatmul.mubr.bf16.vlgmr.msra.gmra.mrb[0].mxu1 %v1171_v21  ;;  %1569 = vmatmul.mubr.bf16.vlgmr.msra.gmra.mrb[16].mxu0 %v1171_v21  ;;  %v3907_v21 = vld [vmem:[%s5179_s7 + $0x1cc] ss:$16 sps:$4 sm:$0xff]  }
 0x1cd   : > { %1970 = vmatpush1.bf16.msra.mxu1 %v3818_v19  ;;  %2043 = vmatpush1.bf16.msra.mxu0 %v3821_v20  ;;  %v3899_v19 = vld [vmem:[%s5179_s7 + $0x1a8] ss:$16 sps:$4 sm:$0xff]   ;;  %v3904_v20 = vld [vmem:[%s5179_s7 + $0x1c4] ss:$16 sps:$4 sm:$0xff]  }
 0x1ce   : > { %2001 = vmatprep.mubr.bf16.mxu1 %v4423_v15  ;;  %2074 = vmatprep.mubr.bf16.mxu0 %v4423_v15  ;;  %v3833_v15 = vld [vmem:[%s5179_s7 + $0x48] ss:$16 sps:$4 sm:$0xff]  }
 0x1cf   : > { %1971 = vmatprep.subr.bf16.mxu1 %v3826_v22  ;;  %2044 = vmatprep.subr.bf16.mxu0 %v3829_v23  ;;  %v3902_v22 = vld [vmem:[%s5179_s7 + $0x1c0] ss:$16 sps:$4 sm:$0xff]   ;;  %v3905_v23 = vld [vmem:[%s5179_s7 + $0x1c8] ss:$16 sps:$4 sm:$0xff]  }
 0x1d1   : > { %1972 = vmatpush1.bf16.msra.mxu1 %v3824_v24  ;;  %2045 = vmatpush1.bf16.msra.mxu0 %v3827_v25  ;;  %v3910_v24 = vld [vmem:[%s5179_s7 + $0x1e4] ss:$16 sps:$4 sm:$0xff]   ;;  %v3913_v25 = vld [vmem:[%s5179_s7 + $0x1ec] ss:$16 sps:$4 sm:$0xff]  }
 0x1d2   : > { %1973 = vmatprep.subr.bf16.mxu1 %v3832_v26  ;;  %2046 = vmatprep.subr.bf16.mxu0 %v3835_v27  ;;  %v3908_v26 = vld [vmem:[%s5179_s7 + $0x1e0] ss:$16 sps:$4 sm:$0xff]   ;;  %v3911_v27 = vld [vmem:[%s5179_s7 + $0x1e8] ss:$16 sps:$4 sm:$0xff]  }
 0x1d5   : > { %1974 = vmatpush1.bf16.msra.mxu1 %v3830_v28  ;;  %2047 = vmatpush1.bf16.msra.mxu0 %v3833_v15  ;;  %v3921_v28 = vld [vmem:[%s5181_s9 + $0x88] sm:$0xff]   ;;  %v3922_v15 = vld [vmem:[%s5181_s9 + $0x50] sm:$0xff]  }
 0x1d6   : > { %1975 = vmatprep.subr.bf16.mxu1 %v3838_v29  ;;  %2048 = vmatprep.subr.bf16.mxu0 %v3841_v14  ;;  %v3924_v29 = vld [vmem:[%s5181_s9 + $0xd0] sm:$0xff]  }
 0x1d7   : > { %v3923_v14 = vld [vmem:[%s5181_s9 + $0x10] sm:$0xff]  }
 0x1d9   : > { %1976 = vmatpush1.bf16.msra.mxu1 %v3836_v30  ;;  %2049 = vmatpush1.bf16.msra.mxu0 %v3839_v33  ;;  %v3925_v30 = vld [vmem:[%s5181_s9 + $0x90] sm:$0xff]   ;;  %v3926_v33 = vld [vmem:[%s5181_s9 + $0x58] sm:$0xff]  }
 0x1da   : > { %1977 = vmatprep.subr.bf16.mxu1 %v3844_v34  ;;  %2050 = vmatprep.subr.bf16.mxu0 %v3847_v36  ;;  %v3928_v34 = vld [vmem:[%s5181_s9 + $0xd8] sm:$0xff]  }
 0x1db   : > { %v3927_v36 = vld [vmem:[%s5181_s9 + $0x18] sm:$0xff]  }
 0x1dd   : > { %1978 = vmatpush1.bf16.msra.mxu1 %v3842_v37  ;;  %2051 = vmatpush1.bf16.msra.mxu0 %v3845_v38  ;;  %v3929_v37 = vld [vmem:[%s5181_s9 + $0x98] sm:$0xff]   ;;  %v3930_v38 = vld [vmem:[%s5181_s9 + $0x60] sm:$0xff]  }
 0x1de   : > { %1979 = vmatprep.subr.bf16.mxu1 %v3850_v39  ;;  %2052 = vmatprep.subr.bf16.mxu0 %v3853_v40  ;;  %v3932_v39 = vld [vmem:[%s5181_s9 + $0xe0] sm:$0xff]  }
 0x1df   : > { %v3931_v40 = vld [vmem:[%s5181_s9 + $0x20] sm:$0xff]  }
 0x1e1   : > { %1980 = vmatpush1.bf16.msra.mxu1 %v3848_v42  ;;  %2053 = vmatpush1.bf16.msra.mxu0 %v3851_v44  ;;  %v3933_v42 = vld [vmem:[%s5181_s9 + $0xa0] sm:$0xff]   ;;  %v3934_v44 = vld [vmem:[%s5181_s9 + $0x68] sm:$0xff]  }
 0x1e2   : > { %1981 = vmatprep.subr.bf16.mxu1 %v3856_v46  ;;  %2054 = vmatprep.subr.bf16.mxu0 %v3859_v47  ;;  %v3936_v46 = vld [vmem:[%s5181_s9 + $0xe8] sm:$0xff]  }
 0x1e3   : > { %v3935_v47 = vld [vmem:[%s5181_s9 + $0x28] sm:$0xff]  }
 0x1e5   : > { %1982 = vmatpush1.bf16.msra.mxu1 %v3854_v48  ;;  %2055 = vmatpush1.bf16.msra.mxu0 %v3857_v49  ;;  %v3937_v48 = vld [vmem:[%s5181_s9 + $0xa8] sm:$0xff]   ;;  %v3938_v49 = vld [vmem:[%s5181_s9 + $0x70] sm:$0xff]  }
 0x1e6   : > { %1983 = vmatprep.subr.bf16.mxu1 %v3862_v51  ;;  %2056 = vmatprep.subr.bf16.mxu0 %v3865_v60  ;;  %v3940_v51 = vld [vmem:[%s5181_s9 + $0xf0] sm:$0xff]  }
 0x1e7   : > { %v3939_v60 = vld [vmem:[%s5181_s9 + $0x30] sm:$0xff]  }
 0x1e9   : > { %1984 = vmatpush1.bf16.msra.mxu1 %v3860_v52  ;;  %2057 = vmatpush1.bf16.msra.mxu0 %v3863_v54  ;;  %v3941_v52 = vld [vmem:[%s5181_s9 + $0xb0] sm:$0xff]   ;;  %v3942_v54 = vld [vmem:[%s5181_s9 + $0x78] sm:$0xff]  }
 0x1ea   : > { %1985 = vmatprep.subr.bf16.mxu1 %v3868_v1  ;;  %2058 = vmatprep.subr.bf16.mxu0 %v3871_v55  ;;  %v3944_v1 = vld [vmem:[%s5181_s9 + $0xf8] sm:$0xff]  }
 0x1eb   : > { %v3943_v55 = vld [vmem:[%s5181_s9 + $0x38] sm:$0xff]  }
 0x1ed   : > { %1986 = vmatpush1.bf16.msra.mxu1 %v3866_v31  ;;  %2059 = vmatpush1.bf16.msra.mxu0 %v3869_v61  ;;  %v3945_v31 = vld [vmem:[%s5181_s9 + $0xb8] sm:$0xff]   ;;  %v5190_v61 = vmov 0.0|0.0  }
 0x1ee   : > { %1987 = vmatprep.subr.bf16.mxu1 %v3874_v35  ;;  %2060 = vmatprep.subr.bf16.mxu0 %v3877_v43  ;;  %v3962_v35 = vmov 1966171168  }
 0x1ef   : > { %v2124_v43 = vunpack.c.l.s4 %v3962_v35 }
 0x1f1   : > { %1988 = vmatpush1.bf16.msra.mxu1 %v3872_v58  ;;  %2061 = vmatpush1.bf16.msra.mxu0 %v3875_v63  ;;  %v3459_v63 = vld [vmem:[%s5185_s13] ss:$0 sm:$0xff] }
 0x1f2   : > { %1989 = vmatprep.subr.bf16.mxu1 %v3880_v0  ;;  %2062 = vmatprep.subr.bf16.mxu0 %v3883_v2  ;;  %v3460_v0 = vld [vmem:[%s5185_s13 + $0x1] ss:$0 sm:$0xff] }
 0x1f5   : > { %1990 = vmatpush1.bf16.msra.mxu1 %v3878_v3  ;;  %2063 = vmatpush1.bf16.msra.mxu0 %v3881_v4  ;;  %v2125_v3 = vunpack.c.0.s8 %v2124_v43 }
 0x1f6   : > { %1991 = vmatprep.subr.bf16.mxu1 %v3886_v5  ;;  %2064 = vmatprep.subr.bf16.mxu0 %v3889_v6  ;;  %v3461_v6 = vld [vmem:[%s5185_s13 + $0x2] ss:$0 sm:$0xff] }
 0x1f9   : > { %1992 = vmatpush1.bf16.msra.mxu1 %v3884_v7  ;;  %2065 = vmatpush1.bf16.msra.mxu0 %v3887_v8 }
 0x1fa   : > { %1993 = vmatprep.subr.bf16.mxu1 %v3892_v9  ;;  %2066 = vmatprep.subr.bf16.mxu0 %v3895_v10  ;;  %v2128_v10 = vsub.s32 %v2125_v3, %v4400_v56 }
 0x1fd   : > { %1994 = vmatpush1.bf16.msra.mxu1 %v3890_v12  ;;  %2067 = vmatpush1.bf16.msra.mxu0 %v3893_v13 }
 0x1fe   : > { %1995 = vmatprep.subr.bf16.mxu1 %v3898_v16  ;;  %2068 = vmatprep.subr.bf16.mxu0 %v3901_v17 }
 0x201   : > { %1996 = vmatpush1.bf16.msra.mxu1 %v3896_v18  ;;  %2069 = vmatpush1.bf16.msra.mxu0 %v3899_v19 }
 0x202   : > { %1997 = vmatprep.subr.bf16.mxu1 %v3904_v20  ;;  %2070 = vmatprep.subr.bf16.mxu0 %v3907_v21 }
 0x205   : > { %1998 = vmatpush1.bf16.msra.mxu1 %v3902_v22  ;;  %2071 = vmatpush1.bf16.msra.mxu0 %v3905_v23 }
 0x206   : > { %1999 = vmatprep.subr.bf16.mxu1 %v3910_v24  ;;  %2072 = vmatprep.subr.bf16.mxu0 %v3913_v25 }
 0x209   : > { %2000 = vmatpush1.bf16.msra.mxu1 %v3908_v26  ;;  %2073 = vmatpush1.bf16.msra.mxu0 %v3911_v27 }
 0x20c   : > { %2002 = vmatmul.mubr.bf16.vlgmr.msra.gmra.mrb[4].mxu1 %v4421_v11  ;;  %2075 = vmatmul.mubr.bf16.vlgmr.msra.gmra.mrb[20].mxu0 %v4421_v11  ;;  %v3914_v11 = vld [vmem:[%s5181_s9 + $0x40] sm:$0xff]  }
 0x20d   : > { %2011 = vmatprep.mubr.bf16.mxu1 %v4432_v62  ;;  %2084 = vmatprep.mubr.bf16.mxu0 %v4432_v62  ;;  %v3916_v62 = vld [vmem:[%s5181_s9 + $0xc0] sm:$0xff]  }
 0x20e   : > { %3466 = vmatprep.subr.bf16.mxu1 %v3914_v11  ;;  %3506 = vmatprep.subr.bf16.mxu0 %v3916_v62 }
 0x214   : > { %2012 = vmatmul.mubr.bf16.gmra.mrb[8].mxu1 %v4429_v32  ;;  %2085 = vmatmul.mubr.bf16.gmra.mrb[24].mxu0 %v4429_v32  ;;  %v3915_v32 = vld [vmem:[%s5181_s9] sm:$0xff]  }
 0x215   : > { %2021 = vmatprep.mubr.bf16.mxu1 %v4446_v53  ;;  %2094 = vmatprep.mubr.bf16.mxu0 %v4446_v53  ;;  %v3918_v53 = vld [vmem:[%s5181_s9 + $0x48] sm:$0xff]  }
 0x216   : > { %3467 = vmatpush3.bf16.msra.mxu1 %v3915_v32  ;;  %v3038_v58 = vpop.permute.xlu1 %3037  ;;  %v3048_v2 = vpop.permute.xlu0 %3047 }
 0x217   : > { %3468 = vmatprep.subr.bf16.mxu1 %v3918_v53  ;;  %v3044_v4 = vmul.f32 %v3459_v63, %v3038_v58  ;;  %v3054_v5 = vmul.f32 %v3460_v0, %v3048_v2  ;;  %v4856_v58 = vld [vmem:[%s5187_s15 + $0x40] sm:$0xff]  ;;  %v4861_v63 = vld [vmem:[%s5187_s15 + $0x48] sm:$0xff] }
 0x219   : > { %v3055_v16 = vadd.f32 %v3054_v5, %v3044_v4 }
 0x21b   : > { %v3059_v7 = vpop.permute.xlu1 %3058 }
 0x21c   : > { %2022 = vmatmul.mubr.bf16.gmra.mrb[12].mxu1 %v4443_v50  ;;  %2095 = vmatmul.mubr.bf16.gmra.mrb[28].mxu0 %v4443_v50  ;;  %v3917_v50 = vld [vmem:[%s5181_s9 + $0x80] sm:$0xff]   ;;  %v3065_v17 = vmul.f32 %v3461_v6, %v3059_v7 }
 0x21d   : > { %2031 = vmatprep.mubr.bf16.mxu1 %v4469_v45  ;;  %2104 = vmatprep.mubr.bf16.mxu0 %v4469_v45  ;;  %v3919_v45 = vld [vmem:[%s5181_s9 + $0x8] sm:$0xff]  }
 0x21e   : > { %3507 = vmatpush3.bf16.msra.mxu0 %v3917_v50  ;;  %3469 = vmatpush3.bf16.msra.mxu1 %v3919_v45  ;;  %v3066_v62 = vadd.f32 %v3065_v17, %v3055_v16 }
 0x21f   : > { %3470 = vmatprep.subr.bf16.mxu1 %v3922_v15 }
 0x222   : > { %3471 = vmatpush3.bf16.msra.mxu1 %v3923_v14 }
 0x223   : > { %3472 = vmatprep.subr.bf16.mxu1 %v3926_v33 }
 0x224   : > { %2032 = vmatmul.mubr.bf16.gmra.mrb[16].mxu1 %v4467_v41  ;;  %2105 = vmatmul.mubr.bf16.gmra.mrb[32].mxu0 %v4467_v41  ;;  %v3920_v41 = vld [vmem:[%s5181_s9 + $0xc8] sm:$0xff]  }
 0x225   : > { %3508 = vmatprep.subr.bf16.mxu0 %v3920_v41 }
 0x226   : > { %3509 = vmatpush3.bf16.msra.mxu0 %v3921_v28  ;;  %3473 = vmatpush3.bf16.msra.mxu1 %v3927_v36  ;;  %v3462_v28 = vld [vmem:[%s5186_s14] ss:$0 sm:$0xff] }
 0x227   : > { %3510 = vmatprep.subr.bf16.mxu0 %v3924_v29  ;;  %3474 = vmatprep.subr.bf16.mxu1 %v3930_v38  ;;  %v4788_v15 = vadd.f32 %v3462_v28, %v3066_v62 }
 0x229   : > { %v4791_v29 = vmul.f32 0.70710677, %v4788_v15 }
 0x22a   : > { %3511 = vmatpush3.bf16.msra.mxu0 %v3925_v30  ;;  %3475 = vmatpush3.bf16.msra.mxu1 %v3931_v40 }
 0x22b   : > { %3512 = vmatprep.subr.bf16.mxu0 %v3928_v34  ;;  %3476 = vmatprep.subr.bf16.mxu1 %v3934_v44  ;;  %v3079_v14 = vand.u32 2147483647, %v4791_v29  ;;  %v4804_v44 = vld [vmem:[%s5187_s15] sm:$0xff]  ;;  %vm3077_vm7 = vcmp.ge.f32.partialorder %v4791_v29, 0.0 }
 0x22c   : > { %v3114_v29 = vld [vmem:[%s5187_s15 + $0x60] sm:$0xff] }
 0x22d   : > { %v3080_v30 = vmul.f32 0.3275911, %v3079_v14 }
 0x22e   : > { %3513 = vmatpush3.bf16.msra.mxu0 %v3929_v37  ;;  %3477 = vmatpush3.bf16.msra.mxu1 %v3935_v47  ;;  %v3093_v37 = vsub.f32 0.0, %v3079_v14  ;;  %v4812_v47 = vsub.s32 2, %v4400_v56 }
 0x22f   : > { %3514 = vmatprep.subr.bf16.mxu0 %v3932_v39  ;;  %3478 = vmatprep.subr.bf16.mxu1 %v3938_v49  ;;  %v3081_v33 = vadd.f32 1.0, %v3080_v30  ;;  %v4822_v49 = vld [vmem:[%s5187_s15 + $0x18] sm:$0xff] }
 0x230   : > { %v3094_v39 = vmul.f32 %v3093_v37, %v3079_v14 }
 0x231   : > { %3946 = vrcp.f32 %v3081_v33 }
 0x232   : > { %3515 = vmatpush3.bf16.msra.mxu0 %v3933_v42  ;;  %3479 = vmatpush3.bf16.msra.mxu1 %v3939_v60  ;;  %v2379_v42 = vld [vmem:[%s5180_s8] sm:$0xf] }
 0x233   : > { %3516 = vmatprep.subr.bf16.mxu0 %v3936_v46  ;;  %3480 = vmatprep.subr.bf16.mxu1 %v3942_v54  ;;  %v4809_v46 = vld [vmem:[%s5187_s15 + $0x8] sm:$0xff]  ;;  %v3095_v54 = vmul.f32 1.442695, %v3094_v39  ;;  %v4848_v35 = vrot.slane %v2379_v42, %v4403_v57  ;;  %v4866_v2 = vrot.slane %v2379_v42, %v4409_v59 }
 0x235   : > { %3948 = vpow2.f32 %v3095_v54 }
 0x236   : > { %3517 = vmatpush3.bf16.msra.mxu0 %v3937_v48  ;;  %3481 = vmatpush3.bf16.msra.mxu1 %v3943_v55  ;;  %v4817_v48 = vld [vmem:[%s5187_s15 + $0x10] sm:$0xff] }
 0x237   : > { %3518 = vmatprep.subr.bf16.mxu0 %v3940_v51  ;;  %3626 = vmatprep.subr.bf16.mxu1 %v5190_v61  ;;  %v4827_v51 = vld [vmem:[%s5187_s15 + $0x20] sm:$0xff]  ;;  %v4840_v55 = vld [vmem:[%s5187_s15 + $0x30] sm:$0xff] }
 0x23a   : > { %3519 = vmatpush3.bf16.msra.mxu0 %v3941_v52  ;;  %v4830_v52 = vsub.s32 3, %v4400_v56  ;;  %v4851_v56 = vrot.slane %v2379_v42, %v4812_v47 }
 0x23b   : > { %3520 = vmatprep.subr.bf16.mxu0 %v3944_v1  ;;  %v4794_v34 = vpop.eup %3946  ;;  %v4835_v1 = vld [vmem:[%s5187_s15 + $0x28] sm:$0xff] }
 0x23c   : > { %v3084_v36 = vmul.f32 1.0614054, %v4794_v34  ;;  %v4869_v3 = vrot.slane %v2379_v42, %v4830_v52 }
 0x23e   : > { %3521 = vmatpush3.bf16.msra.mxu0 %v3945_v31  ;;  %v3085_v38 = vadd.f32 -1.4531521, %v3084_v36  ;;  %v4845_v31 = vld [vmem:[%s5187_s15 + $0x38] sm:$0xff] }
 0x23f   : > { %3638 = vmatprep.subr.bf16.mxu0 %v5190_v61 }
 0x240   : > { %v3086_v40 = vmul.f32 %v4794_v34, %v3085_v38 }
 0x242   : > { %v3087_v43 = vadd.f32 1.4214138, %v3086_v40 }
 0x29f   : > { %v1529_v8 = vpop.f32.mrb[0].mxu1  ;;  %v1570_v9 = vpop.f32.mrb[16].mxu0 }
 0x2a0   : > { %v1531_v12 = vpop.f32.mrb[1].mxu1  ;;  %v1572_v13 = vpop.f32.mrb[17].mxu0 }
 0x2a1   : > { %v2119_v18 = vcombine.low %v1529_v8, %v1531_v12  ;;  %v2120_v19 = vcombine.high %v1529_v8, %v1531_v12  ;;  %v2121_v20 = vcombine.low %v1570_v9, %v1572_v13  ;;  %v2122_v21 = vcombine.high %v1570_v9, %v1572_v13  ;;  %v1533_v22 = vpop.f32.mrb[2].mxu1  ;;  %v1574_v23 = vpop.f32.mrb[18].mxu0 }
 0x2a2   : > { %v1534_v24 = vpop.f32.mrb[3].mxu1  ;;  %v1575_v25 = vpop.f32.mrb[19].mxu0 }
 0x2a3   : > { %v2129_v26 = vrot.slane %v2119_v18, %v2128_v10  ;;  %v2136_v27 = vrot.slane %v2120_v19, %v2128_v10  ;;  %v2143_v11 = vrot.slane %v2121_v20, %v2128_v10  ;;  %v2150_v32 = vrot.slane %v2122_v21, %v2128_v10 }
 0x2a4   : > { %v3088_v19 = vmul.f32 %v4794_v34, %v3087_v43 }
 0x2a5   : > { %v2151_v50 = vcombine.low %v2129_v26, %v2143_v11  ;;  %v2152_v53 = vcombine.high %v2129_v26, %v2143_v11  ;;  %v2153_v41 = vcombine.low %v2136_v27, %v2150_v32  ;;  %v2154_v45 = vcombine.high %v2136_v27, %v2150_v32 }
 0x2a7   : > { %v2161_v60 = vrot.slane %v2151_v50, %v2128_v10  ;;  %v4863_v0 = vrot.slane %v2152_v53, %v2128_v10  ;;  %v4873_v5 = vrot.slane %v2153_v41, %v2128_v10  ;;  %v4881_v9 = vrot.slane %v2154_v45, %v2128_v10 }
 0x2a8   : > { %v3089_v45 = vadd.f32 -0.28449672, %v3088_v19 }
 0x2a9   : > { %v2190_v12 = vrot.slane %v2161_v60, %v4403_v57  ;;  %v2198_v16 = vrot.slane %v2161_v60, %v4812_v47  ;;  %v2194_v17 = vrot.slane %v2161_v60, %v4409_v59  ;;  %v4888_v18 = vcombine.high %v2161_v60, %v2161_v60 }
 0x2aa   : > { %v2202_v20 = vrot.slane %v2161_v60, %v4830_v52  ;;  %v2206_v10 = vrot.slane %v4863_v0, %v4403_v57  ;;  %v2214_v21 = vrot.slane %v4863_v0, %v4812_v47  ;;  %v4898_v22 = vcombine.high %v4863_v0, %v4863_v0 }
 0x2ab   : > { %v2210_v23 = vrot.slane %v4863_v0, %v4409_v59  ;;  %v2218_v24 = vrot.slane %v4863_v0, %v4830_v52  ;;  %v4916_v62 = vcombine.high %v4873_v5, %v4873_v5  ;;  %v2222_v50 = vrot.slane %v4888_v18, %v4403_v57 }
 0x2ac   : > { %v2230_v53 = vrot.slane %v4888_v18, %v4812_v47  ;;  %v2226_v28 = vrot.slane %v4888_v18, %v4409_v59  ;;  %v2234_v14 = vrot.slane %v4888_v18, %v4830_v52  ;;  %v2238_v30 = vrot.slane %v4898_v22, %v4403_v57 }
 0x2ad   : > { %v2246_v33 = vrot.slane %v4898_v22, %v4812_v47  ;;  %v2242_v38 = vrot.slane %v4898_v22, %v4409_v59  ;;  %v2250_v39 = vrot.slane %v4898_v22, %v4830_v52  ;;  %v4944_v19 = vcombine.high %v4881_v9, %v4881_v9 }
 0x2ae   : > { %v3090_v42 = vmul.f32 %v4794_v34, %v3089_v45 }
 0x2df   : > { %v2003_v36 = vpop.f32.mrb[4].mxu1  ;;  %v2076_v37 = vpop.f32.mrb[20].mxu0 }
 0x2e0   : > { %v2347_v60 = vadd.f32 %v2190_v12, %v2003_v36  ;;  %v2349_v54 = vadd.f32 %v2198_v16, %v2076_v37  ;;  %v2005_v43 = vpop.f32.mrb[5].mxu1  ;;  %v2078_v0 = vpop.f32.mrb[21].mxu0 }
 0x2e1   : > { %v2348_v13 = vadd.f32 %v2194_v17, %v2005_v43  ;;  %v2350_v8 = vadd.f32 %v2202_v20, %v2078_v0  ;;  %v2007_v7 = vpop.f32.mrb[6].mxu1  ;;  %v2080_v6 = vpop.f32.mrb[22].mxu0 }
 0x2e2   : > { %v4949_v12 = vpop.eup %3948  ;;  %v2401_v16 = vadd.f32 %v4848_v35, %v2347_v60  ;;  %v2403_v36 = vadd.f32 %v4851_v56, %v2349_v54  ;;  %v2351_v37 = vadd.f32 %v2206_v10, %v2007_v7  ;;  %v2353_v18 = vadd.f32 %v2214_v21, %v2080_v6  ;;  %v2009_v41 = vpop.f32.mrb[7].mxu1 }
 0x2e3   : > { %v2082_v32 = vpop.f32.mrb[23].mxu0  ;;  %v2402_v17 = vadd.f32 %v4866_v2, %v2348_v13  ;;  %v2404_v20 = vadd.f32 %v4869_v3, %v2350_v8  ;;  %v2352_v43 = vadd.f32 %v2210_v23, %v2009_v41  ;;  %v3091_v8 = vadd.f32 0.2548296, %v3090_v42 }
 0x2e4   : > { %v2354_v0 = vadd.f32 %v2218_v24, %v2082_v32  ;;  %v2405_v40 = vadd.f32 %v4848_v35, %v2351_v37  ;;  %v2407_v45 = vadd.f32 %v4851_v56, %v2353_v18  ;;  %v2433_v10 = vmax.f32 %v2401_v16, 0.0 }
 0x2e5   : > { %v2406_v6 = vadd.f32 %v4866_v2, %v2352_v43  ;;  %v2435_v21 = vmax.f32 %v2403_v36, 0.0  ;;  %v2434_v32 = vmax.f32 %v2402_v17, 0.0  ;;  %v2436_v41 = vmax.f32 %v2404_v20, 0.0 }
 0x2e6   : > { %v2408_v7 = vadd.f32 %v4869_v3, %v2354_v0  ;;  %v2437_v23 = vmax.f32 %v2405_v40, 0.0  ;;  %v2439_v24 = vmax.f32 %v2407_v45, 0.0  ;;  %v3092_v22 = vmul.f32 %v4794_v34, %v3091_v8 }
 0x2e7   : > { %v2438_v54 = vmax.f32 %v2406_v6, 0.0  ;;  %v2013_v37 = vpop.f32.mrb[8].mxu1  ;;  %v2086_v11 = vpop.f32.mrb[24].mxu0  ;;  %v5199_v8 = vrot.slane %v4873_v5, %v4812_v47 }
 0x2e8   : > { %v2440_v18 = vmax.f32 %v2408_v7, 0.0  ;;  %v2465_v27 = vpack.c.bf16 %v2437_v23, %v2433_v10  ;;  %v2467_v60 = vpack.c.bf16 %v2439_v24, %v2435_v21  ;;  %v2355_v26 = vadd.f32 %v2222_v50, %v2013_v37  ;;  %v2015_v25 = vpop.f32.mrb[9].mxu1  ;;  %v2088_v0 = vpop.f32.mrb[25].mxu0 }
 0x2e9   : > { %v2357_v43 = vadd.f32 %v2230_v53, %v2086_v11  ;;  %v2356_v61 = vadd.f32 %v2226_v28, %v2015_v25  ;;  %v2358_v4 = vadd.f32 %v2234_v14, %v2088_v0  ;;  %v2017_v13 = vpop.f32.mrb[10].mxu1  ;;  %v2090_v42 = vpop.f32.mrb[26].mxu0  ;;  %v2466_v16 = vpack.c.bf16 %v2438_v54, %v2434_v32 }
 0x2ea   : > { %v2468_v36 = vpack.c.bf16 %v2440_v18, %v2436_v41  ;;  %v2409_v40 = vadd.f32 %v4848_v35, %v2355_v26  ;;  %v2359_v20 = vadd.f32 %v2238_v30, %v2017_v13  ;;  %v2361_v11 = vadd.f32 %v2246_v33, %v2090_v42  ;;  %v2019_v50 = vpop.f32.mrb[11].mxu1  ;;  %v2092_v53 = vpop.f32.mrb[27].mxu0 }
 0x2eb   : > { %v2411_v17 = vadd.f32 %v4851_v56, %v2357_v43  ;;  %v2410_v25 = vadd.f32 %v4866_v2, %v2356_v61  ;;  %v2412_v28 = vadd.f32 %v4869_v3, %v2358_v4  ;;  %v2360_v26 = vadd.f32 %v2242_v38, %v2019_v50  ;;  %2776 = vmatprep.mubr.bf16.mxu1 %v2466_v16 }
 0x2ec   : > { %v2362_v14 = vadd.f32 %v2250_v39, %v2092_v53  ;;  %v2413_v30 = vadd.f32 %v4848_v35, %v2359_v20  ;;  %v2415_v45 = vadd.f32 %v4851_v56, %v2361_v11  ;;  %2841 = vmatprep.mubr.bf16.mxu0 %v2468_v36  ;;  %2777 = vmatmul.mubr.bf16.vlgmr.msra.gmra.mrb[20].mxu1 %v2465_v27  ;;  %v2441_v39 = vmax.f32 %v2409_v40, 0.0 }
 0x2ed   : > { %v2310_v61 = vrot.slane %v4944_v19, %v4812_v47  ;;  %v2414_v4 = vadd.f32 %v4866_v2, %v2360_v26  ;;  %2842 = vmatmul.mubr.bf16.vlgmr.msra.gmra.mrb[36].mxu0 %v2467_v60  ;;  %v2306_v38 = vrot.slane %v4944_v19, %v4409_v59  ;;  %v2443_v6 = vmax.f32 %v2411_v17, 0.0 }
 0x2ee   : > { %v2416_v33 = vadd.f32 %v4869_v3, %v2362_v14  ;;  %v2445_v7 = vmax.f32 %v2413_v30, 0.0  ;;  %v2447_v13 = vmax.f32 %v2415_v45, 0.0  ;;  %v5196_v27 = vpack.c.bf16 %v4809_v46, %v4804_v44 }
 0x2ef   : > { %v2442_v10 = vmax.f32 %v2410_v25, 0.0  ;;  %v2444_v21 = vmax.f32 %v2412_v28, 0.0  ;;  %v2446_v23 = vmax.f32 %v2414_v4, 0.0  ;;  %v2023_v32 = vpop.f32.mrb[12].mxu1  ;;  %v2096_v41 = vpop.f32.mrb[28].mxu0  ;;  %v5197_v60 = vmov 0.0|0.0  }
 0x2f0   : > { %3640 = vmatpush3.bf16.msra.mxu0 %v5196_v27  ;;  %v2448_v24 = vmax.f32 %v2416_v33, 0.0  ;;  %v5198_v54 = vrot.slane %v4873_v5, %v4403_v57  ;;  %v2365_v18 = vadd.f32 %v5199_v8, %v2096_v41  ;;  %v2025_v37 = vpop.f32.mrb[13].mxu1  ;;  %v2098_v43 = vpop.f32.mrb[29].mxu0  ;;  %v2469_v44 = vpack.c.bf16 %v2445_v7, %v2441_v39 }
 0x2f1   : > { %3641 = vmatprep.subr.bf16.mxu0 %v5197_v60  ;;  %v2471_v46 = vpack.c.bf16 %v2447_v13, %v2443_v6  ;;  %v5200_v0 = vrot.slane %v4873_v5, %v4409_v59  ;;  %v5201_v16 = vrot.slane %v4873_v5, %v4830_v52  ;;  %v2027_v40 = vpop.f32.mrb[14].mxu1  ;;  %v2100_v17 = vpop.f32.mrb[30].mxu0  ;;  %v2470_v20 = vpack.c.bf16 %v2446_v23, %v2442_v10 }
 0x2f2   : > { %v2363_v34 = vadd.f32 %v5198_v54, %v2023_v32  ;;  %v2472_v11 = vpack.c.bf16 %v2448_v24, %v2444_v21  ;;  %v2419_v53 = vadd.f32 %v4851_v56, %v2365_v18  ;;  %v5202_v25 = vrot.slane %v4881_v9, %v4403_v57  ;;  %v2029_v30 = vpop.f32.mrb[15].mxu1  ;;  %v2102_v45 = vpop.f32.mrb[31].mxu0 }
 0x2f3   : > { %v2364_v42 = vadd.f32 %v5200_v0, %v2025_v37  ;;  %v2366_v36 = vadd.f32 %v5201_v16, %v2098_v43  ;;  %v5203_v26 = vrot.slane %v4881_v9, %v4812_v47  ;;  %v5204_v5 = vpack.c.bf16 %v4822_v49, %v4817_v48  ;;  %2784 = vmatprep.mubr.bf16.mxu1 %v2470_v20 }
 0x2f4   : > { %v2417_v50 = vadd.f32 %v4848_v35, %v2363_v34  ;;  %v2367_v28 = vadd.f32 %v5202_v25, %v2027_v40  ;;  %v5205_v39 = vrot.slane %v4881_v9, %v4409_v59  ;;  %v5206_v7 = vrot.slane %v4881_v9, %v4830_v52  ;;  %2849 = vmatprep.mubr.bf16.mxu0 %v2472_v11 }
 0x2f5   : > { %v2369_v14 = vadd.f32 %v5203_v26, %v2100_v17  ;;  %3643 = vmatpush3.bf16.msra.mxu0 %v5204_v5  ;;  %v2418_v4 = vadd.f32 %v4866_v2, %v2364_v42  ;;  %v2420_v33 = vadd.f32 %v4869_v3, %v2366_v36  ;;  %2785 = vmatmul.mubr.bf16.gmra.mrb[24].mxu1 %v2469_v44  ;;  %v2451_v24 = vmax.f32 %v2419_v53, 0.0  ;;  %v3113_v26 = vld [vmem:[%s5187_s15 + $0x58] sm:$0xff] }
 0x2f6   : > { %v2368_v6 = vadd.f32 %v5205_v39, %v2029_v30  ;;  %v2370_v13 = vadd.f32 %v5206_v7, %v2102_v45  ;;  %v2421_v27 = vadd.f32 %v4848_v35, %v2367_v28  ;;  %v2314_v48 = vrot.slane %v4944_v19, %v4830_v52  ;;  %2850 = vmatmul.mubr.bf16.gmra.mrb[40].mxu0 %v2471_v46  ;;  %v3112_v28 = vld [vmem:[%s5187_s15 + $0x50] sm:$0xff] }
 0x2f7   : > { %v2423_v10 = vadd.f32 %v4851_v56, %v2369_v14  ;;  %v5033_v9 = vmul.f32 %v4949_v12, %v3092_v22  ;;  %3644 = vmatprep.subr.bf16.mxu0 %v5197_v60  ;;  %v2449_v23 = vmax.f32 %v2417_v50, 0.0  ;;  %v5207_v54 = vpack.c.bf16 %v4835_v1, %v4827_v51  ;;  %v2033_v43 = vpop.f32.mrb[16].mxu1  ;;  %v2106_v44 = vpop.f32.mrb[32].mxu0 }
 0x2f8   : > { %v2422_v49 = vadd.f32 %v4866_v2, %v2368_v6  ;;  %v2424_v21 = vadd.f32 %v4869_v3, %v2370_v13  ;;  %v2453_v32 = vmax.f32 %v2421_v27, 0.0  ;;  %v2450_v34 = vmax.f32 %v2418_v4, 0.0  ;;  %v2035_v42 = vpop.f32.mrb[17].mxu1  ;;  %v2108_v16 = vpop.f32.mrb[33].mxu0 }
 0x2f9   : > { %v2455_v41 = vmax.f32 %v2423_v10, 0.0  ;;  %3646 = vmatpush3.bf16.msra.mxu0 %v5207_v54  ;;  %v2452_v8 = vmax.f32 %v2420_v33, 0.0  ;;  %v5208_v12 = vrot.slane %v4916_v62, %v4403_v57  ;;  %v5209_v46 = vrot.slane %v4916_v62, %v4812_v47  ;;  %v2037_v11 = vpop.f32.mrb[18].mxu1  ;;  %v2110_v50 = vpop.f32.mrb[34].mxu0  ;;  %v3116_v54 = vld [vmem:[%s5187_s15 + $0x70] sm:$0xff] }
 0x2fa   : > { %v2454_v18 = vmax.f32 %v2422_v49, 0.0  ;;  %v2456_v37 = vmax.f32 %v2424_v21, 0.0  ;;  %3647 = vmatprep.subr.bf16.mxu0 %v5197_v60  ;;  %v2473_v51 = vpack.c.bf16 %v2453_v32, %v2449_v23  ;;  %v5210_v36 = vrot.slane %v4916_v62, %v4409_v59  ;;  %v2039_v5 = vpop.f32.mrb[19].mxu1  ;;  %v2112_v4 = vpop.f32.mrb[35].mxu0 }
 0x2fb   : > { %v2371_v22 = vadd.f32 %v5208_v12, %v2033_v43  ;;  %v2373_v0 = vadd.f32 %v5209_v46, %v2106_v44  ;;  %v2475_v1 = vpack.c.bf16 %v2455_v41, %v2451_v24  ;;  %v5211_v17 = vrot.slane %v4916_v62, %v4830_v52  ;;  %v2931_v12 = vld [vmem:[%s5183_s11] sm:$0xff]  ;;  %v2933_v46 = vld [vmem:[%s5183_s11 + $0x10] sm:$0xff] }
 0x2fc   : > { %v2372_v40 = vadd.f32 %v5210_v36, %v2035_v42  ;;  %v2474_v53 = vpack.c.bf16 %v2454_v18, %v2450_v34  ;;  %v2476_v25 = vpack.c.bf16 %v2456_v37, %v2452_v8  ;;  %v5212_v52 = vrot.slane %v4944_v19, %v4403_v57  ;;  %v3117_v34 = vld [vmem:[%s5187_s15 + $0x78] sm:$0xff]  ;;  %v2937_v36 = vld [vmem:[%s5183_s11 + $0x30] sm:$0xff] }
 0x2fd   : > { %v2374_v20 = vadd.f32 %v5211_v17, %v2108_v16  ;;  %v2425_v14 = vadd.f32 %v4848_v35, %v2371_v22  ;;  %v2427_v30 = vadd.f32 %v4851_v56, %v2373_v0  ;;  %v2377_v45 = vadd.f32 %v2310_v61, %v2110_v50  ;;  %v2934_v0 = vld [vmem:[%s5183_s11 + $0x18] sm:$0xff]  ;;  %v2935_v16 = vld [vmem:[%s5183_s11 + $0x20] sm:$0xff] }
 0x2fe   : > { %v2375_v62 = vadd.f32 %v5212_v52, %v2037_v11  ;;  %v5213_v33 = vpack.c.bf16 %v4845_v31, %v4840_v55  ;;  %v2426_v39 = vadd.f32 %v4866_v2, %v2372_v40  ;;  %v2376_v7 = vadd.f32 %v2306_v38, %v2039_v5  ;;  %2792 = vmatprep.mubr.bf16.mxu1 %v2474_v53  ;;  %v2938_v40 = vld [vmem:[%s5183_s11 + $0x38] sm:$0xff]  ;;  %v5131_v50 = vld [vmem:[%s5182_s10] ss:$0 sm:$0xff] }
 0x2ff   : > { %v2428_v6 = vadd.f32 %v4869_v3, %v2374_v20  ;;  %v2378_v57 = vadd.f32 %v2314_v48, %v2112_v4  ;;  %v2431_v47 = vadd.f32 %v4851_v56, %v2377_v45  ;;  %2857 = vmatprep.mubr.bf16.mxu0 %v2476_v25  ;;  %2793 = vmatmul.mubr.bf16.gmra.mrb[28].mxu1 %v2473_v51  ;;  %v3963_v27 = vmov -1.0   ;;  %v2936_v51 = vld [vmem:[%s5183_s11 + $0x28] sm:$0xff] }
 0x300   : > { %3649 = vmatpush3.bf16.msra.mxu0 %v5213_v33  ;;  %v2429_v13 = vadd.f32 %v4848_v35, %v2375_v62  ;;  %v3654_v61 = vpack.c.bf16 %v3113_v26, %v3112_v28  ;;  %v2430_v55 = vadd.f32 %v4866_v2, %v2376_v7  ;;  %v3078_v10 = vsel %vm3077_vm7, 1.0, %v3963_v27 }
 0x301   : > { %v2432_v31 = vadd.f32 %v4869_v3, %v2378_v57  ;;  %2858 = vmatmul.mubr.bf16.gmra.mrb[44].mxu0 %v2475_v1  ;;  %v3098_v59 = vsub.f32 1.0, %v5033_v9  ;;  %3650 = vmatprep.subr.bf16.mxu0 %v5197_v60  ;;  %v2457_v19 = vmax.f32 %v2425_v14, 0.0  ;;  %v2459_v35 = vmax.f32 %v2427_v30, 0.0  ;;  %v3115_v9 = vld [vmem:[%s5187_s15 + $0x68] sm:$0xff] }
 0x302   : > { %v2461_v38 = vmax.f32 %v2429_v13, 0.0  ;;  %v2463_v56 = vmax.f32 %v2431_v47, 0.0  ;;  %v5214_v48 = vpack.c.bf16 %v4861_v63, %v4856_v58  ;;  %v2458_v2 = vmax.f32 %v2426_v39, 0.0 }
 0x303   : > { %v2460_v49 = vmax.f32 %v2428_v6, 0.0  ;;  %v2462_v3 = vmax.f32 %v2430_v55, 0.0  ;;  %v2464_v21 = vmax.f32 %v2432_v31, 0.0  ;;  %v3099_v58 = vmul.f32 %v3098_v59, %v3078_v10 }
 0x304   : > { %3652 = vmatpush3.bf16.msra.mxu0 %v5214_v48  ;;  %v2477_v23 = vpack.c.bf16 %v2461_v38, %v2457_v19  ;;  %v2479_v24 = vpack.c.bf16 %v2463_v56, %v2459_v35  ;;  %v3657_v63 = vpack.c.bf16 %v3115_v9, %v3114_v29  ;;  %v3075_v8 = vmul.f32 0.5, %v4788_v15  ;;  %v2932_v15 = vld [vmem:[%s5183_s11 + $0x8] sm:$0xff] }
 0x305   : > { %3653 = vmatprep.subr.bf16.mxu0 %v5197_v60  ;;  %v2478_v32 = vpack.c.bf16 %v2462_v3, %v2458_v2  ;;  %v2480_v41 = vpack.c.bf16 %v2464_v21, %v2460_v49  ;;  %v3100_v18 = vadd.f32 1.0, %v3099_v58  ;;  %v3965_v37 = vmov 0.0  }
 0x306   : > { %v3660_v43 = vpack.c.bf16 %v3117_v34, %v3116_v54  ;;  %v3627_v22 = vpack.c.bf16 %v2932_v15, %v2931_v12  ;;  %v3630_v42 = vpack.c.bf16 %v2934_v0, %v2933_v46  ;;  %v3633_v1 = vpack.c.bf16 %v2936_v51, %v2935_v16 }
 0x307   : > { %2800 = vmatprep.mubr.bf16.mxu1 %v2478_v32  ;;  %2865 = vmatprep.mubr.bf16.mxu0 %v2480_v41  ;;  %v3101_v44 = vmul.f32 %v3100_v18, %v3075_v8  ;;  %v3636_v17 = vpack.c.bf16 %v2938_v40, %v2937_v36 }
 0x308   : > { %3655 = vmatpush3.bf16.msra.mxu0 %v3654_v61  ;;  %2801 = vmatmul.mubr.bf16.gmra.mrb[32].mxu1 %v2477_v23 }
 0x309   : > { %3656 = vmatprep.subr.bf16.mxu0 %v5197_v60  ;;  %2866 = vmatmul.mubr.bf16.gmra.mrb[48].mxu0 %v2479_v24 }
 0x30a   : > { %3588 = vmatprep.mubr.msk.f32.mxu1 %vm3964_vm8, %v3965_v37  ;;  %3623 = vmatprep.mubr.msk.f32.mxu0 %vm3964_vm8, %v3965_v37 }
 0x30b   : > { %3628 = vmatpush3.bf16.msra.mxu1 %v3627_v22 }
 0x30c   : > { %3658 = vmatpush3.bf16.msra.mxu0 %v3657_v63  ;;  %3629 = vmatprep.subr.bf16.mxu1 %v5197_v60 }
 0x30d   : > { %3659 = vmatprep.subr.bf16.mxu0 %v5197_v60 }
 0x30f   : > { %3631 = vmatpush3.bf16.msra.mxu1 %v3630_v42 }
 0x310   : > { %3661 = vmatpush3.bf16.msra.mxu0 %v3660_v43  ;;  %3632 = vmatprep.subr.bf16.mxu1 %v5197_v60 }
 0x313   : > { %3624 = vmatmul.mubr.f32.vlgmr.msra.gmra.mrb[52].mxu0 %v3101_v44  ;;  %3634 = vmatpush3.bf16.msra.mxu1 %v3633_v1 }
 0x314   : > { %3635 = vmatprep.subr.bf16.mxu1 %v5197_v60 }
 0x317   : > { %3637 = vmatpush3.bf16.msra.mxu1 %v3636_v17 }
 0x3bf   : > { %v3482_v20 = vpop.f32.mrb[20].mxu1 }
 0x3c0   : > { %v3522_v11 = vpop.f32.mrb[36].mxu0  ;;  %v3483_v53 = vpop.f32.mrb[21].mxu1 }
 0x3c1   : > { %v3484_v25 = vadd.f32 %v3483_v53, %v3482_v20  ;;  %v3523_v28 = vpop.f32.mrb[37].mxu0  ;;  %v3485_v26 = vpop.f32.mrb[22].mxu1 }
 0x3c2   : > { %v3524_v14 = vadd.f32 %v3523_v28, %v3522_v11  ;;  %v3525_v30 = vpop.f32.mrb[38].mxu0  ;;  %v3486_v52 = vpop.f32.mrb[23].mxu1 }
 0x3c3   : > { %v2779_v62 = vadd.f32 %v3484_v25, %v5131_v50  ;;  %v3487_v45 = vadd.f32 %v3486_v52, %v3485_v26  ;;  %v3526_v5 = vpop.f32.mrb[39].mxu0 }
 0x3c4   : > { %v3527_v60 = vadd.f32 %v3526_v5, %v3525_v30 }
 0x3c5   : > { %v2844_v4 = vadd.f32 %v3524_v14, %v2779_v62  ;;  %v2782_v33 = vadd.f32 %v3487_v45, %v5131_v50 }
 0x3c7   : > { %v2875_v39 = vsel %vm2874_vm9, %v2844_v4, -inf  ;;  %v2847_v6 = vadd.f32 %v3527_v60, %v2782_v33 }
 0x3c8   : > { %v3488_v7 = vpop.f32.mrb[24].mxu1  ;;  %v2876_v57 = vrot.slane %v2875_v39, 4 }
 0x3c9   : > { %v3528_v13 = vpop.f32.mrb[40].mxu0  ;;  %v3489_v47 = vpop.f32.mrb[25].mxu1  ;;  %v2882_v61 = vsel %vm2874_vm9, %v2847_v6, -inf }
 0x3ca   : > { %v3490_v55 = vadd.f32 %v3489_v47, %v3488_v7  ;;  %v3529_v31 = vpop.f32.mrb[41].mxu0  ;;  %v3491_v27 = vpop.f32.mrb[26].mxu1  ;;  %v2877_v10 = vmax.f32 %v2875_v39, %v2876_v57  ;;  %v2883_v59 = vrot.slane %v2882_v61, 4 }
 0x3cb   : > { %v3530_v19 = vadd.f32 %v3529_v31, %v3528_v13  ;;  %v3531_v35 = vpop.f32.mrb[42].mxu0  ;;  %v3492_v38 = vpop.f32.mrb[27].mxu1 }
 0x3cc   : > { %v2787_v56 = vadd.f32 %v3490_v55, %v5131_v50  ;;  %v3493_v48 = vadd.f32 %v3492_v38, %v3491_v27  ;;  %v3532_v2 = vpop.f32.mrb[43].mxu0  ;;  %v2878_v49 = vrot.slane %v2877_v10, 2  ;;  %v2884_v3 = vmax.f32 %v2882_v61, %v2883_v59 }
 0x3cd   : > { %v3533_v21 = vadd.f32 %v3532_v2, %v3531_v35 }
 0x3ce   : > { %v2852_v29 = vadd.f32 %v3530_v19, %v2787_v56  ;;  %v2790_v9 = vadd.f32 %v3493_v48, %v5131_v50  ;;  %v2879_v23 = vmax.f32 %v2877_v10, %v2878_v49  ;;  %v2885_v24 = vrot.slane %v2884_v3, 2 }
 0x3d0   : > { %v2889_v32 = vsel %vm2874_vm9, %v2852_v29, -inf  ;;  %v2855_v41 = vadd.f32 %v3533_v21, %v2790_v9  ;;  %v2880_v63 = vrot.slane %v2879_v23, 1  ;;  %v2886_v54 = vmax.f32 %v2884_v3, %v2885_v24 }
 0x3d1   : > { %v2890_v34 = vrot.slane %v2889_v32, 4 }
 0x3d2   : > { %v3494_v58 = vpop.f32.mrb[28].mxu1  ;;  %v2896_v37 = vsel %vm2874_vm9, %v2855_v41, -inf  ;;  %v2887_v15 = vrot.slane %v2886_v54, 1  ;;  %v2881_v16 = vmax.f32 %v2879_v23, %v2880_v63 }
 0x3d3   : > { %v3495_v18 = vpop.f32.mrb[29].mxu1  ;;  %v2891_v22 = vmax.f32 %v2889_v32, %v2890_v34  ;;  %v2897_v46 = vrot.slane %v2896_v37, 4  ;;  %v3463_v32 = vld [vmem:[%s5188_s16] ss:$0 sm:$0xff] }
 0x3d4   : > { %v3534_v8 = vpop.f32.mrb[44].mxu0  ;;  %v3496_v43 = vadd.f32 %v3495_v18, %v3494_v58  ;;  %v3497_v12 = vpop.f32.mrb[30].mxu1  ;;  %v2888_v17 = vmax.f32 %v2886_v54, %v2887_v15 }
 0x3d5   : > { %v3535_v44 = vpop.f32.mrb[45].mxu0  ;;  %v3498_v42 = vpop.f32.mrb[31].mxu1  ;;  %v2892_v20 = vrot.slane %v2891_v22, 2  ;;  %v2898_v11 = vmax.f32 %v2896_v37, %v2897_v46 }
 0x3d6   : > { %v3537_v0 = vpop.f32.mrb[46].mxu0  ;;  %v2795_v51 = vadd.f32 %v3496_v43, %v5131_v50  ;;  %v3536_v1 = vadd.f32 %v3535_v44, %v3534_v8  ;;  %v3499_v36 = vadd.f32 %v3498_v42, %v3497_v12  ;;  %v2954_v26 = vsel %vm1150_vm0, %v2888_v17, %v2881_v16 }
 0x3d7   : > { %v3538_v40 = vpop.f32.mrb[47].mxu0  ;;  %v2893_v14 = vmax.f32 %v2891_v22, %v2892_v20  ;;  %v2899_v30 = vrot.slane %v2898_v11, 2 }
 0x3d8   : > { %v3539_v53 = vadd.f32 %v3538_v40, %v3537_v0  ;;  %v2860_v25 = vadd.f32 %v3536_v1, %v2795_v51  ;;  %v2798_v28 = vadd.f32 %v3499_v36, %v5131_v50 }
 0x3d9   : > { %v2894_v5 = vrot.slane %v2893_v14, 1  ;;  %v2900_v60 = vmax.f32 %v2898_v11, %v2899_v30 }
 0x3da   : > { %v2903_v52 = vsel %vm2874_vm9, %v2860_v25, -inf  ;;  %v2863_v62 = vadd.f32 %v3539_v53, %v2798_v28  ;;  %v3457_v28 = vld [vmem:[%s5184_s12] ss:$0 sm:$0xff] }
 0x3db   : > { %v3500_v45 = vpop.f32.mrb[32].mxu1  ;;  %v2904_v4 = vrot.slane %v2903_v52, 4  ;;  %v2895_v47 = vmax.f32 %v2893_v14, %v2894_v5  ;;  %v2901_v61 = vrot.slane %v2900_v60, 1 }
 0x3dc   : > { %v3540_v33 = vpop.f32.mrb[48].mxu0  ;;  %v3501_v39 = vpop.f32.mrb[33].mxu1  ;;  %v2910_v6 = vsel %vm2874_vm9, %v2863_v62, -inf }
 0x3dd   : > { %v3502_v7 = vadd.f32 %v3501_v39, %v3500_v45  ;;  %v3541_v57 = vpop.f32.mrb[49].mxu0  ;;  %v3503_v13 = vpop.f32.mrb[34].mxu1  ;;  %v2905_v55 = vmax.f32 %v2903_v52, %v2904_v4  ;;  %v2911_v31 = vrot.slane %v2910_v6, 4  ;;  %v2955_v56 = vsel %vm1152_vm1, %v2895_v47, %v2954_v26 }
 0x3de   : > { %v3543_v27 = vpop.f32.mrb[50].mxu0  ;;  %v3504_v10 = vpop.f32.mrb[35].mxu1  ;;  %v3542_v19 = vadd.f32 %v3541_v57, %v3540_v33  ;;  %v2902_v48 = vmax.f32 %v2900_v60, %v2901_v61 }
 0x3df   : > { %v2803_v59 = vadd.f32 %v3502_v7, %v5131_v50  ;;  %v3505_v35 = vadd.f32 %v3504_v10, %v3503_v13  ;;  %v3544_v38 = vpop.f32.mrb[51].mxu0  ;;  %v2906_v2 = vrot.slane %v2905_v55, 2  ;;  %v2912_v49 = vmax.f32 %v2910_v6, %v2911_v31 }
 0x3e0   : > { %v3545_v29 = vadd.f32 %v3544_v38, %v3543_v27  ;;  %v2956_v9 = vsel %vm1154_vm2, %v2902_v48, %v2955_v56 }
 0x3e1   : > { %v2868_v3 = vadd.f32 %v3542_v19, %v2803_v59  ;;  %v2806_v21 = vadd.f32 %v3505_v35, %v5131_v50  ;;  %v2907_v23 = vmax.f32 %v2905_v55, %v2906_v2  ;;  %v2913_v24 = vrot.slane %v2912_v49, 2 }
 0x3e3   : > { %v2917_v41 = vsel %vm2874_vm9, %v2868_v3, -inf  ;;  %v2871_v58 = vadd.f32 %v3545_v29, %v2806_v21  ;;  %v2908_v63 = vrot.slane %v2907_v23, 1  ;;  %v2914_v54 = vmax.f32 %v2912_v49, %v2913_v24 }
 0x3e4   : > { %v2918_v34 = vrot.slane %v2917_v41, 4 }
 0x3e5   : > { %v2924_v18 = vsel %vm2874_vm9, %v2871_v58, -inf  ;;  %v2909_v43 = vmax.f32 %v2907_v23, %v2908_v63  ;;  %v2915_v44 = vrot.slane %v2914_v54, 1 }
 0x3e6   : > { %v3191_v8 = vpop.f32.mrb[52].mxu0  ;;  %v2919_v12 = vmax.f32 %v2917_v41, %v2918_v34  ;;  %v2925_v15 = vrot.slane %v2924_v18, 4 }
 0x3e7   : > { %v3192_v37 = vadd.f32 %v3463_v32, %v3191_v8  ;;  %v3625_v50 = vpop.f32.mrb[53].mxu0  ;;  %v2957_v22 = vsel %vm1156_vm3, %v2909_v43, %v2956_v9  ;;  %v2916_v46 = vmax.f32 %v2914_v54, %v2915_v44 }
 0x3e8   : > { %v2920_v0 = vrot.slane %v2919_v12, 2  ;;  %v2926_v42 = vmax.f32 %v2924_v18, %v2925_v15 }
 0x3e9   : > { %3196 = vrot.lane.b32.xlu1 %v3192_v37, %s3966_s29  ;;  %v2958_v1 = vsel %vm1158_vm4, %v2916_v46, %v2957_v22 }
 0x3ea   : > { %v2921_v16 = vmax.f32 %v2919_v12, %v2920_v0  ;;  %v2927_v51 = vrot.slane %v2926_v42, 2 }
 0x3ec   : > { %v2922_v36 = vrot.slane %v2921_v16, 1  ;;  %v2928_v40 = vmax.f32 %v2926_v42, %v2927_v51 }
 0x3ee   : > { %v2923_v17 = vmax.f32 %v2921_v16, %v2922_v36  ;;  %v2929_v20 = vrot.slane %v2928_v40, 1 }
 0x3f0   : > { %v2930_v11 = vmax.f32 %v2928_v40, %v2929_v20  ;;  %v2959_v53 = vsel %vm1160_vm5, %v2923_v17, %v2958_v1 }
 0x3f2   : > { %v2960_v25 = vsel %vm1162_vm6, %v2930_v11, %v2959_v53 }
 0x3f3   : > { %3589 = vmatmul.mubr.msk.f32.vlgmr.msra.gmra.mrb[36].mxu1 %vm2874_vm9, %v2960_v25 }
 0x45b   : > { %v3197_v52 = vpop.permute.xlu1 %3196 }
 0x4c6   : > { %v3029_v26 = vpop.f32.mrb[36].mxu1 }
 0x4c7   : > { %v3030_v14 = vadd.f32 %v3457_v28, %v3029_v26  ;;  %v3590_v30 = vpop.f32.mrb[37].mxu1 }
 0x4c9   : > { %v3200_v62 = vsel %vm3199_vm10, %v3030_v14, %v3197_v52 }
 0x4ca   : > { %3201 = vst.msk [vmem:[%s565_s19] sm:$0xff] %vm2874_vm9, %v3200_v62 }
 0x4cb PF: > { %s27_s24 = sadd.s32 1, %s3956_s24  }
 0x4cc   : > { %p24_p5 = scmp.ge.s32.totalorder %s27_s24, 4  }
 0x4ce   :  { %26 = sbr.rel (!%p24_p5) target bundleno = 3 (0x3), region = 121 }

// kernel: point_transformer_mae_forward.3
= control target key start
LH: loop header
LB: loop body
LE: loop exit
PB: predicated region body
PF: predicated region fallthrough
CT: control target
= control target key end

     0   :  { %s7648_s0 = inlined_call_operand.vmem [shape: f32[2,16,32], index: 0, kind: input, shape index: {}]   ;;  %s7649_s1 = inlined_call_operand.vmem [shape: f32[2,16,32], index: 1, kind: input, shape index: {}]   ;;  %s7650_s2 = inlined_call_operand.vmem [shape: f32[1,16], index: 2, kind: input, shape index: {}]   ;;  %s7651_s3 = inlined_call_operand.vmem [shape: f32[2,1,32], index: 3, kind: input, shape index: {}]   ;;  %s7652_s4 = inlined_call_operand.vmem [shape: f32[2,1,32], index: 4, kind: input, shape index: {}]   ;;  %s7653_s5 = inlined_call_operand.vmem [shape: f32[2,32,96], index: 5, kind: input, shape index: {}]   ;;  %s7654_s6 = inlined_call_operand.vmem [shape: f32[2,1,96], index: 6, kind: input, shape index: {}]   ;;  %s7655_s7 = inlined_call_operand.vmem [shape: f32[2,32,32], index: 7, kind: input, shape index: {}]   ;;  %s7656_s8 = inlined_call_operand.vmem [shape: f32[2,1,32], index: 8, kind: input, shape index: {}]   ;;  %s7657_s9 = inlined_call_operand.vmem [shape: f32[2,1,32], index: 9, kind: input, shape index: {}]   ;;  %s7658_s10 = inlined_call_operand.vmem [shape: f32[2,1,32], index: 10, kind: input, shape index: {}]   ;;  %s7659_s11 = inlined_call_operand.vmem [shape: f32[2,32,128], index: 11, kind: input, shape index: {}]   ;;  %s7660_s12 = inlined_call_operand.vmem [shape: f32[2,1,128], index: 12, kind: input, shape index: {}]   ;;  %s7661_s13 = inlined_call_operand.vmem [shape: f32[2,128,32], index: 13, kind: input, shape index: {}]   ;;  %s7662_s14 = inlined_call_operand.vmem [shape: f32[2,1,32], index: 14, kind: input, shape index: {}]   ;;  %s7663_s15 = inlined_call_operand.hbm [shape: f32[2,4,32], index: 15, kind: output, shape index: {}]  }
   0x1   :  { %7693 = sst [smem:[#allocation7_spill]] %s7648_s0 }
   0x2   :  { %7694 = sst [smem:[#allocation8_spill]] %s7649_s1 }
   0x3   :  { %7695 = sst [smem:[#allocation9_spill]] %s7650_s2 }
   0x4   :  { %20 = vsyncpa [#allocation3], 0 }
   0x5   :  { %22 = vsyncpa [#allocation3 + $0x1], 0  ;;  %s6666_s18 = smov 0   ;;  %s6668_s19 = smov 0  }
   0x6   :  { %s6670_s20 = smov 0   ;;  %s6672_s21 = smov 0  }
   0x7 LB: > { %7696 = sst [smem:[#allocation5_spill]] %s6562_s20  ;;  %s6687_s22 = sadd.s32 4294967295, %s6566_s21   ;;  %s6566_s21 = sphi %s6672_s21, %s7723_s21   ;;  %s6562_s20 = sphi %s6670_s20, %s7720_s20   ;;  %s6558_s19 = sphi %s6668_s19, %s7722_s19   ;;  %s6554_s18 = sphi %s6666_s18, %s7721_s18  }
   0x8   : > { %s5599_s23 = sadd.s32 4294967294, %s6566_s21   ;;  %s6691_s24 = sadd.s32 1, %s6566_s21  }
   0x9   : > { %s360_s25 = sadd.s32 1, %s6562_s20  ;;  %s357_s26 = ssub.s32 %s6566_s21, %s6691_s24 }
   0xa   : > { %p370_p0 = scmp.ne.s32.totalorder %s6562_s20, %s6558_s19  ;;  %p358_p1 = scmp.eq.s32.totalorder %s357_s26, 0 }
   0xb   : > { %p371_p2 = scmp.eq.s32.totalorder %s6687_s22, 1  ;;  %p376_p3 = scmp.ne.s32.totalorder %s6558_s19, %s6554_s18 }
   0xc   : > { %p377_p4 = scmp.eq.s32.totalorder %s5599_s23, 1  ;;  %p5602_p7 = scmp.ge.s32.totalorder %s6566_s21, 1 }
   0xd   : > { %s6702_s27 = scalar_select %p358_p1, %s6562_s20, %s360_s25  }
   0xe   : > { %p6704_p5 = por %p371_p2, %p370_p0  ;;  %p6708_p6 = por %p377_p4, %p376_p3 }
   0xf   : > { %7697 = sst [smem:[#allocation6_spill]] %s6702_s27  ;;  %p450_p8 = scmp.lt.s32.totalorder %s6566_s21, 3 }
  0x11   : > { %p451_p9 = pnand %p5602_p7, %p450_p8 }
  0x12   : > { %p503_p10 = scmp.lt.s32.totalorder (!%p451_p9), %s6687_s22, 1  ;;  %s7700_s0 = sld [smem:[#allocation7_spill]] (!%p451_p9)  ;;  %vm520_vm0 = vcmask (!%p451_p9), 261120   ;;  %v566_v18 = vld [vmem:[%s7653_s5] sm:$0xff] (!%p451_p9)  ;;  %v567_v19 = vld [vmem:[%s7653_s5 + $0x8] sm:$0xff] (!%p451_p9)  ;;  %v568_v20 = vld [vmem:[%s7653_s5 + $0x10] sm:$0xff] (!%p451_p9)  ;;  %v731_v50 = vlaneseq (!%p451_p9) }
  0x13   : > { %454 = sbr.rel (%p451_p9) target bundleno = 5286 (0x14a6), region = 80  ;;  %s7701_s1 = sld [smem:[#allocation8_spill]] (!%p451_p9)  ;;  %v6159_v21 = vpack.c.bf16 (!%p451_p9), %v567_v19, %v566_v18  ;;  %v569_v22 = vld [vmem:[%s7653_s5 + $0x18] sm:$0xff] (!%p451_p9)  ;;  %v5608_v31 = vld [vmem:[%s7651_s3] ss:$0 sm:$0xff] (!%p451_p9)  ;;  %vm1542_vm1 = vcmask (!%p451_p9), 64512  }
  0x14   : > { %v6163_v23 = vpack.c.bf16 (!%p451_p9), %v569_v22, %v568_v20  ;;  %v5609_v33 = vld [vmem:[%s7652_s4] ss:$0 sm:$0xff] (!%p451_p9)  ;;  %s7683_s26 = smov (!%p451_p9), 88   ;;  %s7679_s27 = smov (!%p451_p9), 72   ;;  %v6575_v48 = vmov (!%p451_p9), 1983009808   ;;  %vm6869_vm2 = vmpackc.low (!%p451_p9), %vm1542_vm1, %vm1542_vm1 }
  0x15   : > { %6160 = vmatprep.subr.bf16.mxu1 (!%p451_p9), %v6159_v21  ;;  %v5610_v40 = vld [vmem:[%s7654_s6] ss:$0 sm:$0xff] (!%p451_p9)  ;;  %s7665_s17 = smov (!%p451_p9), 112   ;;  %v729_v49 = vunpack.c.l.s4 (!%p451_p9), %v6575_v48  ;;  %v6576_v52 = vmov (!%p451_p9), 1934713408   ;;  %v732_v55 = vshrl.u32 (!%p451_p9), %v731_v50, 7 }
  0x16   : > { %6162 = vmatpush3.bf16.msra.mxu1 (!%p451_p9), %v6159_v21  ;;  %v793_v53 = vunpack.c.l.s4 (!%p451_p9), %v6576_v52  ;;  %s7704_s2 = sld [smem:[#allocation9_spill]] (!%p451_p9)  ;;  %vm1913_vm3 = vcmask (!%p451_p9), 130048   ;;  %s7675_s23 = smov (!%p451_p9), 56   ;;  %vm2626_vm4 = vcmask (!%p451_p9), 195584   ;;  %vm5512_vm9 = vcmask (!%p451_p9), 258049  }
  0x17   : > { %6164 = vmatprep.subr.bf16.mxu1 (!%p451_p9), %v6163_v23  ;;  %v730_v54 = vunpack.c.0.s8 (!%p451_p9), %v729_v49 }
  0x18   : > { %v794_v58 = vunpack.c.0.s8 (!%p451_p9), %v793_v53 }
  0x19   : > { %v6789_v61 = vsub.s32 (!%p451_p9), %v730_v54, %v732_v55 }
  0x1a   : > { %s504_s30 = scalar_select %p503_p10, %s6687_s22, 1  ;;  %6166 = vmatpush3.bf16.msra.mxu1 %v6163_v23 }
  0x1c   : > { %s5773_s16 = sshll.u32 %s504_s30, 4  ;;  %s7669_s30 = smov 120  }
  0x1d   : > { %s507_s25 = scalar_lea.vmem %s7700_s0, %s5773_s16  ;;  %s512_s20 = scalar_lea.vmem %s7701_s1, %s5773_s16 }
  0x1e   : > { %v514_v0 = vld [vmem:[%s507_s25] sm:$0xff]  ;;  %v515_v2 = vld [vmem:[%s507_s25 + $0x8] sm:$0xff]  ;;  %s7685_s25 = smov 96   ;;  %s7667_s16 = smov 104  }
  0x1f   : > { %v516_v1 = vld [vmem:[%s512_s20] sm:$0xff]  ;;  %v517_v4 = vld [vmem:[%s512_s20 + $0x8] sm:$0xff]  ;;  %s7681_s20 = smov 80   ;;  %s7707_s0 = smov 80  }
  0x20   : > { %v6722_v3 = vadd.f32 %v516_v1, %v514_v0  ;;  %v6724_v5 = vadd.f32 %v517_v4, %v515_v2 }
  0x22   : > { %v521_v6 = vsel %vm520_vm0, %v6722_v3, 0.0  ;;  %v524_v7 = vsel %vm520_vm0, %v6724_v5, 0.0 }
  0x23   : > { %522 = vadd.xlane.f32.xlu0 %v521_v6  ;;  %v6791_v6 = vsub.s32 %v794_v58, %v732_v55 }
  0x27   : > { %525 = vadd.xlane.f32.xlu0 %v524_v7 }
  0xb0   : > { %v523_v8 = vpop.xlane.xlu0 %522 }
  0xb1   : > { %v528_v9 = vmul.f32 0.03125, %v523_v8 }
  0xb3   : > { %v530_v10 = vsub.f32 %v6722_v3, %v528_v9 }
  0xb4   : > { %v526_v11 = vpop.xlane.xlu0 %525 }
  0xb5   : > { %v529_v12 = vmul.f32 0.03125, %v526_v11  ;;  %v532_v13 = vmul.f32 %v530_v10, %v530_v10 }
  0xb7   : > { %v531_v14 = vsub.f32 %v6724_v5, %v529_v12  ;;  %v534_v15 = vsel %vm520_vm0, %v532_v13, 0.0 }
  0xb8   : > { %535 = vadd.xlane.f32.xlu1 %v534_v15 }
  0xb9   : > { %v533_v16 = vmul.f32 %v531_v14, %v531_v14 }
  0xbb   : > { %v537_v17 = vsel %vm520_vm0, %v533_v16, 0.0 }
  0xbc   : > { %538 = vadd.xlane.f32.xlu1 %v537_v17 }
 0x145   : > { %v536_v24 = vpop.xlane.xlu1 %535 }
 0x146   : > { %v540_v25 = vmul.f32 0.03125, %v536_v24 }
 0x148   : > { %v542_v26 = vadd.f32 1e-06, %v540_v25 }
 0x149   : > { %v539_v27 = vpop.xlane.xlu1 %538 }
 0x14a   : > { %6407 = vrsqrt.f32 %v542_v26  ;;  %v541_v28 = vmul.f32 0.03125, %v539_v27 }
 0x14c   : > { %v543_v29 = vadd.f32 1e-06, %v541_v28 }
 0x14e   : > { %6409 = vrsqrt.f32 %v543_v29 }
 0x154   : > { %v6408_v30 = vpop.eup %6407 }
 0x155   : > { %v546_v32 = vmul.f32 %v6408_v30, %v530_v10 }
 0x157   : > { %v555_v34 = vmul.f32 %v5608_v31, %v546_v32 }
 0x158   : > { %v6410_v35 = vpop.eup %6409 }
 0x159   : > { %v547_v36 = vmul.f32 %v6410_v35, %v531_v14  ;;  %v564_v37 = vadd.f32 %v5609_v33, %v555_v34 }
 0x15b   : > { %v556_v38 = vmul.f32 %v5608_v31, %v547_v36  ;;  %5919 = vmatprep.mubr.msk.f32.mxu1 %vm520_vm0, %v564_v37 }
 0x15d   : > { %v565_v39 = vadd.f32 %v5609_v33, %v556_v38 }
 0x15f   : > { %5920 = vmatmul.mubr.msk.f32.vlgmr.msra.gmra.mrb[0].mxu1 %vm520_vm0, %v565_v39 }
 0x232   : > { %v5921_v41 = vpop.f32.mrb[0].mxu1 }
 0x233   : > { %v6757_v42 = vadd.f32 %v5921_v41, %v5610_v40  ;;  %v649_v43 = vpop.f32.mrb[1].mxu1 }
 0x234   : > { %v6759_v44 = vadd.f32 %v5610_v40, %v649_v43 }
 0x235   : > { %680 = vrot.lane.b32.xlu1 %v6757_v42, %s7685_s25 }
 0x236   : > { %678 = vrot.lane.b32.xlu0 %v6759_v44, %s7685_s25  ;;  %s7687_s25 = smov 24  }
 0x239   : > { %686 = vrot.lane.b32.xlu1 %v6757_v42, %s7683_s26 }
 0x23a   : > { %690 = vrot.lane.b32.xlu0 %v6759_v44, %s7681_s20 }
 0x23d   : > { %692 = vrot.lane.b32.xlu1 %v6757_v42, %s7681_s20  ;;  %s7689_s20 = smov 16  }
 0x23e   : > { %696 = vrot.lane.b32.xlu0 %v6759_v44, %s7679_s27 }
 0x241   : > { %698 = vrot.lane.b32.xlu1 %v6757_v42, %s7679_s27  ;;  %s7710_s27 = smov 104  }
 0x242   : > { %660 = vrot.lane.b32.xlu0 %v6759_v44, %s7669_s30 }
 0x245   : > { %684 = vrot.lane.b32.xlu1 %v6759_v44, %s7683_s26  ;;  %s7709_s26 = smov 120  }
 0x246   : > { %672 = vrot.lane.b32.xlu0 %v6759_v44, %s7667_s16 }
 0x249   : > { %662 = vrot.lane.b32.xlu1 %v6757_v42, %s7669_s30  ;;  %s7671_s30 = smov 40  }
 0x24a   : > { %668 = vrot.lane.b32.xlu0 %v6757_v42, %s7665_s17 }
 0x24d   : > { %666 = vrot.lane.b32.xlu1 %v6759_v44, %s7665_s17  ;;  %s7677_s17 = smov 64  }
 0x251   : > { %674 = vrot.lane.b32.xlu1 %v6757_v42, %s7667_s16  ;;  %s7673_s16 = smov 48  }
 0x2a7   : > { %v681_v45 = vpop.permute.xlu1 %680 }
 0x2a8   : > { %v679_v46 = vpop.permute.xlu0 %678 }
 0x2ab   : > { %v687_v47 = vpop.permute.xlu1 %686 }
 0x2ac   : > { %v691_v51 = vpop.permute.xlu0 %690 }
 0x2ad   : > { %v758_v62 = vcombine.low %v679_v46, %v691_v51  ;;  %v759_v63 = vcombine.high %v679_v46, %v691_v51 }
 0x2af   : > { %v693_v56 = vpop.permute.xlu1 %692  ;;  %v766_v11 = vrot.slane %v758_v62, %v6789_v61  ;;  %v773_v12 = vrot.slane %v759_v63, %v6789_v61 }
 0x2b0   : > { %v697_v57 = vpop.permute.xlu0 %696  ;;  %v962_v59 = vcombine.low %v681_v45, %v693_v56  ;;  %v963_v60 = vcombine.high %v681_v45, %v693_v56 }
 0x2b2   : > { %v970_v7 = vrot.slane %v962_v59, %v6789_v61  ;;  %v977_v8 = vrot.slane %v963_v60, %v6789_v61 }
 0x2b3   : > { %v699_v0 = vpop.permute.xlu1 %698 }
 0x2b4   : > { %v978_v1 = vcombine.low %v687_v47, %v699_v0  ;;  %v979_v2 = vcombine.high %v687_v47, %v699_v0  ;;  %v661_v4 = vpop.permute.xlu0 %660 }
 0x2b6   : > { %v986_v9 = vrot.slane %v978_v1, %v6789_v61  ;;  %v993_v10 = vrot.slane %v979_v2, %v6789_v61 }
 0x2b7   : > { %v685_v13 = vpop.permute.xlu1 %684 }
 0x2b8   : > { %v1026_v14 = vcombine.low %v970_v7, %v986_v9  ;;  %v1027_v15 = vcombine.high %v970_v7, %v986_v9  ;;  %v1042_v16 = vcombine.low %v977_v8, %v993_v10  ;;  %v1043_v17 = vcombine.high %v977_v8, %v993_v10  ;;  %v673_v18 = vpop.permute.xlu0 %672 }
 0x2b9   : > { %v774_v19 = vcombine.low %v685_v13, %v697_v57  ;;  %v775_v20 = vcombine.high %v685_v13, %v697_v57  ;;  %v742_v21 = vcombine.low %v661_v4, %v673_v18  ;;  %v743_v22 = vcombine.high %v661_v4, %v673_v18 }
 0x2ba   : > { %v1034_v23 = vrot.slane %v1026_v14, %v6791_v6  ;;  %v1041_v24 = vrot.slane %v1027_v15, %v6791_v6  ;;  %v1050_v25 = vrot.slane %v1042_v16, %v6791_v6  ;;  %v1057_v26 = vrot.slane %v1043_v17, %v6791_v6 }
 0x2bb   : > { %v782_v27 = vrot.slane %v774_v19, %v6789_v61  ;;  %v789_v28 = vrot.slane %v775_v20, %v6789_v61  ;;  %v750_v29 = vrot.slane %v742_v21, %v6789_v61  ;;  %v757_v30 = vrot.slane %v743_v22, %v6789_v61  ;;  %v663_v31 = vpop.permute.xlu1 %662 }
 0x2bc   : > { %v5622_v32 = vcombine.low %v1034_v23, %v1041_v24  ;;  %v5624_v33 = vcombine.high %v1034_v23, %v1041_v24  ;;  %v5626_v34 = vcombine.low %v1050_v25, %v1057_v26  ;;  %v5628_v35 = vcombine.high %v1050_v25, %v1057_v26  ;;  %v669_v40 = vpop.permute.xlu0 %668 }
 0x2bd   : > { %v822_v36 = vcombine.low %v766_v11, %v782_v27  ;;  %v823_v37 = vcombine.high %v766_v11, %v782_v27  ;;  %v838_v38 = vcombine.low %v773_v12, %v789_v28  ;;  %v839_v39 = vcombine.high %v773_v12, %v789_v28 }
 0x2be   : > { %v6808_v41 = vrot.slane %v5622_v32, %v6789_v61  ;;  %v6811_v43 = vrot.slane %v5624_v33, %v6789_v61  ;;  %v6814_v45 = vrot.slane %v5626_v34, %v6789_v61  ;;  %v6817_v46 = vrot.slane %v5628_v35, %v6789_v61 }
 0x2bf   : > { %v830_v47 = vrot.slane %v822_v36, %v6791_v6  ;;  %v837_v48 = vrot.slane %v823_v37, %v6791_v6  ;;  %v846_v49 = vrot.slane %v838_v38, %v6791_v6  ;;  %v853_v50 = vrot.slane %v839_v39, %v6791_v6  ;;  %v667_v51 = vpop.permute.xlu1 %666 }
 0x2c0   : > { %v930_v52 = vcombine.low %v6757_v42, %v669_v40  ;;  %v931_v53 = vcombine.high %v6757_v42, %v669_v40  ;;  %v726_v54 = vcombine.low %v6759_v44, %v667_v51  ;;  %v727_v55 = vcombine.high %v6759_v44, %v667_v51 }
 0x2c1   : > { %v5614_v56 = vcombine.low %v830_v47, %v837_v48  ;;  %v5616_v57 = vcombine.high %v830_v47, %v837_v48  ;;  %v5618_v58 = vcombine.low %v846_v49, %v853_v50  ;;  %v5620_v59 = vcombine.high %v846_v49, %v853_v50 }
 0x2c2   : > { %v938_v60 = vrot.slane %v930_v52, %v6789_v61  ;;  %v945_v62 = vrot.slane %v931_v53, %v6789_v61  ;;  %v734_v63 = vrot.slane %v726_v54, %v6789_v61  ;;  %v741_v0 = vrot.slane %v727_v55, %v6789_v61 }
 0x2c3   : > { %v1149_v1 = vrot.slane %v5614_v56, %v6789_v61  ;;  %v1165_v2 = vrot.slane %v5616_v57, %v6789_v61  ;;  %v1181_v4 = vrot.slane %v5618_v58, %v6789_v61  ;;  %v1197_v7 = vrot.slane %v5620_v59, %v6789_v61  ;;  %v675_v8 = vpop.permute.xlu1 %674 }
 0x2c4   : > { %v790_v9 = vcombine.low %v734_v63, %v750_v29  ;;  %v791_v10 = vcombine.high %v734_v63, %v750_v29  ;;  %v806_v11 = vcombine.low %v741_v0, %v757_v30  ;;  %v807_v12 = vcombine.high %v741_v0, %v757_v30 }
 0x2c5   : > { %v946_v13 = vcombine.low %v663_v31, %v675_v8  ;;  %v947_v14 = vcombine.high %v663_v31, %v675_v8  ;;  %v1214_v15 = vcombine.low %v1149_v1, %v1165_v2  ;;  %v1246_v16 = vcombine.low %v1181_v4, %v1197_v7 }
 0x2c6   : > { %v798_v17 = vrot.slane %v790_v9, %v6791_v6  ;;  %v805_v18 = vrot.slane %v791_v10, %v6791_v6  ;;  %v814_v19 = vrot.slane %v806_v11, %v6791_v6  ;;  %v821_v20 = vrot.slane %v807_v12, %v6791_v6 }
 0x2c7   : > { %v954_v21 = vrot.slane %v946_v13, %v6789_v61  ;;  %v961_v22 = vrot.slane %v947_v14, %v6789_v61  ;;  %v1222_v23 = vrot.slane %v1214_v15, %v6791_v6  ;;  %v1254_v24 = vrot.slane %v1246_v16, %v6791_v6 }
 0x2c8   : > { %v5613_v25 = vcombine.low %v798_v17, %v805_v18  ;;  %v5615_v26 = vcombine.high %v798_v17, %v805_v18  ;;  %v5617_v27 = vcombine.low %v814_v19, %v821_v20  ;;  %v5619_v28 = vcombine.high %v814_v19, %v821_v20 }
 0x2c9   : > { %v994_v29 = vcombine.low %v938_v60, %v954_v21  ;;  %v995_v30 = vcombine.high %v938_v60, %v954_v21  ;;  %v1010_v31 = vcombine.low %v945_v62, %v961_v22  ;;  %v1011_v32 = vcombine.high %v945_v62, %v961_v22 }
 0x2ca   : > { %v1142_v33 = vrot.slane %v5613_v25, %v6789_v61  ;;  %v1158_v34 = vrot.slane %v5615_v26, %v6789_v61  ;;  %v1174_v35 = vrot.slane %v5617_v27, %v6789_v61  ;;  %v1190_v36 = vrot.slane %v5619_v28, %v6789_v61 }
 0x2cb   : > { %v1002_v37 = vrot.slane %v994_v29, %v6791_v6  ;;  %v1009_v38 = vrot.slane %v995_v30, %v6791_v6  ;;  %v1018_v39 = vrot.slane %v1010_v31, %v6791_v6  ;;  %v1025_v40 = vrot.slane %v1011_v32, %v6791_v6 }
 0x2cc   : > { %v1266_v47 = vcombine.low %v1222_v23, %v1254_v24  ;;  %v1350_v48 = vcombine.low %v6808_v41, %v6811_v43  ;;  %v1382_v49 = vcombine.low %v6814_v45, %v6817_v46  ;;  %v1215_v50 = vcombine.high %v1149_v1, %v1165_v2 }
 0x2cd   : > { %v5621_v51 = vcombine.low %v1002_v37, %v1009_v38  ;;  %v5623_v52 = vcombine.high %v1002_v37, %v1009_v38  ;;  %v5625_v53 = vcombine.low %v1018_v39, %v1025_v40  ;;  %v5627_v54 = vcombine.high %v1018_v39, %v1025_v40 }
 0x2ce   : > { %v1358_v55 = vrot.slane %v1350_v48, %v6791_v6  ;;  %v1390_v56 = vrot.slane %v1382_v49, %v6791_v6  ;;  %v1229_v57 = vrot.slane %v1215_v50, %v6791_v6  ;;  %v1247_v58 = vcombine.high %v1181_v4, %v1197_v7 }
 0x2cf   : > { %v1278_v59 = vrot.slane %v5621_v51, %v6789_v61  ;;  %v1294_v60 = vrot.slane %v5623_v52, %v6789_v61  ;;  %v1310_v62 = vrot.slane %v5625_v53, %v6789_v61  ;;  %v1326_v63 = vrot.slane %v5627_v54, %v6789_v61 }
 0x2d0   : > { %v1402_v0 = vcombine.low %v1358_v55, %v1390_v56  ;;  %v1261_v1 = vrot.slane %v1247_v58, %v6791_v6  ;;  %v1351_v2 = vcombine.high %v6808_v41, %v6811_v43  ;;  %v1383_v8 = vcombine.high %v6814_v45, %v6817_v46 }
 0x2d1   : > { %v1334_v9 = vcombine.low %v1278_v59, %v1294_v60  ;;  %v1366_v10 = vcombine.low %v1310_v62, %v1326_v63  ;;  %v1267_v7 = vcombine.high %v1222_v23, %v1254_v24  ;;  %v1403_v11 = vcombine.high %v1358_v55, %v1390_v56 }
 0x2d2   : > { %v6167_v12 = vpack.c.bf16 %v1402_v0, %v1266_v47  ;;  %v1269_v13 = vcombine.high %v1229_v57, %v1261_v1  ;;  %v1365_v14 = vrot.slane %v1351_v2, %v6791_v6  ;;  %v1397_v15 = vrot.slane %v1383_v8, %v6791_v6  ;;  %v5649_v47 = vld [vmem:[%s7704_s2] ss:$0 sm:$0xff] }
 0x2d3   : > { %v6173_v41 = vpack.c.bf16 %v1403_v11, %v1267_v7  ;;  %v1198_v43 = vcombine.low %v1142_v33, %v1158_v34  ;;  %v1230_v16 = vcombine.low %v1174_v35, %v1190_v36  ;;  %v1199_v45 = vcombine.high %v1142_v33, %v1158_v34 }
 0x2d4   : > { %6169 = vmatprep.subr.msk.bf16.mxu1 %vm6869_vm2, %v6167_v12  ;;  %v1231_v46 = vcombine.high %v1174_v35, %v1190_v36  ;;  %v1342_v17 = vrot.slane %v1334_v9, %v6791_v6  ;;  %v1374_v18 = vrot.slane %v1366_v10, %v6791_v6  ;;  %v1405_v19 = vcombine.high %v1365_v14, %v1397_v15 }
 0x2d5   : > { %6172 = vmatpush3.bf16.xpose.msk.msra.mxu1 %vm6869_vm2, %v6167_v12  ;;  %v1206_v20 = vrot.slane %v1198_v43, %v6791_v6  ;;  %v1238_v21 = vrot.slane %v1230_v16, %v6791_v6  ;;  %v1213_v22 = vrot.slane %v1199_v45, %v6791_v6  ;;  %v1335_v24 = vcombine.high %v1278_v59, %v1294_v60 }
 0x2d6   : > { %6175 = vmatprep.subr.msk.bf16.mxu1 %vm6869_vm2, %v6173_v41  ;;  %v1245_v23 = vrot.slane %v1231_v46, %v6791_v6  ;;  %v6185_v25 = vpack.c.bf16 %v1405_v19, %v1269_v13  ;;  %v1367_v27 = vcombine.high %v1310_v62, %v1326_v63  ;;  %v1268_v28 = vcombine.low %v1229_v57, %v1261_v1 }
 0x2d7   : > { %v1262_v26 = vcombine.low %v1206_v20, %v1238_v21  ;;  %v1398_v30 = vcombine.low %v1342_v17, %v1374_v18  ;;  %v1349_v31 = vrot.slane %v1335_v24, %v6791_v6  ;;  %v1404_v33 = vcombine.low %v1365_v14, %v1397_v15 }
 0x2d8   : > { %v1265_v29 = vcombine.high %v1213_v22, %v1245_v23  ;;  %6187 = vmatprep.subr.msk.bf16.mxu0 %vm6869_vm2, %v6185_v25  ;;  %v1381_v32 = vrot.slane %v1367_v27, %v6791_v6  ;;  %v1263_v34 = vcombine.high %v1206_v20, %v1238_v21  ;;  %v1399_v37 = vcombine.high %v1342_v17, %v1374_v18 }
 0x2d9   : > { %5926 = vmatprep.mubr.msk.f32.mxu1 %vm1542_vm1, %v1262_v26  ;;  %6190 = vmatpush3.bf16.xpose.msk.msra.mxu0 %vm6869_vm2, %v6185_v25  ;;  %v6179_v35 = vpack.c.bf16 %v1404_v33, %v1268_v28  ;;  %v1264_v38 = vcombine.low %v1213_v22, %v1245_v23 }
 0x2da   : > { %5947 = vmatprep.mubr.msk.f32.mxu0 %vm1542_vm1, %v1265_v29  ;;  %v1401_v36 = vcombine.high %v1349_v31, %v1381_v32  ;;  %v1400_v39 = vcombine.low %v1349_v31, %v1381_v32 }
 0x2dc   : > { %5927 = vmatmul.mubr.msk.f32.vlgmr.msra.gmra.mrb[2].mxu1 %vm1542_vm1, %v1398_v30 }
 0x2dd   : > { %6178 = vmatpush3.bf16.xpose.msk.msra.mxu1 %vm6869_vm2, %v6173_v41  ;;  %5933 = vmatprep.mubr.msk.f32.mxu1 %vm1542_vm1, %v1263_v34 }
 0x2de   : > { %6181 = vmatprep.subr.msk.bf16.mxu1 %vm6869_vm2, %v6179_v35 }
 0x2e0   : > { %5948 = vmatmul.mubr.msk.f32.vlgmr.msra.gmra.mrb[0].mxu0 %vm1542_vm1, %v1401_v36 }
 0x2e4   : > { %5934 = vmatmul.mubr.msk.f32.vlgmr.msra.gmra.mrb[4].mxu1 %vm1542_vm1, %v1399_v37 }
 0x2e5   : > { %6184 = vmatpush3.bf16.xpose.msk.msra.mxu1 %vm6869_vm2, %v6179_v35  ;;  %5940 = vmatprep.mubr.msk.f32.mxu1 %vm1542_vm1, %v1264_v38 }
 0x2ec   : > { %5941 = vmatmul.mubr.msk.f32.vlgmr.msra.gmra.mrb[6].mxu1 %vm1542_vm1, %v1400_v39 }
 0x3af   : > { %v5928_v40 = vpop.f32.mrb[2].mxu1 }
 0x3b0   : > { %v1892_v48 = vmul.f32 0.35355338, %v5928_v40  ;;  %v1621_v49 = vpop.f32.mrb[3].mxu1 }
 0x3b1   : > { %v1891_v50 = vmul.f32 0.35355338, %v1621_v49 }
 0x3b2   : > { %v1906_v51 = vadd.f32 %v5649_v47, %v1892_v48 }
 0x3b3   : > { %v1905_v52 = vadd.f32 %v5649_v47, %v1891_v50  ;;  %v5949_v53 = vpop.f32.mrb[0].mxu0 }
 0x3b4   : > { %v1917_v54 = vsel %vm1913_vm3, %v1906_v51, -inf  ;;  %v1882_v55 = vpop.f32.mrb[1].mxu0  ;;  %v1898_v57 = vmul.f32 0.35355338, %v5949_v53 }
 0x3b5   : > { %1918 = vmax.xlane.f32.xlu1 %v1917_v54  ;;  %v1914_v56 = vsel %vm1913_vm3, %v1905_v52, -inf  ;;  %v1897_v58 = vmul.f32 0.35355338, %v1882_v55 }
 0x3b6   : > { %1915 = vmax.xlane.f32.xlu0 %v1914_v56  ;;  %v1912_v8 = vadd.f32 %v5649_v47, %v1898_v57 }
 0x3b7   : > { %v5935_v59 = vpop.f32.mrb[4].mxu1  ;;  %v1911_v63 = vadd.f32 %v5649_v47, %v1897_v58 }
 0x3b8   : > { %v1894_v60 = vmul.f32 0.35355338, %v5935_v59  ;;  %v1708_v62 = vpop.f32.mrb[5].mxu1  ;;  %v1935_v7 = vsel %vm1913_vm3, %v1912_v8, -inf }
 0x3b9   : > { %v1893_v0 = vmul.f32 0.35355338, %v1708_v62  ;;  %v1932_v1 = vsel %vm1913_vm3, %v1911_v63, -inf }
 0x3ba   : > { %v1908_v2 = vadd.f32 %v5649_v47, %v1894_v60  ;;  %1933 = vmax.xlane.f32.xlu1 %v1932_v1 }
 0x3bb   : > { %v1907_v10 = vadd.f32 %v5649_v47, %v1893_v0 }
 0x3bc   : > { %v1923_v9 = vsel %vm1913_vm3, %v1908_v2, -inf }
 0x3bd   : > { %1924 = vmax.xlane.f32.xlu0 %v1923_v9  ;;  %v1920_v13 = vsel %vm1913_vm3, %v1907_v10, -inf }
 0x3be   : > { %1936 = vmax.xlane.f32.xlu1 %v1935_v7 }
 0x3bf   : > { %v5942_v11 = vpop.f32.mrb[6].mxu1 }
 0x3c0   : > { %v1795_v12 = vpop.f32.mrb[7].mxu1  ;;  %v1896_v14 = vmul.f32 0.35355338, %v5942_v11 }
 0x3c1   : > { %v1895_v15 = vmul.f32 0.35355338, %v1795_v12  ;;  %1921 = vmax.xlane.f32.xlu0 %v1920_v13 }
 0x3c2   : > { %v6917_v16 = vadd.f32 %v5649_v47, %v1896_v14 }
 0x3c3   : > { %v1909_v41 = vadd.f32 %v5649_v47, %v1895_v15 }
 0x3c4   : > { %v1929_v45 = vsel %vm1913_vm3, %v6917_v16, -inf }
 0x3c5   : > { %v1926_v43 = vsel %vm1913_vm3, %v1909_v41, -inf }
 0x3c6   : > { %1927 = vmax.xlane.f32.xlu0 %v1926_v43 }
 0x3ca   : > { %1930 = vmax.xlane.f32.xlu0 %v1929_v45 }
 0x3cf   : > { %704 = vrot.lane.b32.xlu1 %v6757_v42, %s7677_s17 }
 0x3d3   : > { %708 = vrot.lane.b32.xlu1 %v6759_v44, %s7675_s23 }
 0x3d7   : > { %710 = vrot.lane.b32.xlu1 %v6757_v42, %s7675_s23  ;;  %s7708_s23 = smov 72  }
 0x3db   : > { %716 = vrot.lane.b32.xlu1 %v6757_v42, %s7673_s16 }
 0x3df   : > { %722 = vrot.lane.b32.xlu1 %v6757_v42, %s7671_s30 }
 0x3e0   : > { %702 = vrot.lane.b32.xlu0 %v6759_v44, %s7677_s17  ;;  %s7706_s17 = smov 88  }
 0x3e4   : > { %714 = vrot.lane.b32.xlu0 %v6759_v44, %s7673_s16  ;;  %s500_s16 = sand.u32 1, %s6558_s19  }
 0x3e8   : > { %720 = vrot.lane.b32.xlu0 %v6759_v44, %s7671_s30  ;;  %s7691_s30 = smov 8  }
 0x442   : > { %v1919_v46 = vpop.xlane.xlu1 %1918 }
 0x443   : > { %v1939_v17 = vsub.f32 %v1906_v51, %v1919_v46  ;;  %v1916_v18 = vpop.xlane.xlu0 %1915 }
 0x444   : > { %v1938_v19 = vsub.f32 %v1905_v52, %v1916_v18 }
 0x445   : > { %v1948_v20 = vmul.f32 1.442695, %v1939_v17 }
 0x446   : > { %v1946_v21 = vmul.f32 1.442695, %v1938_v19 }
 0x447   : > { %6411 = vpow2.f32 %v1948_v20  ;;  %v1934_v22 = vpop.xlane.xlu1 %1933 }
 0x448   : > { %6413 = vpow2.f32 %v1946_v21  ;;  %v1944_v23 = vsub.f32 %v1911_v63, %v1934_v22 }
 0x44a   : > { %v1925_v42 = vpop.xlane.xlu0 %1924  ;;  %v1958_v24 = vmul.f32 1.442695, %v1944_v23 }
 0x44b   : > { %v1941_v25 = vsub.f32 %v1908_v2, %v1925_v42  ;;  %v1937_v26 = vpop.xlane.xlu1 %1936 }
 0x44c   : > { %6415 = vpow2.f32 %v1958_v24  ;;  %v1945_v28 = vsub.f32 %v1912_v8, %v1937_v26 }
 0x44d   : > { %v1952_v27 = vmul.f32 1.442695, %v1941_v25 }
 0x44e   : > { %v1922_v29 = vpop.xlane.xlu0 %1921  ;;  %v1960_v44 = vmul.f32 1.442695, %v1945_v28 }
 0x44f   : > { %6417 = vpow2.f32 %v1952_v27  ;;  %v1940_v30 = vsub.f32 %v1907_v10, %v1922_v29  ;;  %v705_v31 = vpop.permute.xlu1 %704 }
 0x450   : > { %6419 = vpow2.f32 %v1960_v44 }
 0x451   : > { %v6937_v32 = vpop.eup %6411  ;;  %v1950_v33 = vmul.f32 1.442695, %v1940_v30 }
 0x452   : > { %v6939_v34 = vpop.eup %6413  ;;  %v1965_v35 = vsel %vm1913_vm3, %v6937_v32, 0.0 }
 0x453   : > { %6421 = vpow2.f32 %v1950_v33  ;;  %v1928_v36 = vpop.xlane.xlu0 %1927  ;;  %1966 = vadd.xlane.f32.xlu1 %v1965_v35  ;;  %v1962_v37 = vsel %vm1913_vm3, %v6939_v34, 0.0  ;;  %v709_v38 = vpop.permute.xlu1 %708 }
 0x454   : > { %v1942_v39 = vsub.f32 %v1909_v41, %v1928_v36  ;;  %1963 = vadd.xlane.f32.xlu0 %v1962_v37 }
 0x456   : > { %v1954_v40 = vmul.f32 1.442695, %v1942_v39  ;;  %v6945_v47 = vpop.eup %6415 }
 0x457   : > { %v1931_v48 = vpop.xlane.xlu0 %1930  ;;  %v711_v49 = vpop.permute.xlu1 %710  ;;  %v1980_v51 = vsel %vm1913_vm3, %v6945_v47, 0.0 }
 0x458   : > { %6423 = vpow2.f32 %v1954_v40  ;;  %v1943_v50 = vsub.f32 %v6917_v16, %v1931_v48  ;;  %1981 = vadd.xlane.f32.xlu0 %v1980_v51 }
 0x459   : > { %v6950_v52 = vpop.eup %6417 }
 0x45a   : > { %v1971_v53 = vsel %vm1913_vm3, %v6950_v52, 0.0  ;;  %v6954_v54 = vpop.eup %6419  ;;  %v1956_v56 = vmul.f32 1.442695, %v1943_v50 }
 0x45b   : > { %1972 = vadd.xlane.f32.xlu1 %v1971_v53  ;;  %v703_v55 = vpop.permute.xlu0 %702  ;;  %v717_v57 = vpop.permute.xlu1 %716  ;;  %v1983_v60 = vsel %vm1913_vm3, %v6954_v54, 0.0 }
 0x45c   : > { %v1066_v59 = vcombine.low %v705_v31, %v717_v57  ;;  %v1067_v63 = vcombine.high %v705_v31, %v717_v57  ;;  %6425 = vpow2.f32 %v1956_v56 }
 0x45d   : > { %v6956_v58 = vpop.eup %6421 }
 0x45e   : > { %v1968_v62 = vsel %vm1913_vm3, %v6956_v58, 0.0  ;;  %v1074_v10 = vrot.slane %v1066_v59, %v6789_v61  ;;  %v1081_v12 = vrot.slane %v1067_v63, %v6789_v61 }
 0x45f   : > { %1984 = vadd.xlane.f32.xlu1 %v1983_v60  ;;  %1969 = vadd.xlane.f32.xlu0 %v1968_v62  ;;  %v715_v0 = vpop.permute.xlu0 %714  ;;  %v723_v1 = vpop.permute.xlu1 %722 }
 0x460   : > { %v1082_v2 = vcombine.low %v711_v49, %v723_v1  ;;  %v1083_v8 = vcombine.high %v711_v49, %v723_v1  ;;  %v862_v7 = vcombine.low %v703_v55, %v715_v0  ;;  %v863_v11 = vcombine.high %v703_v55, %v715_v0 }
 0x462   : > { %v6962_v9 = vpop.eup %6423  ;;  %v1090_v13 = vrot.slane %v1082_v2, %v6789_v61  ;;  %v1097_v14 = vrot.slane %v1083_v8, %v6789_v61  ;;  %v870_v19 = vrot.slane %v862_v7, %v6789_v61  ;;  %v877_v20 = vrot.slane %v863_v11, %v6789_v61 }
 0x463   : > { %v721_v15 = vpop.permute.xlu0 %720  ;;  %v1974_v41 = vsel %vm1913_vm3, %v6962_v9, 0.0 }
 0x464   : > { %v878_v43 = vcombine.low %v709_v38, %v721_v15  ;;  %v879_v16 = vcombine.high %v709_v38, %v721_v15  ;;  %1975 = vadd.xlane.f32.xlu0 %v1974_v41  ;;  %v1098_v45 = vcombine.low %v1074_v10, %v1090_v13  ;;  %v1099_v46 = vcombine.high %v1074_v10, %v1090_v13 }
 0x465   : > { %v1114_v17 = vcombine.low %v1081_v12, %v1097_v14  ;;  %v1115_v18 = vcombine.high %v1081_v12, %v1097_v14 }
 0x466   : > { %v886_v21 = vrot.slane %v878_v43, %v6789_v61  ;;  %v893_v22 = vrot.slane %v879_v16, %v6789_v61  ;;  %v1106_v23 = vrot.slane %v1098_v45, %v6791_v6  ;;  %v1113_v42 = vrot.slane %v1099_v46, %v6791_v6  ;;  %v6978_v35 = vpop.eup %6425 }
 0x467   : > { %v1122_v24 = vrot.slane %v1114_v17, %v6791_v6  ;;  %v1129_v25 = vrot.slane %v1115_v18, %v6791_v6  ;;  %v1977_v57 = vsel %vm1913_vm3, %v6978_v35, 0.0 }
 0x468   : > { %v894_v26 = vcombine.low %v870_v19, %v886_v21  ;;  %v895_v27 = vcombine.high %v870_v19, %v886_v21  ;;  %v910_v28 = vcombine.low %v877_v20, %v893_v22  ;;  %v911_v29 = vcombine.high %v877_v20, %v893_v22  ;;  %1978 = vadd.xlane.f32.xlu0 %v1977_v57 }
 0x469   : > { %v1474_v44 = vcombine.low %v1106_v23, %v1113_v42  ;;  %v5631_v30 = vcombine.high %v1106_v23, %v1113_v42  ;;  %v1490_v31 = vcombine.low %v1122_v24, %v1129_v25  ;;  %v5632_v33 = vcombine.high %v1122_v24, %v1129_v25 }
 0x46a   : > { %v902_v36 = vrot.slane %v894_v26, %v6791_v6  ;;  %v909_v37 = vrot.slane %v895_v27, %v6791_v6  ;;  %v918_v38 = vrot.slane %v910_v28, %v6791_v6  ;;  %v925_v39 = vrot.slane %v911_v29, %v6791_v6 }
 0x46b   : > { %v1481_v40 = vrot.slane %v1474_v44, %v6789_v61  ;;  %v1489_v48 = vrot.slane %v5631_v30, %v6789_v61  ;;  %v1497_v49 = vrot.slane %v1490_v31, %v6789_v61  ;;  %v1505_v50 = vrot.slane %v5632_v33, %v6789_v61 }
 0x46c   : > { %v1406_v51 = vcombine.low %v902_v36, %v909_v37  ;;  %v5629_v53 = vcombine.high %v902_v36, %v909_v37  ;;  %v1422_v55 = vcombine.low %v918_v38, %v925_v39  ;;  %v5630_v56 = vcombine.high %v918_v38, %v925_v39 }
 0x46d   : > { %v1506_v59 = vcombine.low %v1481_v40, %v1489_v48  ;;  %v1522_v60 = vcombine.low %v1497_v49, %v1505_v50  ;;  %v1507_v62 = vcombine.high %v1481_v40, %v1489_v48  ;;  %v1523_v11 = vcombine.high %v1497_v49, %v1505_v50 }
 0x46e   : > { %v1413_v63 = vrot.slane %v1406_v51, %v6789_v61  ;;  %v1421_v0 = vrot.slane %v5629_v53, %v6789_v61  ;;  %v1429_v1 = vrot.slane %v1422_v55, %v6789_v61  ;;  %v1437_v2 = vrot.slane %v5630_v56, %v6789_v61 }
 0x46f   : > { %v1514_v8 = vrot.slane %v1506_v59, %v6791_v6  ;;  %v1530_v10 = vrot.slane %v1522_v60, %v6791_v6  ;;  %v1521_v7 = vrot.slane %v1507_v62, %v6791_v6  ;;  %v1537_v41 = vrot.slane %v1523_v11, %v6791_v6 }
 0x470   : > { %v1438_v12 = vcombine.low %v1413_v63, %v1421_v0  ;;  %v1454_v13 = vcombine.low %v1429_v1, %v1437_v2  ;;  %v1439_v14 = vcombine.high %v1413_v63, %v1421_v0  ;;  %v1455_v15 = vcombine.high %v1429_v1, %v1437_v2 }
 0x471   : > { %v1538_v17 = vcombine.low %v1514_v8, %v1530_v10  ;;  %v1540_v18 = vcombine.low %v1521_v7, %v1537_v41  ;;  %v1541_v19 = vcombine.high %v1521_v7, %v1537_v41  ;;  %v1539_v25 = vcombine.high %v1514_v8, %v1530_v10 }
 0x472   : > { %v1446_v43 = vrot.slane %v1438_v12, %v6791_v6  ;;  %v1462_v16 = vrot.slane %v1454_v13, %v6791_v6  ;;  %v1453_v45 = vrot.slane %v1439_v14, %v6791_v6  ;;  %v1469_v46 = vrot.slane %v1455_v15, %v6791_v6 }
 0x474   : > { %v1470_v20 = vcombine.low %v1446_v43, %v1462_v16  ;;  %v1472_v21 = vcombine.low %v1453_v45, %v1469_v46  ;;  %v1471_v22 = vcombine.high %v1446_v43, %v1462_v16  ;;  %v1473_v23 = vcombine.high %v1453_v45, %v1469_v46 }
 0x476   : > { %v6191_v42 = vpack.c.bf16 %v1538_v17, %v1470_v20  ;;  %v6199_v24 = vpack.c.bf16 %v1540_v18, %v1472_v21  ;;  %v6203_v26 = vpack.c.bf16 %v1541_v19, %v1473_v23  ;;  %v6195_v27 = vpack.c.bf16 %v1539_v25, %v1471_v22 }
 0x478   : > { %6192 = vmatprep.subr.bf16.mxu1 %v6191_v42  ;;  %6200 = vmatprep.subr.bf16.mxu0 %v6199_v24 }
 0x479   : > { %6194 = vmatpush3.bf16.msra.mxu1 %v6191_v42  ;;  %6202 = vmatpush3.bf16.msra.mxu0 %v6199_v24 }
 0x47a   : > { %6196 = vmatprep.subr.bf16.mxu1 %v6195_v27 }
 0x4e0   : > { %v1967_v28 = vpop.xlane.xlu1 %1966 }
 0x4e1   : > { %6427 = vrcp.f32 %v1967_v28  ;;  %v1964_v29 = vpop.xlane.xlu0 %1963 }
 0x4e2   : > { %6429 = vrcp.f32 %v1964_v29 }
 0x4e5   : > { %v1982_v44 = vpop.xlane.xlu0 %1981 }
 0x4e6   : > { %6431 = vrcp.f32 %v1982_v44 }
 0x4e8   : > { %v1973_v30 = vpop.xlane.xlu1 %1972 }
 0x4e9   : > { %6433 = vrcp.f32 %v1973_v30 }
 0x4eb   : > { %v6428_v31 = vpop.eup %6427 }
 0x4ec   : > { %v6430_v33 = vpop.eup %6429  ;;  %v1970_v36 = vpop.xlane.xlu0 %1969  ;;  %v1995_v38 = vmul.f32 %v6428_v31, %v6937_v32 }
 0x4ed   : > { %v1994_v37 = vmul.f32 %v6430_v33, %v6939_v34  ;;  %v1985_v39 = vpop.xlane.xlu1 %1984  ;;  %6435 = vrcp.f32 %v1970_v36 }
 0x4ee   : > { %6437 = vrcp.f32 %v1985_v39 }
 0x4ef   : > { %5954 = vmatprep.mubr.msk.f32.mxu1 %vm1913_vm3, %v1994_v37 }
 0x4f0   : > { %5955 = vmatmul.mubr.msk.f32.vlgmr.msra.gmra.mrb[8].mxu1 %vm1913_vm3, %v1995_v38  ;;  %v6432_v48 = vpop.eup %6431 }
 0x4f1   : > { %6198 = vmatpush3.bf16.msra.mxu1 %v6195_v27  ;;  %v1976_v40 = vpop.xlane.xlu0 %1975  ;;  %v2000_v55 = vmul.f32 %v6432_v48, %v6945_v47 }
 0x4f2   : > { %6439 = vrcp.f32 %v1976_v40  ;;  %6204 = vmatprep.subr.bf16.mxu1 %v6203_v26 }
 0x4f3   : > { %v6434_v49 = vpop.eup %6433 }
 0x4f4   : > { %v1997_v34 = vmul.f32 %v6434_v49, %v6950_v52 }
 0x4f5   : > { %v1979_v32 = vpop.xlane.xlu0 %1978 }
 0x4f6   : > { %6441 = vrcp.f32 %v1979_v32 }
 0x4f7   : > { %v6436_v50 = vpop.eup %6435 }
 0x4f8   : > { %v1996_v51 = vmul.f32 %v6436_v50, %v6956_v58  ;;  %v6438_v53 = vpop.eup %6437 }
 0x4f9   : > { %v2001_v59 = vmul.f32 %v6438_v53, %v6954_v54 }
 0x4fa   : > { %5961 = vmatprep.mubr.msk.f32.mxu1 %vm1913_vm3, %v1996_v51 }
 0x4fb   : > { %5962 = vmatmul.mubr.msk.f32.vlgmr.msra.gmra.mrb[10].mxu1 %vm1913_vm3, %v1997_v34 }
 0x4fc   : > { %v6440_v56 = vpop.eup %6439  ;;  %6206 = vmatpush3.bf16.msra.mxu1 %v6203_v26  ;;  %5975 = vmatprep.mubr.msk.f32.mxu1 %vm1913_vm3, %v2000_v55 }
 0x4fd   : > { %v1998_v57 = vmul.f32 %v6440_v56, %v6962_v9 }
 0x4ff   : > { %5968 = vmatprep.mubr.msk.f32.mxu0 %vm1913_vm3, %v1998_v57  ;;  %5976 = vmatmul.mubr.msk.f32.vlgmr.msra.gmra.mrb[12].mxu1 %vm1913_vm3, %v2001_v59 }
 0x500   : > { %v6442_v52 = vpop.eup %6441 }
 0x501   : > { %v1999_v58 = vmul.f32 %v6442_v52, %v6978_v35 }
 0x503   : > { %5969 = vmatmul.mubr.msk.f32.vlgmr.msra.gmra.mrb[2].mxu0 %vm1913_vm3, %v1999_v58 }
 0x5c3   : > { %v5956_v47 = vpop.f32.mrb[8].mxu1 }
 0x5c4   : > { %v2074_v60 = vpop.f32.mrb[9].mxu1 }
 0x5ce   : > { %v5963_v62 = vpop.f32.mrb[10].mxu1 }
 0x5cf   : > { %v2155_v63 = vpop.f32.mrb[11].mxu1 }
 0x5d2   : > { %v5977_v0 = vpop.f32.mrb[12].mxu1 }
 0x5d3   : > { %v2410_v1 = vcombine.low %v5963_v62, %v5977_v0  ;;  %v2411_v2 = vcombine.high %v5963_v62, %v5977_v0  ;;  %v2317_v8 = vpop.f32.mrb[13].mxu1 }
 0x5d4   : > { %v2342_v9 = vcombine.low %v2155_v63, %v2317_v8  ;;  %v2343_v10 = vcombine.high %v2155_v63, %v2317_v8 }
 0x5d5   : > { %v2418_v35 = vrot.slane %v2410_v1, %v6789_v61  ;;  %v2425_v15 = vrot.slane %v2411_v2, %v6789_v61 }
 0x5d6   : > { %v5970_v54 = vpop.f32.mrb[2].mxu0  ;;  %v2350_v16 = vrot.slane %v2342_v9, %v6789_v61  ;;  %v2357_v45 = vrot.slane %v2343_v10, %v6789_v61  ;;  %v2629_v10 = vld [vmem:[%s7655_s7] sm:$0xff] }
 0x5d7   : > { %v2394_v7 = vcombine.low %v5956_v47, %v5970_v54  ;;  %v2395_v11 = vcombine.high %v5956_v47, %v5970_v54  ;;  %v2236_v12 = vpop.f32.mrb[3].mxu0 }
 0x5d8   : > { %v2326_v13 = vcombine.low %v2074_v60, %v2236_v12  ;;  %v2327_v14 = vcombine.high %v2074_v60, %v2236_v12 }
 0x5d9   : > { %v2402_v41 = vrot.slane %v2394_v7, %v6789_v61  ;;  %v2409_v43 = vrot.slane %v2395_v11, %v6789_v61 }
 0x5da   : > { %v2334_v46 = vrot.slane %v2326_v13, %v6789_v61  ;;  %v2341_v17 = vrot.slane %v2327_v14, %v6789_v61  ;;  %v2630_v13 = vld [vmem:[%s7655_s7 + $0x8] sm:$0xff]  ;;  %v2631_v14 = vld [vmem:[%s7655_s7 + $0x10] sm:$0xff] }
 0x5db   : > { %v2426_v18 = vcombine.low %v2402_v41, %v2418_v35  ;;  %v2427_v19 = vcombine.high %v2402_v41, %v2418_v35  ;;  %v2442_v20 = vcombine.low %v2409_v43, %v2425_v15  ;;  %v2443_v21 = vcombine.high %v2409_v43, %v2425_v15  ;;  %v2632_v35 = vld [vmem:[%s7655_s7 + $0x18] sm:$0xff] }
 0x5dc   : > { %v2358_v22 = vcombine.low %v2334_v46, %v2350_v16  ;;  %v2359_v23 = vcombine.high %v2334_v46, %v2350_v16  ;;  %v2374_v42 = vcombine.low %v2341_v17, %v2357_v45  ;;  %v2375_v24 = vcombine.high %v2341_v17, %v2357_v45 }
 0x5dd   : > { %v2434_v25 = vrot.slane %v2426_v18, %v6791_v6  ;;  %v2441_v26 = vrot.slane %v2427_v19, %v6791_v6  ;;  %v2450_v27 = vrot.slane %v2442_v20, %v6791_v6  ;;  %v2457_v28 = vrot.slane %v2443_v21, %v6791_v6 }
 0x5de   : > { %v2366_v29 = vrot.slane %v2358_v22, %v6791_v6  ;;  %v2373_v44 = vrot.slane %v2359_v23, %v6791_v6  ;;  %v2382_v30 = vrot.slane %v2374_v42, %v6791_v6  ;;  %v2389_v31 = vrot.slane %v2375_v24, %v6791_v6 }
 0x5df   : > { %v2530_v33 = vcombine.low %v2434_v25, %v2441_v26  ;;  %v5660_v36 = vcombine.high %v2434_v25, %v2441_v26  ;;  %v2546_v37 = vcombine.low %v2450_v27, %v2457_v28  ;;  %v5661_v38 = vcombine.high %v2450_v27, %v2457_v28 }
 0x5e0   : > { %v2462_v39 = vcombine.low %v2366_v29, %v2373_v44  ;;  %v5658_v40 = vcombine.high %v2366_v29, %v2373_v44  ;;  %v2478_v48 = vcombine.low %v2382_v30, %v2389_v31  ;;  %v5659_v49 = vcombine.high %v2382_v30, %v2389_v31 }
 0x5e1   : > { %v2537_v50 = vrot.slane %v2530_v33, %v6789_v61  ;;  %v2545_v51 = vrot.slane %v5660_v36, %v6789_v61  ;;  %v2553_v34 = vrot.slane %v2546_v37, %v6789_v61  ;;  %v2561_v53 = vrot.slane %v5661_v38, %v6789_v61  ;;  %v5664_v33 = vld [vmem:[%s7656_s8] ss:$0 sm:$0xff] }
 0x5e2   : > { %v2469_v32 = vrot.slane %v2462_v39, %v6789_v61  ;;  %v2477_v55 = vrot.slane %v5658_v40, %v6789_v61  ;;  %v2485_v56 = vrot.slane %v2478_v48, %v6789_v61  ;;  %v2493_v57 = vrot.slane %v5659_v49, %v6789_v61 }
 0x5e3   : > { %v2562_v59 = vcombine.low %v2537_v50, %v2545_v51  ;;  %v2578_v52 = vcombine.low %v2553_v34, %v2561_v53  ;;  %v2563_v58 = vcombine.high %v2537_v50, %v2545_v51  ;;  %v2579_v47 = vcombine.high %v2553_v34, %v2561_v53 }
 0x5e4   : > { %v2494_v60 = vcombine.low %v2469_v32, %v2477_v55  ;;  %v2510_v62 = vcombine.low %v2485_v56, %v2493_v57  ;;  %v2495_v63 = vcombine.high %v2469_v32, %v2477_v55  ;;  %v2511_v0 = vcombine.high %v2485_v56, %v2493_v57 }
 0x5e5   : > { %v2570_v1 = vrot.slane %v2562_v59, %v6791_v6  ;;  %v2586_v2 = vrot.slane %v2578_v52, %v6791_v6  ;;  %v2577_v8 = vrot.slane %v2563_v58, %v6791_v6  ;;  %v2593_v9 = vrot.slane %v2579_v47, %v6791_v6  ;;  %v2769_v59 = vld [vmem:[%s7659_s11] sm:$0xff]  ;;  %v2770_v52 = vld [vmem:[%s7659_s11 + $0x8] sm:$0xff]  ;;  %v2771_v47 = vld [vmem:[%s7659_s11 + $0x10] sm:$0xff] }
 0x5e6   : > { %v2502_v54 = vrot.slane %v2494_v60, %v6791_v6  ;;  %v2518_v7 = vrot.slane %v2510_v62, %v6791_v6  ;;  %v2509_v11 = vrot.slane %v2495_v63, %v6791_v6  ;;  %v2525_v12 = vrot.slane %v2511_v0, %v6791_v6  ;;  %v2772_v60 = vld [vmem:[%s7659_s11 + $0x18] sm:$0xff] }
 0x5e7   : > { %v2595_v15 = vcombine.high %v2570_v1, %v2586_v2  ;;  %v2596_v41 = vcombine.low %v2577_v8, %v2593_v9  ;;  %v2597_v43 = vcombine.high %v2577_v8, %v2593_v9  ;;  %v2594_v16 = vcombine.low %v2570_v1, %v2586_v2 }
 0x5e8   : > { %v2527_v45 = vcombine.high %v2502_v54, %v2518_v7  ;;  %v2529_v46 = vcombine.high %v2509_v11, %v2525_v12  ;;  %v2528_v17 = vcombine.low %v2509_v11, %v2525_v12  ;;  %v2526_v18 = vcombine.low %v2502_v54, %v2518_v7  ;;  %v5665_v54 = vld [vmem:[%s7657_s9] ss:$0 sm:$0xff] }
 0x5e9   : > { %2602 = vrot.lane.b32.xlu1 %v2595_v15, %s7691_s30  ;;  %v6207_v19 = vpack.c.bf16 %v2630_v13, %v2629_v10  ;;  %v6211_v20 = vpack.c.bf16 %v2632_v35, %v2631_v14  ;;  %v6215_v58 = vpack.c.bf16 %v2770_v52, %v2769_v59  ;;  %v6219_v62 = vpack.c.bf16 %v2772_v60, %v2771_v47  ;;  %v5666_v11 = vld [vmem:[%s7658_s10] ss:$0 sm:$0xff] }
 0x5ea   : > { %2600 = vrot.lane.b32.xlu0 %v2527_v45, %s7691_s30  ;;  %s5603_s30 = sshll.u32 %s500_s16, 2 }
 0x5eb   : > { %6208 = vmatprep.subr.bf16.mxu0 %v6207_v19  ;;  %6216 = vmatprep.subr.bf16.mxu1 %v6215_v58  ;;  %s502_s1 = scalar_lea.vmem [#allocation2], %s5603_s30  ;;  %s6585_s30 = smov [#allocation2]  }
 0x5ec   : > { %6210 = vmatpush3.bf16.msra.mxu0 %v6207_v19  ;;  %6218 = vmatpush3.bf16.msra.mxu1 %v6215_v58  ;;  %v2919_v19 = vld [vmem:[%s7661_s13 + $0x20] sm:$0xff] }
 0x5ed   : > { %2610 = vrot.lane.b32.xlu1 %v2596_v41, %s7689_s20  ;;  %6212 = vmatprep.subr.bf16.mxu0 %v6211_v20 }
 0x5ee   : > { %2616 = vrot.lane.b32.xlu0 %v2529_v46, %s7687_s25  ;;  %6220 = vmatprep.subr.bf16.mxu1 %v6219_v62  ;;  %v2917_v46 = vld [vmem:[%s7661_s13 + $0x10] sm:$0xff] }
 0x5f0   : > { %6214 = vmatpush3.bf16.msra.mxu0 %v6211_v20  ;;  %6222 = vmatpush3.bf16.msra.mxu1 %v6219_v62  ;;  %v2920_v20 = vld [vmem:[%s7661_s13 + $0x28] sm:$0xff] }
 0x5f1   : > { %2608 = vrot.lane.b32.xlu1 %v2528_v17, %s7689_s20  ;;  %v2918_v17 = vld [vmem:[%s7661_s13 + $0x18] sm:$0xff]  ;;  %s7705_s20 = smov 96  }
 0x5f5   : > { %2618 = vrot.lane.b32.xlu1 %v2597_v43, %s7687_s25  ;;  %v2915_v43 = vld [vmem:[%s7661_s13] sm:$0xff]  ;;  %s7711_s25 = smov 112  }
 0x65b   : > { %v2603_v21 = vpop.permute.xlu1 %2602 }
 0x65c   : > { %v2601_v22 = vpop.permute.xlu0 %2600  ;;  %v2623_v28 = vsel %vm1542_vm1, %v2594_v16, %v2603_v21  ;;  %v2916_v16 = vld [vmem:[%s7661_s13 + $0x8] sm:$0xff]  ;;  %v6231_v21 = vpack.c.bf16 %v2920_v20, %v2919_v19 }
 0x65d   : > { %v2622_v42 = vsel %vm1542_vm1, %v2526_v18, %v2601_v22  ;;  %v6223_v45 = vpack.c.bf16 %v2916_v16, %v2915_v43  ;;  %v6227_v18 = vpack.c.bf16 %v2918_v17, %v2917_v46  ;;  %v2921_v22 = vld [vmem:[%s7661_s13 + $0x30] sm:$0xff] }
 0x65f   : > { %v2611_v23 = vpop.permute.xlu1 %2610  ;;  %6224 = vmatprep.subr.bf16.mxu0 %v6223_v45 }
 0x660   : > { %v2617_v25 = vpop.permute.xlu0 %2616  ;;  %v2625_v29 = vsel %vm1913_vm3, %v2623_v28, %v2611_v23  ;;  %v2922_v23 = vld [vmem:[%s7661_s13 + $0x38] sm:$0xff] }
 0x661   : > { %v2926_v28 = vld [vmem:[%s7661_s13 + $0x58] sm:$0xff] }
 0x663   : > { %v2609_v24 = vpop.permute.xlu1 %2608 }
 0x664   : > { %v2624_v26 = vsel %vm1913_vm3, %v2622_v42, %v2609_v24  ;;  %v6235_v42 = vpack.c.bf16 %v2922_v23, %v2921_v22  ;;  %v2923_v24 = vld [vmem:[%s7661_s13 + $0x40] sm:$0xff]  ;;  %v6584_v22 = vmov -1.0  }
 0x665   : > { %v2627_v27 = vsel %vm2626_vm4, %v2624_v26, %v2617_v25  ;;  %v2924_v25 = vld [vmem:[%s7661_s13 + $0x48] sm:$0xff] }
 0x666   : > { %5986 = vmatprep.mubr.msk.f32.mxu0 %vm520_vm0, %v2627_v27  ;;  %v6239_v26 = vpack.c.bf16 %v2924_v25, %v2923_v24  ;;  %v2925_v27 = vld [vmem:[%s7661_s13 + $0x50] sm:$0xff] }
 0x667   : > { %v2619_v44 = vpop.permute.xlu1 %2618 }
 0x668   : > { %v2628_v30 = vsel %vm2626_vm4, %v2625_v29, %v2619_v44  ;;  %v6243_v29 = vpack.c.bf16 %v2926_v28, %v2925_v27  ;;  %v2927_v44 = vld [vmem:[%s7661_s13 + $0x60] sm:$0xff] }
 0x669   : > { %5987 = vmatmul.mubr.msk.f32.vlgmr.msra.gmra.mrb[4].mxu0 %vm520_vm0, %v2628_v30  ;;  %v2928_v30 = vld [vmem:[%s7661_s13 + $0x68] sm:$0xff] }
 0x66a   : > { %6226 = vmatpush3.bf16.msra.mxu0 %v6223_v45 }
 0x66b   : > { %6228 = vmatprep.subr.bf16.mxu0 %v6227_v18 }
 0x66e   : > { %6230 = vmatpush3.bf16.msra.mxu0 %v6227_v18 }
 0x66f   : > { %6232 = vmatprep.subr.bf16.mxu0 %v6231_v21 }
 0x672   : > { %6234 = vmatpush3.bf16.msra.mxu0 %v6231_v21 }
 0x673   : > { %6236 = vmatprep.subr.bf16.mxu0 %v6235_v42 }
 0x676   : > { %6238 = vmatpush3.bf16.msra.mxu0 %v6235_v42 }
 0x677   : > { %6240 = vmatprep.subr.bf16.mxu0 %v6239_v26 }
 0x67a   : > { %6242 = vmatpush3.bf16.msra.mxu0 %v6239_v26 }
 0x67b   : > { %6244 = vmatprep.subr.bf16.mxu0 %v6243_v29 }
 0x67e   : > { %6246 = vmatpush3.bf16.msra.mxu0 %v6243_v29 }
 0x73c   : > { %v5988_v31 = vpop.f32.mrb[4].mxu0 }
 0x73d   : > { %v2715_v36 = vadd.f32 %v5988_v31, %v6724_v5  ;;  %v2705_v37 = vpop.f32.mrb[5].mxu0  ;;  %v6247_v31 = vpack.c.bf16 %v2928_v30, %v2927_v44 }
 0x73e   : > { %v2714_v38 = vadd.f32 %v2705_v37, %v6722_v3 }
 0x73f   : > { %v7081_v39 = vadd.f32 %v5664_v33, %v2715_v36  ;;  %6248 = vmatprep.subr.bf16.mxu0 %v6247_v31  ;;  %v2930_v36 = vld [vmem:[%s7661_s13 + $0x78] sm:$0xff] }
 0x740   : > { %v7083_v40 = vadd.f32 %v5664_v33, %v2714_v38  ;;  %v2929_v33 = vld [vmem:[%s7661_s13 + $0x70] sm:$0xff]  ;;  %6250 = vmatpush3.bf16.msra.mxu0 %v6247_v31  ;;  %v5667_v38 = vld [vmem:[%s7660_s12] ss:$0 sm:$0xff] }
 0x741   : > { %v2728_v48 = vsel %vm520_vm0, %v7081_v39, 0.0  ;;  %v6251_v37 = vpack.c.bf16 %v2930_v36, %v2929_v33  ;;  %v5670_v36 = vld [vmem:[%s7662_s14] ss:$0 sm:$0xff] }
 0x742   : > { %2729 = vadd.xlane.f32.xlu1 %v2728_v48  ;;  %v2725_v49 = vsel %vm520_vm0, %v7083_v40, 0.0 }
 0x743   : > { %2726 = vadd.xlane.f32.xlu0 %v2725_v49  ;;  %6252 = vmatprep.subr.bf16.mxu0 %v6251_v37 }
 0x744   : > { %6254 = vmatpush3.bf16.msra.mxu0 %v6251_v37 }
 0x7cf   : > { %v2730_v50 = vpop.xlane.xlu1 %2729 }
 0x7d0   : > { %v2732_v51 = vmul.f32 0.03125, %v2730_v50  ;;  %v2727_v34 = vpop.xlane.xlu0 %2726 }
 0x7d1   : > { %v2731_v53 = vmul.f32 0.03125, %v2727_v34 }
 0x7d2   : > { %v2734_v5 = vsub.f32 %v7081_v39, %v2732_v51 }
 0x7d3   : > { %v2733_v3 = vsub.f32 %v7083_v40, %v2731_v53 }
 0x7d4   : > { %v2736_v56 = vmul.f32 %v2734_v5, %v2734_v5 }
 0x7d5   : > { %v2735_v32 = vmul.f32 %v2733_v3, %v2733_v3 }
 0x7d6   : > { %v2740_v57 = vsel %vm520_vm0, %v2736_v56, 0.0 }
 0x7d7   : > { %v2737_v55 = vsel %vm520_vm0, %v2735_v32, 0.0 }
 0x7d8   : > { %2738 = vadd.xlane.f32.xlu0 %v2737_v55 }
 0x7dc   : > { %2741 = vadd.xlane.f32.xlu0 %v2740_v57 }
 0x865   : > { %v2739_v63 = vpop.xlane.xlu0 %2738 }
 0x866   : > { %v2743_v0 = vmul.f32 0.03125, %v2739_v63 }
 0x868   : > { %v2745_v1 = vadd.f32 1e-06, %v2743_v0 }
 0x869   : > { %v2742_v2 = vpop.xlane.xlu0 %2741 }
 0x86a   : > { %6443 = vrsqrt.f32 %v2745_v1  ;;  %v2744_v8 = vmul.f32 0.03125, %v2742_v2 }
 0x86c   : > { %v2746_v9 = vadd.f32 1e-06, %v2744_v8 }
 0x86e   : > { %6445 = vrsqrt.f32 %v2746_v9 }
 0x874   : > { %v6444_v10 = vpop.eup %6443 }
 0x875   : > { %v2749_v7 = vmul.f32 %v6444_v10, %v2733_v3 }
 0x877   : > { %v2758_v12 = vmul.f32 %v5665_v54, %v2749_v7 }
 0x878   : > { %v6446_v13 = vpop.eup %6445 }
 0x879   : > { %v2750_v14 = vmul.f32 %v6446_v13, %v2734_v5  ;;  %v2767_v35 = vadd.f32 %v5666_v11, %v2758_v12 }
 0x87b   : > { %v2759_v15 = vmul.f32 %v5665_v54, %v2750_v14  ;;  %5997 = vmatprep.mubr.msk.f32.mxu1 %vm520_vm0, %v2767_v35 }
 0x87d   : > { %v2768_v41 = vadd.f32 %v5666_v11, %v2759_v15 }
 0x87f   : > { %5998 = vmatmul.mubr.msk.f32.vlgmr.msra.gmra.mrb[14].mxu1 %vm520_vm0, %v2768_v41 }
 0x952   : > { %v5999_v48 = vpop.f32.mrb[14].mxu1 }
 0x953   : > { %v2858_v49 = vadd.f32 %v5999_v48, %v5667_v38  ;;  %v2852_v50 = vpop.f32.mrb[15].mxu1 }
 0x954   : > { %v2853_v51 = vadd.f32 %v5667_v38, %v2852_v50 }
 0x955   : > { %v2864_v34 = vmul.f32 0.70710677, %v2858_v49  ;;  %v2862_v44 = vmul.f32 0.5, %v2858_v49 }
 0x956   : > { %v2863_v53 = vmul.f32 0.70710677, %v2853_v51  ;;  %v2861_v28 = vmul.f32 0.5, %v2853_v51 }
 0x957   : > { %v2870_v5 = vand.u32 2147483647, %v2864_v34  ;;  %vm2866_vm5 = vcmp.ge.f32.partialorder %v2864_v34, 0.0 }
 0x958   : > { %v2869_v3 = vand.u32 2147483647, %v2863_v53  ;;  %vm2865_vm6 = vcmp.ge.f32.partialorder %v2863_v53, 0.0  ;;  %v2868_v23 = vsel %vm2866_vm5, 1.0, %v6584_v22 }
 0x959   : > { %v2872_v32 = vmul.f32 0.3275911, %v2870_v5  ;;  %v2898_v59 = vsub.f32 0.0, %v2870_v5  ;;  %v2867_v25 = vsel %vm2865_vm6, 1.0, %v6584_v22 }
 0x95a   : > { %v2871_v55 = vmul.f32 0.3275911, %v2869_v3  ;;  %v2897_v52 = vsub.f32 0.0, %v2869_v3 }
 0x95b   : > { %v2874_v56 = vadd.f32 1.0, %v2872_v32  ;;  %v2900_v47 = vmul.f32 %v2898_v59, %v2870_v5 }
 0x95c   : > { %v2873_v57 = vadd.f32 1.0, %v2871_v55  ;;  %v2899_v63 = vmul.f32 %v2897_v52, %v2869_v3  ;;  %v5675_v52 = vld [vmem:[%s7653_s5 + $0x20] sm:$0xff] }
 0x95d   : > { %6447 = vrcp.f32 %v2874_v56  ;;  %v2903_v2 = vmul.f32 1.442695, %v2900_v47  ;;  %v5677_v47 = vld [vmem:[%s7653_s5 + $0x30] sm:$0xff] }
 0x95e   : > { %6449 = vrcp.f32 %v2873_v57  ;;  %v2901_v10 = vmul.f32 1.442695, %v2899_v63 }
 0x95f   : > { %6451 = vpow2.f32 %v2903_v2 }
 0x960   : > { %6453 = vpow2.f32 %v2901_v10 }
 0x967   : > { %v6448_v58 = vpop.eup %6447 }
 0x968   : > { %v6450_v60 = vpop.eup %6449  ;;  %v2880_v62 = vmul.f32 1.0614054, %v6448_v58 }
 0x969   : > { %v2879_v0 = vmul.f32 1.0614054, %v6450_v60  ;;  %v6452_v46 = vpop.eup %6451 }
 0x96a   : > { %v2882_v1 = vadd.f32 -1.4531521, %v2880_v62  ;;  %v6454_v18 = vpop.eup %6453  ;;  %v5678_v62 = vld [vmem:[%s7653_s5 + $0x38] sm:$0xff] }
 0x96b   : > { %v2881_v8 = vadd.f32 -1.4531521, %v2879_v0  ;;  %v6259_v63 = vpack.c.bf16 %v5678_v62, %v5677_v47 }
 0x96c   : > { %v2884_v9 = vmul.f32 %v6448_v58, %v2882_v1 }
 0x96d   : > { %v2883_v54 = vmul.f32 %v6450_v60, %v2881_v8 }
 0x96e   : > { %v2886_v7 = vadd.f32 1.4214138, %v2884_v9 }
 0x96f   : > { %v2885_v11 = vadd.f32 1.4214138, %v2883_v54 }
 0x970   : > { %v2888_v12 = vmul.f32 %v6448_v58, %v2886_v7  ;;  %v5672_v7 = vld [vmem:[%s7651_s3 + $0x1] ss:$0 sm:$0xff] }
 0x971   : > { %v2887_v13 = vmul.f32 %v6450_v60, %v2885_v11 }
 0x972   : > { %v2890_v14 = vadd.f32 -0.28449672, %v2888_v12 }
 0x973   : > { %v2889_v35 = vadd.f32 -0.28449672, %v2887_v13 }
 0x974   : > { %v2892_v15 = vmul.f32 %v6448_v58, %v2890_v14 }
 0x975   : > { %v2891_v41 = vmul.f32 %v6450_v60, %v2889_v35  ;;  %v5674_v35 = vld [vmem:[%s7652_s4 + $0x1] ss:$0 sm:$0xff] }
 0x976   : > { %v2894_v43 = vadd.f32 0.2548296, %v2892_v15 }
 0x977   : > { %v2893_v16 = vadd.f32 0.2548296, %v2891_v41 }
 0x978   : > { %v2896_v45 = vmul.f32 %v6448_v58, %v2894_v43  ;;  %v5676_v58 = vld [vmem:[%s7653_s5 + $0x28] sm:$0xff] }
 0x979   : > { %v2895_v17 = vmul.f32 %v6450_v60, %v2893_v16  ;;  %v6255_v60 = vpack.c.bf16 %v5676_v58, %v5675_v52  ;;  %v5680_v16 = vld [vmem:[%s7654_s6 + $0x1] ss:$0 sm:$0xff] }
 0x97a   : > { %v2906_v19 = vmul.f32 %v6452_v46, %v2896_v45 }
 0x97b   : > { %v2905_v20 = vmul.f32 %v6454_v18, %v2895_v17  ;;  %6256 = vmatprep.subr.bf16.mxu1 %v6255_v60 }
 0x97c   : > { %v2908_v21 = vsub.f32 1.0, %v2906_v19  ;;  %6258 = vmatpush3.bf16.msra.mxu1 %v6255_v60 }
 0x97d   : > { %v2907_v42 = vsub.f32 1.0, %v2905_v20  ;;  %6260 = vmatprep.subr.bf16.mxu1 %v6259_v63 }
 0x97e   : > { %v2910_v24 = vmul.f32 %v2908_v21, %v2868_v23 }
 0x97f   : > { %v2909_v26 = vmul.f32 %v2907_v42, %v2867_v25 }
 0x980   : > { %v2912_v27 = vadd.f32 1.0, %v2910_v24  ;;  %6262 = vmatpush3.bf16.msra.mxu1 %v6259_v63 }
 0x981   : > { %v2911_v29 = vadd.f32 1.0, %v2909_v26 }
 0x982   : > { %v2914_v31 = vmul.f32 %v2912_v27, %v2862_v44 }
 0x983   : > { %v2913_v30 = vmul.f32 %v2911_v29, %v2861_v28 }
 0x985   : > { %6032 = vmatprep.mubr.f32.mxu0 %v2913_v30 }
 0x986   : > { %6033 = vmatmul.mubr.f32.vlgmr.msra.gmra.mrb[6].mxu0 %v2914_v31 }
 0xa59   : > { %v6034_v33 = vpop.f32.mrb[6].mxu0 }
 0xa5a   : > { %v3007_v37 = vadd.f32 %v6034_v33, %v7081_v39  ;;  %v2997_v38 = vpop.f32.mrb[7].mxu0 }
 0xa5b   : > { %v3006_v48 = vadd.f32 %v2997_v38, %v7083_v40 }
 0xa5c   : > { %v7171_v50 = vadd.f32 %v5670_v36, %v3007_v37 }
 0xa5d   : > { %v7173_v34 = vadd.f32 %v5670_v36, %v3006_v48 }
 0xa5e   : > { %v3020_v49 = vsel %vm520_vm0, %v7171_v50, 0.0 }
 0xa5f   : > { %3021 = vadd.xlane.f32.xlu1 %v3020_v49  ;;  %v3017_v51 = vsel %vm520_vm0, %v7173_v34, 0.0 }
 0xa60   : > { %3018 = vadd.xlane.f32.xlu0 %v3017_v51 }
 0xaec   : > { %v3022_v53 = vpop.xlane.xlu1 %3021 }
 0xaed   : > { %v3024_v5 = vmul.f32 0.03125, %v3022_v53  ;;  %v3019_v3 = vpop.xlane.xlu0 %3018 }
 0xaee   : > { %v3023_v32 = vmul.f32 0.03125, %v3019_v3 }
 0xaef   : > { %v3026_v39 = vsub.f32 %v7171_v50, %v3024_v5 }
 0xaf0   : > { %v3025_v40 = vsub.f32 %v7173_v34, %v3023_v32 }
 0xaf1   : > { %v3028_v55 = vmul.f32 %v3026_v39, %v3026_v39 }
 0xaf2   : > { %v3027_v56 = vmul.f32 %v3025_v40, %v3025_v40 }
 0xaf3   : > { %v3032_v57 = vsel %vm520_vm0, %v3028_v55, 0.0 }
 0xaf4   : > { %3033 = vadd.xlane.f32.xlu1 %v3032_v57  ;;  %v3029_v59 = vsel %vm520_vm0, %v3027_v56, 0.0 }
 0xaf5   : > { %3030 = vadd.xlane.f32.xlu0 %v3029_v59 }
 0xb81   : > { %v3034_v0 = vpop.xlane.xlu1 %3033 }
 0xb82   : > { %v3036_v1 = vmul.f32 0.03125, %v3034_v0  ;;  %v3031_v2 = vpop.xlane.xlu0 %3030 }
 0xb83   : > { %v3035_v8 = vmul.f32 0.03125, %v3031_v2 }
 0xb84   : > { %v3038_v9 = vadd.f32 1e-06, %v3036_v1 }
 0xb85   : > { %v3037_v10 = vadd.f32 1e-06, %v3035_v8 }
 0xb86   : > { %6455 = vrsqrt.f32 %v3038_v9 }
 0xb87   : > { %6457 = vrsqrt.f32 %v3037_v10 }
 0xb90   : > { %v6456_v54 = vpop.eup %6455 }
 0xb91   : > { %v6458_v11 = vpop.eup %6457  ;;  %v3042_v12 = vmul.f32 %v6456_v54, %v3026_v39 }
 0xb92   : > { %v3041_v13 = vmul.f32 %v6458_v11, %v3025_v40 }
 0xb93   : > { %v3052_v14 = vmul.f32 %v5672_v7, %v3042_v12 }
 0xb94   : > { %v3051_v15 = vmul.f32 %v5672_v7, %v3041_v13 }
 0xb95   : > { %v3062_v43 = vadd.f32 %v5674_v35, %v3052_v14 }
 0xb96   : > { %v3061_v41 = vadd.f32 %v5674_v35, %v3051_v15 }
 0xb98   : > { %6043 = vmatprep.mubr.msk.f32.mxu1 %vm520_vm0, %v3061_v41 }
 0xb99   : > { %6044 = vmatmul.mubr.msk.f32.vlgmr.msra.gmra.mrb[16].mxu1 %vm520_vm0, %v3062_v43 }
 0xc6c   : > { %v6045_v45 = vpop.f32.mrb[16].mxu1 }
 0xc6d   : > { %v7206_v46 = vadd.f32 %v6045_v45, %v5680_v16  ;;  %v3148_v17 = vpop.f32.mrb[17].mxu1 }
 0xc6e   : > { %v7208_v18 = vadd.f32 %v5680_v16, %v3148_v17 }
 0xc6f   : > { %3179 = vrot.lane.b32.xlu1 %v7206_v46, %s7705_s20 }
 0xc70   : > { %3177 = vrot.lane.b32.xlu0 %v7208_v18, %s7705_s20  ;;  %s7712_s20 = smov 64  }
 0xc73   : > { %3185 = vrot.lane.b32.xlu1 %v7206_v46, %s7706_s17 }
 0xc74   : > { %3189 = vrot.lane.b32.xlu0 %v7208_v18, %s7707_s0 }
 0xc77   : > { %3191 = vrot.lane.b32.xlu1 %v7206_v46, %s7707_s0  ;;  %s7714_s0 = smov 48  }
 0xc78   : > { %3195 = vrot.lane.b32.xlu0 %v7208_v18, %s7708_s23 }
 0xc7b   : > { %3197 = vrot.lane.b32.xlu1 %v7206_v46, %s7708_s23  ;;  %s7715_s23 = smov 40  }
 0xc7c   : > { %3159 = vrot.lane.b32.xlu0 %v7208_v18, %s7709_s26 }
 0xc7f   : > { %3183 = vrot.lane.b32.xlu1 %v7208_v18, %s7706_s17  ;;  %s7713_s17 = smov 56  }
 0xc80   : > { %3171 = vrot.lane.b32.xlu0 %v7208_v18, %s7710_s27 }
 0xc83   : > { %3161 = vrot.lane.b32.xlu1 %v7206_v46, %s7709_s26  ;;  %s7717_s26 = smov 16  }
 0xc84   : > { %3167 = vrot.lane.b32.xlu0 %v7206_v46, %s7711_s25 }
 0xc87   : > { %3165 = vrot.lane.b32.xlu1 %v7208_v18, %s7711_s25 }
 0xc8b   : > { %3173 = vrot.lane.b32.xlu1 %v7206_v46, %s7710_s27  ;;  %s7718_s27 = smov 24  }
 0xce1   : > { %v3180_v19 = vpop.permute.xlu1 %3179 }
 0xce2   : > { %v3178_v20 = vpop.permute.xlu0 %3177 }
 0xce5   : > { %v3186_v21 = vpop.permute.xlu1 %3185 }
 0xce6   : > { %v3190_v23 = vpop.permute.xlu0 %3189 }
 0xce7   : > { %v3257_v27 = vcombine.low %v3178_v20, %v3190_v23  ;;  %v3258_v28 = vcombine.high %v3178_v20, %v3190_v23 }
 0xce9   : > { %v3192_v42 = vpop.permute.xlu1 %3191  ;;  %v3265_v48 = vrot.slane %v3257_v27, %v6789_v61  ;;  %v3272_v49 = vrot.slane %v3258_v28, %v6789_v61 }
 0xcea   : > { %v3196_v24 = vpop.permute.xlu0 %3195  ;;  %v3461_v25 = vcombine.low %v3180_v19, %v3192_v42  ;;  %v3462_v26 = vcombine.high %v3180_v19, %v3192_v42 }
 0xcec   : > { %v3469_v33 = vrot.slane %v3461_v25, %v6789_v61  ;;  %v3476_v36 = vrot.slane %v3462_v26, %v6789_v61 }
 0xced   : > { %v3198_v29 = vpop.permute.xlu1 %3197 }
 0xcee   : > { %v3477_v44 = vcombine.low %v3186_v21, %v3198_v29  ;;  %v3478_v30 = vcombine.high %v3186_v21, %v3198_v29  ;;  %v3160_v31 = vpop.permute.xlu0 %3159 }
 0xcf0   : > { %v3485_v37 = vrot.slane %v3477_v44, %v6789_v61  ;;  %v3492_v38 = vrot.slane %v3478_v30, %v6789_v61 }
 0xcf1   : > { %v3184_v51 = vpop.permute.xlu1 %3183 }
 0xcf2   : > { %v3525_v53 = vcombine.low %v3469_v33, %v3485_v37  ;;  %v3526_v5 = vcombine.high %v3469_v33, %v3485_v37  ;;  %v3541_v3 = vcombine.low %v3476_v36, %v3492_v38  ;;  %v3542_v32 = vcombine.high %v3476_v36, %v3492_v38  ;;  %v3172_v39 = vpop.permute.xlu0 %3171 }
 0xcf3   : > { %v3273_v40 = vcombine.low %v3184_v51, %v3196_v24  ;;  %v3274_v55 = vcombine.high %v3184_v51, %v3196_v24  ;;  %v3241_v56 = vcombine.low %v3160_v31, %v3172_v39  ;;  %v3242_v57 = vcombine.high %v3160_v31, %v3172_v39 }
 0xcf4   : > { %v3533_v59 = vrot.slane %v3525_v53, %v6791_v6  ;;  %v3540_v52 = vrot.slane %v3526_v5, %v6791_v6  ;;  %v3549_v58 = vrot.slane %v3541_v3, %v6791_v6  ;;  %v3556_v47 = vrot.slane %v3542_v32, %v6791_v6 }
 0xcf5   : > { %v3281_v60 = vrot.slane %v3273_v40, %v6789_v61  ;;  %v3288_v62 = vrot.slane %v3274_v55, %v6789_v61  ;;  %v3249_v63 = vrot.slane %v3241_v56, %v6789_v61  ;;  %v3256_v0 = vrot.slane %v3242_v57, %v6789_v61  ;;  %v3162_v1 = vpop.permute.xlu1 %3161 }
 0xcf6   : > { %v5692_v2 = vcombine.low %v3533_v59, %v3540_v52  ;;  %v5694_v8 = vcombine.high %v3533_v59, %v3540_v52  ;;  %v5696_v9 = vcombine.low %v3549_v58, %v3556_v47  ;;  %v5698_v10 = vcombine.high %v3549_v58, %v3556_v47  ;;  %v3168_v13 = vpop.permute.xlu0 %3167 }
 0xcf7   : > { %v3321_v54 = vcombine.low %v3265_v48, %v3281_v60  ;;  %v3322_v7 = vcombine.high %v3265_v48, %v3281_v60  ;;  %v3337_v11 = vcombine.low %v3272_v49, %v3288_v62  ;;  %v3338_v12 = vcombine.high %v3272_v49, %v3288_v62 }
 0xcf8   : > { %v7253_v14 = vrot.slane %v5692_v2, %v6789_v61  ;;  %v7256_v35 = vrot.slane %v5694_v8, %v6789_v61  ;;  %v7259_v15 = vrot.slane %v5696_v9, %v6789_v61  ;;  %v7262_v41 = vrot.slane %v5698_v10, %v6789_v61 }
 0xcf9   : > { %v3329_v43 = vrot.slane %v3321_v54, %v6791_v6  ;;  %v3336_v16 = vrot.slane %v3322_v7, %v6791_v6  ;;  %v3345_v45 = vrot.slane %v3337_v11, %v6791_v6  ;;  %v3352_v17 = vrot.slane %v3338_v12, %v6791_v6  ;;  %v3166_v19 = vpop.permute.xlu1 %3165 }
 0xcfa   : > { %v3429_v20 = vcombine.low %v7206_v46, %v3168_v13  ;;  %v3430_v21 = vcombine.high %v7206_v46, %v3168_v13  ;;  %v3225_v23 = vcombine.low %v7208_v18, %v3166_v19  ;;  %v3226_v42 = vcombine.high %v7208_v18, %v3166_v19 }
 0xcfb   : > { %v5684_v24 = vcombine.low %v3329_v43, %v3336_v16  ;;  %v5686_v25 = vcombine.high %v3329_v43, %v3336_v16  ;;  %v5688_v26 = vcombine.low %v3345_v45, %v3352_v17  ;;  %v5690_v27 = vcombine.high %v3345_v45, %v3352_v17 }
 0xcfc   : > { %v3437_v28 = vrot.slane %v3429_v20, %v6789_v61  ;;  %v3444_v29 = vrot.slane %v3430_v21, %v6789_v61  ;;  %v3233_v44 = vrot.slane %v3225_v23, %v6789_v61  ;;  %v3240_v30 = vrot.slane %v3226_v42, %v6789_v61 }
 0xcfd   : > { %v3648_v31 = vrot.slane %v5684_v24, %v6789_v61  ;;  %v3664_v33 = vrot.slane %v5686_v25, %v6789_v61  ;;  %v3680_v36 = vrot.slane %v5688_v26, %v6789_v61  ;;  %v3696_v37 = vrot.slane %v5690_v27, %v6789_v61  ;;  %v3174_v38 = vpop.permute.xlu1 %3173 }
 0xcfe   : > { %v3289_v48 = vcombine.low %v3233_v44, %v3249_v63  ;;  %v3290_v49 = vcombine.high %v3233_v44, %v3249_v63  ;;  %v3305_v51 = vcombine.low %v3240_v30, %v3256_v0  ;;  %v3306_v53 = vcombine.high %v3240_v30, %v3256_v0 }
 0xcff   : > { %v3445_v5 = vcombine.low %v3162_v1, %v3174_v38  ;;  %v3446_v3 = vcombine.high %v3162_v1, %v3174_v38  ;;  %v3713_v32 = vcombine.low %v3648_v31, %v3664_v33  ;;  %v3745_v39 = vcombine.low %v3680_v36, %v3696_v37 }
 0xd00   : > { %v3297_v40 = vrot.slane %v3289_v48, %v6791_v6  ;;  %v3304_v55 = vrot.slane %v3290_v49, %v6791_v6  ;;  %v3313_v56 = vrot.slane %v3305_v51, %v6791_v6  ;;  %v3320_v57 = vrot.slane %v3306_v53, %v6791_v6 }
 0xd01   : > { %v3453_v59 = vrot.slane %v3445_v5, %v6789_v61  ;;  %v3460_v52 = vrot.slane %v3446_v3, %v6789_v61  ;;  %v3721_v58 = vrot.slane %v3713_v32, %v6791_v6  ;;  %v3753_v47 = vrot.slane %v3745_v39, %v6791_v6 }
 0xd02   : > { %v5683_v60 = vcombine.low %v3297_v40, %v3304_v55  ;;  %v5685_v62 = vcombine.high %v3297_v40, %v3304_v55  ;;  %v5687_v63 = vcombine.low %v3313_v56, %v3320_v57  ;;  %v5689_v0 = vcombine.high %v3313_v56, %v3320_v57 }
 0xd03   : > { %v3493_v1 = vcombine.low %v3437_v28, %v3453_v59  ;;  %v3494_v2 = vcombine.high %v3437_v28, %v3453_v59  ;;  %v3509_v8 = vcombine.low %v3444_v29, %v3460_v52  ;;  %v3510_v9 = vcombine.high %v3444_v29, %v3460_v52 }
 0xd04   : > { %v3641_v10 = vrot.slane %v5683_v60, %v6789_v61  ;;  %v3657_v54 = vrot.slane %v5685_v62, %v6789_v61  ;;  %v3673_v7 = vrot.slane %v5687_v63, %v6789_v61  ;;  %v3689_v11 = vrot.slane %v5689_v0, %v6789_v61 }
 0xd05   : > { %v3501_v12 = vrot.slane %v3493_v1, %v6791_v6  ;;  %v3508_v13 = vrot.slane %v3494_v2, %v6791_v6  ;;  %v3517_v43 = vrot.slane %v3509_v8, %v6791_v6  ;;  %v3524_v16 = vrot.slane %v3510_v9, %v6791_v6 }
 0xd06   : > { %v3765_v45 = vcombine.low %v3721_v58, %v3753_v47  ;;  %v3849_v17 = vcombine.low %v7253_v14, %v7256_v35  ;;  %v3881_v19 = vcombine.low %v7259_v15, %v7262_v41  ;;  %v3714_v20 = vcombine.high %v3648_v31, %v3664_v33 }
 0xd07   : > { %v5691_v21 = vcombine.low %v3501_v12, %v3508_v13  ;;  %v5693_v23 = vcombine.high %v3501_v12, %v3508_v13  ;;  %v5695_v42 = vcombine.low %v3517_v43, %v3524_v16  ;;  %v5697_v24 = vcombine.high %v3517_v43, %v3524_v16 }
 0xd08   : > { %v3857_v25 = vrot.slane %v3849_v17, %v6791_v6  ;;  %v3889_v26 = vrot.slane %v3881_v19, %v6791_v6  ;;  %v3728_v27 = vrot.slane %v3714_v20, %v6791_v6  ;;  %v3746_v28 = vcombine.high %v3680_v36, %v3696_v37 }
 0xd09   : > { %v3777_v29 = vrot.slane %v5691_v21, %v6789_v61  ;;  %v3793_v44 = vrot.slane %v5693_v23, %v6789_v61  ;;  %v3809_v30 = vrot.slane %v5695_v42, %v6789_v61  ;;  %v3825_v38 = vrot.slane %v5697_v24, %v6789_v61  ;;  %v6503_v21 = vld [vmem:[%s7704_s2] ss:$0 sm:$0xff] }
 0xd0a   : > { %v3901_v31 = vcombine.low %v3857_v25, %v3889_v26  ;;  %v3760_v33 = vrot.slane %v3746_v28, %v6791_v6  ;;  %v3850_v48 = vcombine.high %v7253_v14, %v7256_v35  ;;  %v3882_v49 = vcombine.high %v7259_v15, %v7262_v41 }
 0xd0b   : > { %v3833_v51 = vcombine.low %v3777_v29, %v3793_v44  ;;  %v3834_v53 = vcombine.high %v3777_v29, %v3793_v44  ;;  %v3865_v36 = vcombine.low %v3809_v30, %v3825_v38  ;;  %v3866_v37 = vcombine.high %v3809_v30, %v3825_v38 }
 0xd0c   : > { %v6263_v5 = vpack.c.bf16 %v3901_v31, %v3765_v45  ;;  %v3768_v3 = vcombine.high %v3728_v27, %v3760_v33  ;;  %v3864_v32 = vrot.slane %v3850_v48, %v6791_v6  ;;  %v3896_v39 = vrot.slane %v3882_v49, %v6791_v6 }
 0xd0d   : > { %v3766_v40 = vcombine.high %v3721_v58, %v3753_v47  ;;  %v3902_v55 = vcombine.high %v3857_v25, %v3889_v26  ;;  %v3697_v56 = vcombine.low %v3641_v10, %v3657_v54  ;;  %v3729_v57 = vcombine.low %v3673_v7, %v3689_v11 }
 0xd0e   : > { %6265 = vmatprep.subr.msk.bf16.mxu1 %vm6869_vm2, %v6263_v5  ;;  %v3904_v14 = vcombine.high %v3864_v32, %v3896_v39  ;;  %v3698_v35 = vcombine.high %v3641_v10, %v3657_v54  ;;  %v3730_v15 = vcombine.high %v3673_v7, %v3689_v11  ;;  %v3841_v41 = vrot.slane %v3833_v51, %v6791_v6 }
 0xd0f   : > { %6268 = vmatpush3.bf16.xpose.msk.msra.mxu1 %vm6869_vm2, %v6263_v5  ;;  %v6269_v59 = vpack.c.bf16 %v3902_v55, %v3766_v40  ;;  %v3705_v52 = vrot.slane %v3697_v56, %v6791_v6  ;;  %v3737_v60 = vrot.slane %v3729_v57, %v6791_v6  ;;  %v3873_v58 = vrot.slane %v3865_v36, %v6791_v6 }
 0xd10   : > { %v6281_v47 = vpack.c.bf16 %v3904_v14, %v3768_v3  ;;  %v3712_v62 = vrot.slane %v3698_v35, %v6791_v6  ;;  %v3744_v63 = vrot.slane %v3730_v15, %v6791_v6  ;;  %v3848_v1 = vrot.slane %v3834_v53, %v6791_v6 }
 0xd11   : > { %6271 = vmatprep.subr.msk.bf16.mxu1 %vm6869_vm2, %v6269_v59  ;;  %v3761_v0 = vcombine.low %v3705_v52, %v3737_v60  ;;  %v3897_v8 = vcombine.low %v3841_v41, %v3873_v58  ;;  %v3880_v9 = vrot.slane %v3866_v37, %v6791_v6  ;;  %v3767_v10 = vcombine.low %v3728_v27, %v3760_v33 }
 0xd12   : > { %6283 = vmatprep.subr.msk.bf16.mxu0 %vm6869_vm2, %v6281_v47  ;;  %v3764_v2 = vcombine.high %v3712_v62, %v3744_v63  ;;  %v3903_v54 = vcombine.low %v3864_v32, %v3896_v39  ;;  %v3762_v7 = vcombine.high %v3705_v52, %v3737_v60  ;;  %v3898_v13 = vcombine.high %v3841_v41, %v3873_v58 }
 0xd13   : > { %6286 = vmatpush3.bf16.xpose.msk.msra.mxu0 %vm6869_vm2, %v6281_v47  ;;  %6050 = vmatprep.mubr.msk.f32.mxu1 %vm1542_vm1, %v3761_v0  ;;  %v3900_v11 = vcombine.high %v3848_v1, %v3880_v9  ;;  %v3763_v43 = vcombine.low %v3712_v62, %v3744_v63  ;;  %v3899_v16 = vcombine.low %v3848_v1, %v3880_v9 }
 0xd14   : > { %6071 = vmatprep.mubr.msk.f32.mxu0 %vm1542_vm1, %v3764_v2  ;;  %v6275_v12 = vpack.c.bf16 %v3903_v54, %v3767_v10 }
 0xd16   : > { %6051 = vmatmul.mubr.msk.f32.vlgmr.msra.gmra.mrb[18].mxu1 %vm1542_vm1, %v3897_v8 }
 0xd17   : > { %6274 = vmatpush3.bf16.xpose.msk.msra.mxu1 %vm6869_vm2, %v6269_v59  ;;  %6057 = vmatprep.mubr.msk.f32.mxu1 %vm1542_vm1, %v3762_v7 }
 0xd18   : > { %6277 = vmatprep.subr.msk.bf16.mxu1 %vm6869_vm2, %v6275_v12 }
 0xd1a   : > { %6072 = vmatmul.mubr.msk.f32.vlgmr.msra.gmra.mrb[8].mxu0 %vm1542_vm1, %v3900_v11 }
 0xd1e   : > { %6058 = vmatmul.mubr.msk.f32.vlgmr.msra.gmra.mrb[20].mxu1 %vm1542_vm1, %v3898_v13 }
 0xd1f   : > { %6280 = vmatpush3.bf16.xpose.msk.msra.mxu1 %vm6869_vm2, %v6275_v12  ;;  %6064 = vmatprep.mubr.msk.f32.mxu1 %vm1542_vm1, %v3763_v43 }
 0xd26   : > { %6065 = vmatmul.mubr.msk.f32.vlgmr.msra.gmra.mrb[22].mxu1 %vm1542_vm1, %v3899_v16 }
 0xde9   : > { %v6052_v45 = vpop.f32.mrb[18].mxu1 }
 0xdea   : > { %v4390_v17 = vmul.f32 0.35355338, %v6052_v45  ;;  %v4119_v19 = vpop.f32.mrb[19].mxu1 }
 0xdeb   : > { %v4389_v20 = vmul.f32 0.35355338, %v4119_v19 }
 0xdec   : > { %v4398_v23 = vadd.f32 %v6503_v21, %v4390_v17 }
 0xded   : > { %v6073_v42 = vpop.f32.mrb[8].mxu0  ;;  %v4397_v24 = vadd.f32 %v6503_v21, %v4389_v20 }
 0xdee   : > { %v4380_v25 = vpop.f32.mrb[9].mxu0  ;;  %v4408_v4 = vsel %vm1913_vm3, %v4398_v23, -inf  ;;  %v4396_v26 = vmul.f32 0.35355338, %v6073_v42 }
 0xdef   : > { %v4395_v27 = vmul.f32 0.35355338, %v4380_v25  ;;  %4409 = vmax.xlane.f32.xlu1 %v4408_v4  ;;  %v4405_v28 = vsel %vm1913_vm3, %v4397_v24, -inf }
 0xdf0   : > { %4406 = vmax.xlane.f32.xlu0 %v4405_v28  ;;  %v4404_v48 = vadd.f32 %v6503_v21, %v4396_v26 }
 0xdf1   : > { %v6059_v29 = vpop.f32.mrb[20].mxu1  ;;  %v4403_v44 = vadd.f32 %v6503_v21, %v4395_v27 }
 0xdf2   : > { %v4392_v30 = vmul.f32 0.35355338, %v6059_v29  ;;  %v4206_v38 = vpop.f32.mrb[21].mxu1  ;;  %v4426_v36 = vsel %vm1913_vm3, %v4404_v48, -inf }
 0xdf3   : > { %v4391_v31 = vmul.f32 0.35355338, %v4206_v38  ;;  %v4423_v33 = vsel %vm1913_vm3, %v4403_v44, -inf }
 0xdf4   : > { %4424 = vmax.xlane.f32.xlu1 %v4423_v33  ;;  %v4400_v49 = vadd.f32 %v6503_v21, %v4392_v30 }
 0xdf5   : > { %v4399_v53 = vadd.f32 %v6503_v21, %v4391_v31 }
 0xdf6   : > { %v4414_v51 = vsel %vm1913_vm3, %v4400_v49, -inf }
 0xdf7   : > { %4415 = vmax.xlane.f32.xlu0 %v4414_v51  ;;  %v4411_v3 = vsel %vm1913_vm3, %v4399_v53, -inf }
 0xdf8   : > { %4427 = vmax.xlane.f32.xlu1 %v4426_v36 }
 0xdf9   : > { %v6066_v37 = vpop.f32.mrb[22].mxu1 }
 0xdfa   : > { %v4293_v5 = vpop.f32.mrb[23].mxu1  ;;  %v4394_v32 = vmul.f32 0.35355338, %v6066_v37 }
 0xdfb   : > { %v4393_v39 = vmul.f32 0.35355338, %v4293_v5  ;;  %4412 = vmax.xlane.f32.xlu0 %v4411_v3 }
 0xdfc   : > { %v4402_v56 = vadd.f32 %v6503_v21, %v4394_v32 }
 0xdfd   : > { %v4401_v40 = vadd.f32 %v6503_v21, %v4393_v39 }
 0xdfe   : > { %v4420_v57 = vsel %vm1913_vm3, %v4402_v56, -inf }
 0xdff   : > { %v4417_v55 = vsel %vm1913_vm3, %v4401_v40, -inf }
 0xe00   : > { %4418 = vmax.xlane.f32.xlu0 %v4417_v55 }
 0xe04   : > { %4421 = vmax.xlane.f32.xlu0 %v4420_v57 }
 0xe09   : > { %3203 = vrot.lane.b32.xlu1 %v7206_v46, %s7712_s20 }
 0xe0d   : > { %3207 = vrot.lane.b32.xlu1 %v7208_v18, %s7713_s17 }
 0xe11   : > { %3209 = vrot.lane.b32.xlu1 %v7206_v46, %s7713_s17  ;;  %s6508_s17 = sshll.u32 %s6585_s30, 4  ;;  %s6509_s17 = int_to_ptr.vmem [resolvable:$false] %s6508_s17 }
 0xe12   : > { %s6510_s2 = scalar_lea.vmem %s6509_s17, 128 }
 0xe15   : > { %3215 = vrot.lane.b32.xlu1 %v7206_v46, %s7714_s0 }
 0xe19   : > { %3221 = vrot.lane.b32.xlu1 %v7206_v46, %s7715_s23 }
 0xe1a   : > { %3201 = vrot.lane.b32.xlu0 %v7208_v18, %s7712_s20  ;;  %s5515_s20 = scalar_lea.sflag [#allocation3], %s500_s16 }
 0xe1e   : > { %3213 = vrot.lane.b32.xlu0 %v7208_v18, %s7714_s0  ;;  %s5770_s0 = sshll.u32 %s6687_s22, 6 }
 0xe1f   : > { %s7606_s25 = scalar_lea.hbm %s7663_s15, %s5770_s0 }
 0xe22   : > { %3219 = vrot.lane.b32.xlu0 %v7208_v18, %s7715_s23  ;;  %s7716_s23 = smov 8  }
 0xe7c   : > { %v4410_v14 = vpop.xlane.xlu1 %4409 }
 0xe7d   : > { %v4430_v35 = vsub.f32 %v4398_v23, %v4410_v14  ;;  %v4407_v15 = vpop.xlane.xlu0 %4406 }
 0xe7e   : > { %v4429_v41 = vsub.f32 %v4397_v24, %v4407_v15 }
 0xe7f   : > { %v4439_v59 = vmul.f32 1.442695, %v4430_v35 }
 0xe80   : > { %v4437_v52 = vmul.f32 1.442695, %v4429_v41 }
 0xe81   : > { %6459 = vpow2.f32 %v4439_v59  ;;  %v4425_v60 = vpop.xlane.xlu1 %4424 }
 0xe82   : > { %6461 = vpow2.f32 %v4437_v52  ;;  %v4435_v58 = vsub.f32 %v4403_v44, %v4425_v60 }
 0xe84   : > { %v4449_v46 = vmul.f32 1.442695, %v4435_v58  ;;  %v4416_v47 = vpop.xlane.xlu0 %4415 }
 0xe85   : > { %v4432_v62 = vsub.f32 %v4400_v49, %v4416_v47  ;;  %v4428_v63 = vpop.xlane.xlu1 %4427 }
 0xe86   : > { %6463 = vpow2.f32 %v4449_v46  ;;  %v4436_v0 = vsub.f32 %v4404_v48, %v4428_v63 }
 0xe87   : > { %v4443_v1 = vmul.f32 1.442695, %v4432_v62 }
 0xe88   : > { %v4451_v2 = vmul.f32 1.442695, %v4436_v0  ;;  %v4413_v8 = vpop.xlane.xlu0 %4412 }
 0xe89   : > { %6465 = vpow2.f32 %v4443_v1  ;;  %v4431_v18 = vsub.f32 %v4399_v53, %v4413_v8  ;;  %v3204_v9 = vpop.permute.xlu1 %3203 }
 0xe8a   : > { %6467 = vpow2.f32 %v4451_v2 }
 0xe8b   : > { %v7373_v10 = vpop.eup %6459  ;;  %v4441_v54 = vmul.f32 1.442695, %v4431_v18 }
 0xe8c   : > { %v7375_v7 = vpop.eup %6461  ;;  %v4456_v11 = vsel %vm1913_vm3, %v7373_v10, 0.0 }
 0xe8d   : > { %6469 = vpow2.f32 %v4441_v54  ;;  %v3208_v12 = vpop.permute.xlu1 %3207  ;;  %v4419_v13 = vpop.xlane.xlu0 %4418  ;;  %4457 = vadd.xlane.f32.xlu1 %v4456_v11  ;;  %v4453_v43 = vsel %vm1913_vm3, %v7375_v7, 0.0 }
 0xe8e   : > { %v4433_v16 = vsub.f32 %v4401_v40, %v4419_v13  ;;  %4454 = vadd.xlane.f32.xlu0 %v4453_v43 }
 0xe90   : > { %v7381_v45 = vpop.eup %6463  ;;  %v4445_v17 = vmul.f32 1.442695, %v4433_v16 }
 0xe91   : > { %v3210_v19 = vpop.permute.xlu1 %3209  ;;  %v4422_v20 = vpop.xlane.xlu0 %4421  ;;  %v4471_v21 = vsel %vm1913_vm3, %v7381_v45, 0.0 }
 0xe92   : > { %6471 = vpow2.f32 %v4445_v17  ;;  %v4434_v23 = vsub.f32 %v4402_v56, %v4422_v20  ;;  %4472 = vadd.xlane.f32.xlu0 %v4471_v21 }
 0xe93   : > { %v7385_v42 = vpop.eup %6465 }
 0xe94   : > { %v4447_v24 = vmul.f32 1.442695, %v4434_v23  ;;  %v4462_v25 = vsel %vm1913_vm3, %v7385_v42, 0.0  ;;  %v7389_v4 = vpop.eup %6467 }
 0xe95   : > { %v3216_v26 = vpop.permute.xlu1 %3215  ;;  %4463 = vadd.xlane.f32.xlu1 %v4462_v25  ;;  %v3202_v27 = vpop.permute.xlu0 %3201  ;;  %v4474_v30 = vsel %vm1913_vm3, %v7389_v4, 0.0 }
 0xe96   : > { %6473 = vpow2.f32 %v4447_v24  ;;  %v3565_v29 = vcombine.low %v3204_v9, %v3216_v26  ;;  %v3566_v44 = vcombine.high %v3204_v9, %v3216_v26 }
 0xe97   : > { %v7391_v28 = vpop.eup %6469 }
 0xe98   : > { %v4459_v38 = vsel %vm1913_vm3, %v7391_v28, 0.0  ;;  %v3573_v36 = vrot.slane %v3565_v29, %v6789_v61  ;;  %v3580_v37 = vrot.slane %v3566_v44, %v6789_v61 }
 0xe99   : > { %v3222_v31 = vpop.permute.xlu1 %3221  ;;  %4475 = vadd.xlane.f32.xlu1 %v4474_v30  ;;  %4460 = vadd.xlane.f32.xlu0 %v4459_v38  ;;  %v3214_v33 = vpop.permute.xlu0 %3213 }
 0xe9a   : > { %v3581_v48 = vcombine.low %v3210_v19, %v3222_v31  ;;  %v3582_v49 = vcombine.high %v3210_v19, %v3222_v31  ;;  %v3361_v51 = vcombine.low %v3202_v27, %v3214_v33  ;;  %v3362_v32 = vcombine.high %v3202_v27, %v3214_v33 }
 0xe9c   : > { %v7397_v53 = vpop.eup %6471  ;;  %v3589_v5 = vrot.slane %v3581_v48, %v6789_v61  ;;  %v3596_v3 = vrot.slane %v3582_v49, %v6789_v61  ;;  %v3369_v35 = vrot.slane %v3361_v51, %v6789_v61  ;;  %v3376_v47 = vrot.slane %v3362_v32, %v6789_v61 }
 0xe9d   : > { %v3220_v39 = vpop.permute.xlu0 %3219  ;;  %v4465_v40 = vsel %vm1913_vm3, %v7397_v53, 0.0 }
 0xe9e   : > { %v3597_v55 = vcombine.low %v3573_v36, %v3589_v5  ;;  %v3598_v56 = vcombine.high %v3573_v36, %v3589_v5  ;;  %v3613_v57 = vcombine.low %v3580_v37, %v3596_v3  ;;  %v3614_v14 = vcombine.high %v3580_v37, %v3596_v3  ;;  %4466 = vadd.xlane.f32.xlu0 %v4465_v40 }
 0xe9f   : > { %v3377_v15 = vcombine.low %v3208_v12, %v3220_v39  ;;  %v3378_v41 = vcombine.high %v3208_v12, %v3220_v39 }
 0xea0   : > { %v7406_v59 = vpop.eup %6473  ;;  %v3605_v52 = vrot.slane %v3597_v55, %v6791_v6  ;;  %v3612_v60 = vrot.slane %v3598_v56, %v6791_v6  ;;  %v3621_v58 = vrot.slane %v3613_v57, %v6791_v6  ;;  %v3628_v46 = vrot.slane %v3614_v14, %v6791_v6 }
 0xea1   : > { %v3385_v62 = vrot.slane %v3377_v15, %v6789_v61  ;;  %v3392_v63 = vrot.slane %v3378_v41, %v6789_v61  ;;  %v4468_v0 = vsel %vm1913_vm3, %v7406_v59, 0.0 }
 0xea2   : > { %v3973_v1 = vcombine.low %v3605_v52, %v3612_v60  ;;  %v5701_v2 = vcombine.high %v3605_v52, %v3612_v60  ;;  %v3989_v8 = vcombine.low %v3621_v58, %v3628_v46  ;;  %v5702_v18 = vcombine.high %v3621_v58, %v3628_v46  ;;  %4469 = vadd.xlane.f32.xlu0 %v4468_v0 }
 0xea3   : > { %v3393_v9 = vcombine.low %v3369_v35, %v3385_v62  ;;  %v3394_v54 = vcombine.high %v3369_v35, %v3385_v62  ;;  %v3409_v11 = vcombine.low %v3376_v47, %v3392_v63  ;;  %v3410_v12 = vcombine.high %v3376_v47, %v3392_v63 }
 0xea4   : > { %v3980_v13 = vrot.slane %v3973_v1, %v6789_v61  ;;  %v3988_v43 = vrot.slane %v5701_v2, %v6789_v61  ;;  %v3996_v16 = vrot.slane %v3989_v8, %v6789_v61  ;;  %v4004_v17 = vrot.slane %v5702_v18, %v6789_v61 }
 0xea5   : > { %v3401_v19 = vrot.slane %v3393_v9, %v6791_v6  ;;  %v3408_v20 = vrot.slane %v3394_v54, %v6791_v6  ;;  %v3417_v21 = vrot.slane %v3409_v11, %v6791_v6  ;;  %v3424_v23 = vrot.slane %v3410_v12, %v6791_v6 }
 0xea6   : > { %v4005_v24 = vcombine.low %v3980_v13, %v3988_v43  ;;  %v4021_v25 = vcombine.low %v3996_v16, %v4004_v17  ;;  %v4006_v26 = vcombine.high %v3980_v13, %v3988_v43  ;;  %v4022_v27 = vcombine.high %v3996_v16, %v4004_v17 }
 0xea7   : > { %v3905_v29 = vcombine.low %v3401_v19, %v3408_v20  ;;  %v5699_v44 = vcombine.high %v3401_v19, %v3408_v20  ;;  %v3921_v30 = vcombine.low %v3417_v21, %v3424_v23  ;;  %v5700_v38 = vcombine.high %v3417_v21, %v3424_v23 }
 0xea8   : > { %v4020_v31 = vrot.slane %v4006_v26, %v6791_v6  ;;  %v4036_v33 = vrot.slane %v4022_v27, %v6791_v6  ;;  %v4013_v37 = vrot.slane %v4005_v24, %v6791_v6  ;;  %v4029_v5 = vrot.slane %v4021_v25, %v6791_v6 }
 0xea9   : > { %v3912_v48 = vrot.slane %v3905_v29, %v6789_v61  ;;  %v3920_v49 = vrot.slane %v5699_v44, %v6789_v61  ;;  %v3928_v51 = vrot.slane %v3921_v30, %v6789_v61  ;;  %v3936_v36 = vrot.slane %v5700_v38, %v6789_v61 }
 0xeaa   : > { %v4040_v3 = vcombine.high %v4020_v31, %v4036_v33  ;;  %v4037_v15 = vcombine.low %v4013_v37, %v4029_v5  ;;  %v4039_v41 = vcombine.low %v4020_v31, %v4036_v33  ;;  %v4038_v63 = vcombine.high %v4013_v37, %v4029_v5 }
 0xeab   : > { %v3937_v32 = vcombine.low %v3912_v48, %v3920_v49  ;;  %v3953_v39 = vcombine.low %v3928_v51, %v3936_v36  ;;  %v3938_v40 = vcombine.high %v3912_v48, %v3920_v49  ;;  %v3954_v55 = vcombine.high %v3928_v51, %v3936_v36 }
 0xead   : > { %v3945_v56 = vrot.slane %v3937_v32, %v6791_v6  ;;  %v3961_v57 = vrot.slane %v3953_v39, %v6791_v6  ;;  %v3952_v14 = vrot.slane %v3938_v40, %v6791_v6  ;;  %v3968_v35 = vrot.slane %v3954_v55, %v6791_v6 }
 0xeaf   : > { %v3969_v52 = vcombine.low %v3945_v56, %v3961_v57  ;;  %v3971_v60 = vcombine.low %v3952_v14, %v3968_v35  ;;  %v3970_v58 = vcombine.high %v3945_v56, %v3961_v57  ;;  %v3972_v46 = vcombine.high %v3952_v14, %v3968_v35 }
 0xeb1   : > { %v6287_v47 = vpack.c.bf16 %v4037_v15, %v3969_v52  ;;  %v6295_v62 = vpack.c.bf16 %v4039_v41, %v3971_v60  ;;  %v6299_v0 = vpack.c.bf16 %v4040_v3, %v3972_v46  ;;  %v6291_v1 = vpack.c.bf16 %v4038_v63, %v3970_v58 }
 0xeb3   : > { %6288 = vmatprep.subr.bf16.mxu1 %v6287_v47  ;;  %6296 = vmatprep.subr.bf16.mxu0 %v6295_v62 }
 0xeb4   : > { %6290 = vmatpush3.bf16.msra.mxu1 %v6287_v47  ;;  %6298 = vmatpush3.bf16.msra.mxu0 %v6295_v62 }
 0xeb5   : > { %6292 = vmatprep.subr.bf16.mxu1 %v6291_v1 }
 0xf1a   : > { %v4458_v2 = vpop.xlane.xlu1 %4457 }
 0xf1b   : > { %6475 = vrcp.f32 %v4458_v2  ;;  %v4455_v8 = vpop.xlane.xlu0 %4454 }
 0xf1c   : > { %6477 = vrcp.f32 %v4455_v8 }
 0xf1f   : > { %v4473_v18 = vpop.xlane.xlu0 %4472 }
 0xf20   : > { %6479 = vrcp.f32 %v4473_v18 }
 0xf22   : > { %v4464_v9 = vpop.xlane.xlu1 %4463 }
 0xf23   : > { %6481 = vrcp.f32 %v4464_v9 }
 0xf25   : > { %v6476_v54 = vpop.eup %6475 }
 0xf26   : > { %v6478_v11 = vpop.eup %6477  ;;  %v4461_v12 = vpop.xlane.xlu0 %4460  ;;  %v4486_v43 = vmul.f32 %v6476_v54, %v7373_v10 }
 0xf27   : > { %v4485_v13 = vmul.f32 %v6478_v11, %v7375_v7  ;;  %v4476_v16 = vpop.xlane.xlu1 %4475  ;;  %6483 = vrcp.f32 %v4461_v12 }
 0xf28   : > { %6485 = vrcp.f32 %v4476_v16 }
 0xf29   : > { %6078 = vmatprep.mubr.msk.f32.mxu1 %vm1913_vm3, %v4485_v13 }
 0xf2a   : > { %6079 = vmatmul.mubr.msk.f32.vlgmr.msra.gmra.mrb[24].mxu1 %vm1913_vm3, %v4486_v43  ;;  %v6480_v20 = vpop.eup %6479 }
 0xf2b   : > { %6294 = vmatpush3.bf16.msra.mxu1 %v6291_v1  ;;  %v4467_v17 = vpop.xlane.xlu0 %4466  ;;  %v4491_v25 = vmul.f32 %v6480_v20, %v7381_v45 }
 0xf2c   : > { %6487 = vrcp.f32 %v4467_v17  ;;  %6300 = vmatprep.subr.bf16.mxu1 %v6299_v0 }
 0xf2d   : > { %v6482_v21 = vpop.eup %6481 }
 0xf2e   : > { %v4488_v10 = vmul.f32 %v6482_v21, %v7385_v42 }
 0xf2f   : > { %v4470_v19 = vpop.xlane.xlu0 %4469 }
 0xf30   : > { %6489 = vrcp.f32 %v4470_v19 }
 0xf31   : > { %v6484_v23 = vpop.eup %6483 }
 0xf32   : > { %v4487_v7 = vmul.f32 %v6484_v23, %v7391_v28  ;;  %v6486_v24 = vpop.eup %6485 }
 0xf33   : > { %v4492_v29 = vmul.f32 %v6486_v24, %v7389_v4 }
 0xf34   : > { %6085 = vmatprep.mubr.msk.f32.mxu1 %vm1913_vm3, %v4487_v7 }
 0xf35   : > { %6086 = vmatmul.mubr.msk.f32.vlgmr.msra.gmra.mrb[26].mxu1 %vm1913_vm3, %v4488_v10 }
 0xf36   : > { %v6488_v26 = vpop.eup %6487  ;;  %6302 = vmatpush3.bf16.msra.mxu1 %v6299_v0  ;;  %6099 = vmatprep.mubr.msk.f32.mxu1 %vm1913_vm3, %v4491_v25 }
 0xf37   : > { %v4489_v27 = vmul.f32 %v6488_v26, %v7397_v53 }
 0xf39   : > { %6092 = vmatprep.mubr.msk.f32.mxu0 %vm1913_vm3, %v4489_v27  ;;  %6100 = vmatmul.mubr.msk.f32.vlgmr.msra.gmra.mrb[28].mxu1 %vm1913_vm3, %v4492_v29 }
 0xf3a   : > { %v6490_v28 = vpop.eup %6489 }
 0xf3b   : > { %v4490_v42 = vmul.f32 %v6490_v28, %v7406_v59 }
 0xf3d   : > { %6093 = vmatmul.mubr.msk.f32.vlgmr.msra.gmra.mrb[10].mxu0 %vm1913_vm3, %v4490_v42 }
 0xffd   : > { %v6080_v45 = vpop.f32.mrb[24].mxu1 }
 0xffe   : > { %v4565_v44 = vpop.f32.mrb[25].mxu1 }
0x1008   : > { %v6087_v30 = vpop.f32.mrb[26].mxu1 }
0x1009   : > { %v4646_v38 = vpop.f32.mrb[27].mxu1 }
0x100c   : > { %v6101_v31 = vpop.f32.mrb[28].mxu1 }
0x100d   : > { %v4901_v33 = vcombine.low %v6087_v30, %v6101_v31  ;;  %v4902_v48 = vcombine.high %v6087_v30, %v6101_v31  ;;  %v4808_v49 = vpop.f32.mrb[29].mxu1 }
0x100e   : > { %v4833_v53 = vcombine.low %v4646_v38, %v4808_v49  ;;  %v4834_v51 = vcombine.high %v4646_v38, %v4808_v49 }
0x100f   : > { %v4909_v59 = vrot.slane %v4901_v33, %v6789_v61  ;;  %v4916_v39 = vrot.slane %v4902_v48, %v6789_v61 }
0x1010   : > { %v6094_v4 = vpop.f32.mrb[10].mxu0  ;;  %v4841_v56 = vrot.slane %v4833_v53, %v6789_v61  ;;  %v4848_v57 = vrot.slane %v4834_v51, %v6789_v61 }
0x1011   : > { %v4885_v36 = vcombine.low %v6080_v45, %v6094_v4  ;;  %v4886_v37 = vcombine.high %v6080_v45, %v6094_v4  ;;  %v4727_v5 = vpop.f32.mrb[11].mxu0 }
0x1012   : > { %v4817_v3 = vcombine.low %v4565_v44, %v4727_v5  ;;  %v4818_v32 = vcombine.high %v4565_v44, %v4727_v5  ;;  %v5732_v5 = vld [vmem:[%s7655_s7 + $0x28] sm:$0xff] }
0x1013   : > { %v4893_v40 = vrot.slane %v4885_v36, %v6789_v61  ;;  %v4900_v55 = vrot.slane %v4886_v37, %v6789_v61 }
0x1014   : > { %v4825_v14 = vrot.slane %v4817_v3, %v6789_v61  ;;  %v4832_v35 = vrot.slane %v4818_v32, %v6789_v61  ;;  %v5733_v3 = vld [vmem:[%s7655_s7 + $0x30] sm:$0xff]  ;;  %v5734_v32 = vld [vmem:[%s7655_s7 + $0x38] sm:$0xff] }
0x1015   : > { %v4917_v15 = vcombine.low %v4893_v40, %v4909_v59  ;;  %v4918_v41 = vcombine.high %v4893_v40, %v4909_v59  ;;  %v4933_v52 = vcombine.low %v4900_v55, %v4916_v39  ;;  %v4934_v60 = vcombine.high %v4900_v55, %v4916_v39 }
0x1016   : > { %v4849_v58 = vcombine.low %v4825_v14, %v4841_v56  ;;  %v4850_v46 = vcombine.high %v4825_v14, %v4841_v56  ;;  %v4865_v47 = vcombine.low %v4832_v35, %v4848_v57  ;;  %v4866_v62 = vcombine.high %v4832_v35, %v4848_v57 }
0x1017   : > { %v4925_v63 = vrot.slane %v4917_v15, %v6791_v6  ;;  %v4932_v0 = vrot.slane %v4918_v41, %v6791_v6  ;;  %v4941_v1 = vrot.slane %v4933_v52, %v6791_v6  ;;  %v4948_v2 = vrot.slane %v4934_v60, %v6791_v6 }
0x1018   : > { %v4857_v8 = vrot.slane %v4849_v58, %v6791_v6  ;;  %v4864_v18 = vrot.slane %v4850_v46, %v6791_v6  ;;  %v4873_v9 = vrot.slane %v4865_v47, %v6791_v6  ;;  %v4880_v54 = vrot.slane %v4866_v62, %v6791_v6 }
0x1019   : > { %v5021_v11 = vcombine.low %v4925_v63, %v4932_v0  ;;  %v5729_v12 = vcombine.high %v4925_v63, %v4932_v0  ;;  %v5037_v13 = vcombine.low %v4941_v1, %v4948_v2  ;;  %v5730_v43 = vcombine.high %v4941_v1, %v4948_v2 }
0x101a   : > { %v4953_v16 = vcombine.low %v4857_v8, %v4864_v18  ;;  %v5727_v17 = vcombine.high %v4857_v8, %v4864_v18  ;;  %v4969_v19 = vcombine.low %v4873_v9, %v4880_v54  ;;  %v5728_v20 = vcombine.high %v4873_v9, %v4880_v54  ;;  %v5738_v9 = vld [vmem:[%s7656_s8 + $0x1] ss:$0 sm:$0xff] }
0x101b   : > { %v5028_v21 = vrot.slane %v5021_v11, %v6789_v61  ;;  %v5036_v23 = vrot.slane %v5729_v12, %v6789_v61  ;;  %v5044_v7 = vrot.slane %v5037_v13, %v6789_v61  ;;  %v5052_v10 = vrot.slane %v5730_v43, %v6789_v61 }
0x101c   : > { %v4960_v24 = vrot.slane %v4953_v16, %v6789_v61  ;;  %v4968_v25 = vrot.slane %v5727_v17, %v6789_v61  ;;  %v4976_v26 = vrot.slane %v4969_v19, %v6789_v61  ;;  %v4984_v27 = vrot.slane %v5728_v20, %v6789_v61  ;;  %v5731_v61 = vld [vmem:[%s7655_s7 + $0x20] sm:$0xff] }
0x101d   : > { %v5053_v29 = vcombine.low %v5028_v21, %v5036_v23  ;;  %v5069_v28 = vcombine.low %v5044_v7, %v5052_v10  ;;  %v5054_v42 = vcombine.high %v5028_v21, %v5036_v23  ;;  %v5070_v45 = vcombine.high %v5044_v7, %v5052_v10 }
0x101e   : > { %v4985_v44 = vcombine.low %v4960_v24, %v4968_v25  ;;  %v5001_v30 = vcombine.low %v4976_v26, %v4984_v27  ;;  %v4986_v38 = vcombine.high %v4960_v24, %v4968_v25  ;;  %v5002_v31 = vcombine.high %v4976_v26, %v4984_v27  ;;  %v5743_v26 = vld [vmem:[%s7659_s11 + $0x20] sm:$0xff]  ;;  %v5744_v27 = vld [vmem:[%s7659_s11 + $0x28] sm:$0xff] }
0x101f   : > { %v5061_v33 = vrot.slane %v5053_v29, %v6791_v6  ;;  %v5077_v48 = vrot.slane %v5069_v28, %v6791_v6  ;;  %v5068_v49 = vrot.slane %v5054_v42, %v6791_v6  ;;  %v5084_v53 = vrot.slane %v5070_v45, %v6791_v6  ;;  %v5745_v29 = vld [vmem:[%s7659_s11 + $0x30] sm:$0xff]  ;;  %v5746_v42 = vld [vmem:[%s7659_s11 + $0x38] sm:$0xff] }
0x1020   : > { %v4993_v51 = vrot.slane %v4985_v44, %v6791_v6  ;;  %v5009_v4 = vrot.slane %v5001_v30, %v6791_v6  ;;  %v5000_v36 = vrot.slane %v4986_v38, %v6791_v6  ;;  %v5016_v37 = vrot.slane %v5002_v31, %v6791_v6 }
0x1021   : > { %v5086_v59 = vcombine.high %v5061_v33, %v5077_v48  ;;  %v5087_v39 = vcombine.low %v5068_v49, %v5084_v53  ;;  %v5088_v40 = vcombine.high %v5068_v49, %v5084_v53  ;;  %v5085_v55 = vcombine.low %v5061_v33, %v5077_v48  ;;  %v5740_v53 = vld [vmem:[%s7657_s9 + $0x1] ss:$0 sm:$0xff] }
0x1022   : > { %v5018_v56 = vcombine.high %v4993_v51, %v5009_v4  ;;  %v5020_v57 = vcombine.high %v5000_v36, %v5016_v37  ;;  %v5019_v14 = vcombine.low %v5000_v36, %v5016_v37  ;;  %v5017_v6 = vcombine.low %v4993_v51, %v5009_v4  ;;  %v5742_v51 = vld [vmem:[%s7658_s10 + $0x1] ss:$0 sm:$0xff] }
0x1023   : > { %5093 = vrot.lane.b32.xlu1 %v5086_v59, %s7716_s23  ;;  %v6303_v35 = vpack.c.bf16 %v5732_v5, %v5731_v61  ;;  %v6307_v15 = vpack.c.bf16 %v5734_v32, %v5733_v3  ;;  %v6311_v28 = vpack.c.bf16 %v5744_v27, %v5743_v26  ;;  %v6315_v45 = vpack.c.bf16 %v5746_v42, %v5745_v29  ;;  %v5751_v59 = vld [vmem:[%s7661_s13 + $0x80] sm:$0xff] }
0x1024   : > { %5091 = vrot.lane.b32.xlu0 %v5018_v56, %s7716_s23  ;;  %v5754_v56 = vld [vmem:[%s7661_s13 + $0x98] sm:$0xff]  ;;  %s5528_s23 = sshll.u32 %s502_s1, 4  ;;  %s7608_s23 = int_to_ptr.vmem [resolvable:$true] %s5528_s23 }
0x1025   : > { %6304 = vmatprep.subr.bf16.mxu0 %v6303_v35  ;;  %6312 = vmatprep.subr.bf16.mxu1 %v6311_v28  ;;  %s6504_s22 = scalar_lea.vmem %s7608_s23, 64  ;;  %p6511_p0 = scmp.lt.s32.totalorder %s7608_s23, %s6509_s17 }
0x1026   : > { %6306 = vmatpush3.bf16.msra.mxu0 %v6303_v35  ;;  %6314 = vmatpush3.bf16.msra.mxu1 %v6311_v28  ;;  %p6505_p11 = scmp.ne.s32.totalorder %s7608_s23, %s6504_s22  ;;  %p6512_p1 = scmp.lt.s32.totalorder %s6510_s2, %s6504_s22 }
0x1027   : > { %5101 = vrot.lane.b32.xlu1 %v5087_v39, %s7717_s26  ;;  %6308 = vmatprep.subr.bf16.mxu0 %v6307_v15  ;;  %v5752_v39 = vld [vmem:[%s7661_s13 + $0x88] sm:$0xff] }
0x1028   : > { %5107 = vrot.lane.b32.xlu0 %v5020_v57, %s7718_s27  ;;  %6316 = vmatprep.subr.bf16.mxu1 %v6315_v45  ;;  %p6506_p12 = pnand %p6505_p11, %p6704_p5  ;;  %p6513_p2 = por %p6512_p1, %p6511_p0 }
0x102a   : > { %6310 = vmatpush3.bf16.msra.mxu0 %v6307_v15  ;;  %6318 = vmatpush3.bf16.msra.mxu1 %v6315_v45  ;;  %v5757_v15 = vld [vmem:[%s7661_s13 + $0xb0] sm:$0xff]  ;;  %p6507_p13 = pneg %p6506_p12 }
0x102b   : > { %5099 = vrot.lane.b32.xlu1 %v5019_v14, %s7717_s26  ;;  %v5755_v14 = vld [vmem:[%s7661_s13 + $0xa0] sm:$0xff] }
0x102c   : > { %p6514_p3 = pnand %p6513_p2, %p6507_p13 }
0x102f   : > { %5109 = vrot.lane.b32.xlu1 %v5088_v40, %s7718_s27  ;;  %v6319_v40 = vpack.c.bf16 %v5752_v39, %v5751_v59 }
0x1031   : > { %6320 = vmatprep.subr.bf16.mxu0 %v6319_v40 }
0x1095   : > { %v5094_v41 = vpop.permute.xlu1 %5093 }
0x1096   : > { %v5092_v52 = vpop.permute.xlu0 %5091  ;;  %v5114_v0 = vsel %vm1542_vm1, %v5085_v55, %v5094_v41  ;;  %v5753_v55 = vld [vmem:[%s7661_s13 + $0x90] sm:$0xff]  ;;  %v5758_v41 = vld [vmem:[%s7661_s13 + $0xb8] sm:$0xff] }
0x1097   : > { %v5113_v58 = vsel %vm1542_vm1, %v5017_v6, %v5092_v52  ;;  %v6323_v57 = vpack.c.bf16 %v5754_v56, %v5753_v55  ;;  %v5756_v6 = vld [vmem:[%s7661_s13 + $0xa8] sm:$0xff]  ;;  %v6331_v52 = vpack.c.bf16 %v5758_v41, %v5757_v15 }
0x1098   : > { %v6327_v35 = vpack.c.bf16 %v5756_v6, %v5755_v14 }
0x1099   : > { %v5102_v60 = vpop.permute.xlu1 %5101 }
0x109a   : > { %v5108_v47 = vpop.permute.xlu0 %5107  ;;  %v5116_v1 = vsel %vm1913_vm3, %v5114_v0, %v5102_v60  ;;  %v5759_v60 = vld [vmem:[%s7661_s13 + $0xc0] sm:$0xff] }
0x109d   : > { %v5100_v46 = vpop.permute.xlu1 %5099 }
0x109e   : > { %v5115_v62 = vsel %vm1913_vm3, %v5113_v58, %v5100_v46  ;;  %v5760_v58 = vld [vmem:[%s7661_s13 + $0xc8] sm:$0xff] }
0x109f   : > { %v5117_v63 = vsel %vm2626_vm4, %v5115_v62, %v5108_v47  ;;  %v6335_v46 = vpack.c.bf16 %v5760_v58, %v5759_v60  ;;  %v5761_v47 = vld [vmem:[%s7661_s13 + $0xd0] sm:$0xff]  ;;  %v5762_v62 = vld [vmem:[%s7661_s13 + $0xd8] sm:$0xff] }
0x10a0   : > { %6110 = vmatprep.mubr.msk.f32.mxu0 %vm520_vm0, %v5117_v63  ;;  %v5763_v63 = vld [vmem:[%s7661_s13 + $0xe0] sm:$0xff]  ;;  %v6339_v0 = vpack.c.bf16 %v5762_v62, %v5761_v47 }
0x10a1   : > { %v5110_v2 = vpop.permute.xlu1 %5109 }
0x10a2   : > { %v5118_v8 = vsel %vm2626_vm4, %v5116_v1, %v5110_v2  ;;  %v5764_v1 = vld [vmem:[%s7661_s13 + $0xe8] sm:$0xff] }
0x10a3   : > { %6111 = vmatmul.mubr.msk.f32.vlgmr.msra.gmra.mrb[12].mxu0 %vm520_vm0, %v5118_v8  ;;  %v6343_v2 = vpack.c.bf16 %v5764_v1, %v5763_v63  ;;  %v5765_v8 = vld [vmem:[%s7661_s13 + $0xf0] sm:$0xff] }
0x10a4   : > { %6322 = vmatpush3.bf16.msra.mxu0 %v6319_v40 }
0x10a5   : > { %6324 = vmatprep.subr.bf16.mxu0 %v6323_v57 }
0x10a8   : > { %6326 = vmatpush3.bf16.msra.mxu0 %v6323_v57 }
0x10a9   : > { %6328 = vmatprep.subr.bf16.mxu0 %v6327_v35 }
0x10ac   : > { %6330 = vmatpush3.bf16.msra.mxu0 %v6327_v35 }
0x10ad   : > { %6332 = vmatprep.subr.bf16.mxu0 %v6331_v52 }
0x10b0   : > { %6334 = vmatpush3.bf16.msra.mxu0 %v6331_v52 }
0x10b1   : > { %6336 = vmatprep.subr.bf16.mxu0 %v6335_v46 }
0x10b4   : > { %6338 = vmatpush3.bf16.msra.mxu0 %v6335_v46 }
0x10b5   : > { %6340 = vmatprep.subr.bf16.mxu0 %v6339_v0 }
0x10b8   : > { %6342 = vmatpush3.bf16.msra.mxu0 %v6339_v0  ;;  %v5768_v0 = vld [vmem:[%s7662_s14 + $0x1] ss:$0 sm:$0xff] }
0x10b9   : > { %6344 = vmatprep.subr.bf16.mxu0 %v6343_v2 }
0x10bc   : > { %6346 = vmatpush3.bf16.msra.mxu0 %v6343_v2 }
0x1176   : > { %v6112_v18 = vpop.f32.mrb[12].mxu0 }
0x1177   : > { %v5206_v54 = vadd.f32 %v6112_v18, %v7171_v50  ;;  %v5196_v11 = vpop.f32.mrb[13].mxu0  ;;  %v5766_v18 = vld [vmem:[%s7661_s13 + $0xf8] sm:$0xff] }
0x1178   : > { %v5205_v12 = vadd.f32 %v5196_v11, %v7173_v34 }
0x1179   : > { %v7516_v13 = vadd.f32 %v5738_v9, %v5206_v54  ;;  %v5748_v54 = vld [vmem:[%s7660_s12 + $0x1] ss:$0 sm:$0xff] }
0x117a   : > { %v5215_v43 = vadd.f32 %v5738_v9, %v5205_v12  ;;  %v6347_v9 = vpack.c.bf16 %v5766_v18, %v5765_v8 }
0x117b   : > { %v5220_v16 = vsel %vm520_vm0, %v7516_v13, 0.0 }
0x117c   : > { %5221 = vadd.xlane.f32.xlu1 %v5220_v16  ;;  %v5217_v17 = vsel %vm520_vm0, %v5215_v43, 0.0  ;;  %6348 = vmatprep.subr.bf16.mxu0 %v6347_v9 }
0x117d   : > { %5218 = vadd.xlane.f32.xlu0 %v5217_v17  ;;  %6350 = vmatpush3.bf16.msra.mxu0 %v6347_v9 }
0x1209   : > { %v5222_v19 = vpop.xlane.xlu1 %5221 }
0x120a   : > { %v5224_v20 = vmul.f32 0.03125, %v5222_v19  ;;  %v5219_v21 = vpop.xlane.xlu0 %5218 }
0x120b   : > { %v5223_v23 = vmul.f32 0.03125, %v5219_v21 }
0x120c   : > { %v5226_v7 = vsub.f32 %v7516_v13, %v5224_v20 }
0x120d   : > { %v5225_v50 = vsub.f32 %v5215_v43, %v5223_v23 }
0x120e   : > { %v5228_v24 = vmul.f32 %v5226_v7, %v5226_v7 }
0x120f   : > { %v5227_v10 = vmul.f32 %v5225_v50, %v5225_v50 }
0x1210   : > { %v5232_v25 = vsel %vm520_vm0, %v5228_v24, 0.0 }
0x1211   : > { %v5229_v34 = vsel %vm520_vm0, %v5227_v10, 0.0 }
0x1212   : > { %5230 = vadd.xlane.f32.xlu0 %v5229_v34 }
0x1216   : > { %5233 = vadd.xlane.f32.xlu0 %v5232_v25 }
0x129f   : > { %v5231_v44 = vpop.xlane.xlu0 %5230 }
0x12a0   : > { %v5235_v30 = vmul.f32 0.03125, %v5231_v44 }
0x12a2   : > { %v5237_v38 = vadd.f32 1e-06, %v5235_v30 }
0x12a3   : > { %v5234_v31 = vpop.xlane.xlu0 %5233 }
0x12a4   : > { %6491 = vrsqrt.f32 %v5237_v38  ;;  %v5236_v33 = vmul.f32 0.03125, %v5234_v31 }
0x12a6   : > { %v5238_v48 = vadd.f32 1e-06, %v5236_v33 }
0x12a8   : > { %6493 = vrsqrt.f32 %v5238_v48 }
0x12ae   : > { %v6492_v49 = vpop.eup %6491 }
0x12af   : > { %v5241_v61 = vmul.f32 %v6492_v49, %v5225_v50 }
0x12b1   : > { %v5251_v4 = vmul.f32 %v5740_v53, %v5241_v61 }
0x12b2   : > { %v6494_v36 = vpop.eup %6493 }
0x12b3   : > { %v5242_v37 = vmul.f32 %v6494_v36, %v5226_v7  ;;  %v5261_v5 = vadd.f32 %v5742_v51, %v5251_v4 }
0x12b5   : > { %v5252_v3 = vmul.f32 %v5740_v53, %v5242_v37  ;;  %6121 = vmatprep.mubr.msk.f32.mxu1 %vm520_vm0, %v5261_v5 }
0x12b7   : > { %v5262_v32 = vadd.f32 %v5742_v51, %v5252_v3 }
0x12b9   : > { %6122 = vmatmul.mubr.msk.f32.vlgmr.msra.gmra.mrb[30].mxu1 %vm520_vm0, %v5262_v32 }
0x138c   : > { %v6123_v11 = vpop.f32.mrb[30].mxu1 }
0x138d   : > { %v5354_v12 = vadd.f32 %v6123_v11, %v5748_v54  ;;  %v5348_v43 = vpop.f32.mrb[31].mxu1 }
0x138e   : > { %v5349_v16 = vadd.f32 %v5748_v54, %v5348_v43 }
0x138f   : > { %v5360_v17 = vmul.f32 0.70710677, %v5354_v12  ;;  %v5358_v46 = vmul.f32 0.5, %v5354_v12 }
0x1390   : > { %v5359_v19 = vmul.f32 0.70710677, %v5349_v16  ;;  %v5357_v60 = vmul.f32 0.5, %v5349_v16 }
0x1391   : > { %v5366_v20 = vand.u32 2147483647, %v5360_v17  ;;  %vm5362_vm7 = vcmp.ge.f32.partialorder %v5360_v17, 0.0 }
0x1392   : > { %v5365_v21 = vand.u32 2147483647, %v5359_v19  ;;  %vm5361_vm8 = vcmp.ge.f32.partialorder %v5359_v19, 0.0  ;;  %v5364_v14 = vsel %vm5362_vm7, 1.0, %v6584_v22 }
0x1393   : > { %v5368_v23 = vmul.f32 0.3275911, %v5366_v20  ;;  %v5394_v34 = vsub.f32 0.0, %v5366_v20  ;;  %v5363_v15 = vsel %vm5361_vm8, 1.0, %v6584_v22 }
0x1394   : > { %v5367_v7 = vmul.f32 0.3275911, %v5365_v21  ;;  %v5393_v24 = vsub.f32 0.0, %v5365_v21 }
0x1395   : > { %v5370_v50 = vadd.f32 1.0, %v5368_v23  ;;  %v5396_v26 = vmul.f32 %v5394_v34, %v5366_v20 }
0x1396   : > { %v5369_v10 = vadd.f32 1.0, %v5367_v7  ;;  %v5395_v28 = vmul.f32 %v5393_v24, %v5365_v21 }
0x1397   : > { %6495 = vrcp.f32 %v5370_v50  ;;  %v5399_v44 = vmul.f32 1.442695, %v5396_v26 }
0x1398   : > { %6497 = vrcp.f32 %v5369_v10  ;;  %v5397_v31 = vmul.f32 1.442695, %v5395_v28 }
0x1399   : > { %6499 = vpow2.f32 %v5399_v44 }
0x139a   : > { %6501 = vpow2.f32 %v5397_v31 }
0x13a1   : > { %v6496_v25 = vpop.eup %6495 }
0x13a2   : > { %v6498_v27 = vpop.eup %6497  ;;  %v5376_v29 = vmul.f32 1.0614054, %v6496_v25 }
0x13a3   : > { %v5375_v42 = vmul.f32 1.0614054, %v6498_v27  ;;  %v6500_v59 = vpop.eup %6499 }
0x13a4   : > { %v5378_v45 = vadd.f32 -1.4531521, %v5376_v29  ;;  %v6502_v40 = vpop.eup %6501 }
0x13a5   : > { %v5377_v30 = vadd.f32 -1.4531521, %v5375_v42 }
0x13a6   : > { %v5380_v38 = vmul.f32 %v6496_v25, %v5378_v45 }
0x13a7   : > { %v5379_v33 = vmul.f32 %v6498_v27, %v5377_v30 }
0x13a8   : > { %v5382_v48 = vadd.f32 1.4214138, %v5380_v38 }
0x13a9   : > { %v5381_v49 = vadd.f32 1.4214138, %v5379_v33 }
0x13aa   : > { %v5384_v53 = vmul.f32 %v6496_v25, %v5382_v48 }
0x13ab   : > { %v5383_v61 = vmul.f32 %v6498_v27, %v5381_v49 }
0x13ac   : > { %v5386_v51 = vadd.f32 -0.28449672, %v5384_v53 }
0x13ad   : > { %v5385_v4 = vadd.f32 -0.28449672, %v5383_v61 }
0x13ae   : > { %v5388_v36 = vmul.f32 %v6496_v25, %v5386_v51 }
0x13af   : > { %v5387_v37 = vmul.f32 %v6498_v27, %v5385_v4 }
0x13b0   : > { %v5390_v5 = vadd.f32 0.2548296, %v5388_v36 }
0x13b1   : > { %v5389_v3 = vadd.f32 0.2548296, %v5387_v37 }
0x13b2   : > { %v5392_v32 = vmul.f32 %v6496_v25, %v5390_v5 }
0x13b3   : > { %v5391_v39 = vmul.f32 %v6498_v27, %v5389_v3 }
0x13b4   : > { %v5402_v55 = vmul.f32 %v6500_v59, %v5392_v32 }
0x13b5   : > { %v5401_v56 = vmul.f32 %v6502_v40, %v5391_v39 }
0x13b6   : > { %v5404_v57 = vsub.f32 1.0, %v5402_v55 }
0x13b7   : > { %v5403_v6 = vsub.f32 1.0, %v5401_v56 }
0x13b8   : > { %v5406_v35 = vmul.f32 %v5404_v57, %v5364_v14 }
0x13b9   : > { %v5405_v41 = vmul.f32 %v5403_v6, %v5363_v15 }
0x13ba   : > { %v5408_v52 = vadd.f32 1.0, %v5406_v35 }
0x13bb   : > { %v5407_v58 = vadd.f32 1.0, %v5405_v41 }
0x13bc   : > { %v5410_v62 = vmul.f32 %v5408_v52, %v5358_v46 }
0x13bd   : > { %v5409_v47 = vmul.f32 %v5407_v58, %v5357_v60 }
0x13bf   : > { %6156 = vmatprep.mubr.f32.mxu0 %v5409_v47 }
0x13c0   : > { %6157 = vmatmul.mubr.f32.vlgmr.msra.gmra.mrb[14].mxu0 %v5410_v62 }
0x1493   : > { %v6158_v63 = vpop.f32.mrb[14].mxu0 }
0x1494   : > { %v5502_v22 = vadd.f32 %v6158_v63, %v7516_v13  ;;  %v5494_v1 = vpop.f32.mrb[15].mxu0 }
0x1496   : > { %v5511_v2 = vadd.f32 %v5768_v0, %v5502_v22 }
0x1498   : > { %5513 = vst.msk [vmem:[%s502_s1 - $0x1] sm:$0x1e] %vm5512_vm9, %v5511_v2 }
0x1499   : > { %6517 = shalt.err (!%p6514_p3)
}
0x149a   : > { %s6518_s16 = scalar_lea.hbm %s7606_s25, 64  ;;  %s6522_s26 = scalar_lea.hbm %s7663_s15, 128 }
0x149b   : > { %p6519_p4 = scmp.ne.s32.totalorder %s7606_s25, %s6518_s16  ;;  %p6523_p9 = scmp.lt.u32.totalorder %s7606_s25, %s7663_s15 }
0x149c   : > { %p6524_p10 = scmp.lt.u32.totalorder %s6522_s26, %s6518_s16  ;;  %p6526_p12 = scmp.lt.u32.totalorder %s6518_s16, %s7606_s25 }
0x149d   : > { %p6520_p7 = pnand %p6519_p4, %p6704_p5 }
0x149e   : > { %p6525_p11 = por %p6524_p10, %p6523_p9 }
0x149f   : > { %p6521_p8 = pneg %p6520_p7 }
0x14a0   : > { %p6527_p13 = por %p6526_p12, %p6525_p11 }
0x14a2   : > { %p6528_p0 = pnand %p6527_p13, %p6521_p8 }
0x14a4   : > { %6531 = shalt.err (!%p6528_p0)
}
0x14a5   : > { %6351 = dma.vmem_to_hbm [thread:$0]  (%p6704_p5), %s7608_s23, 64, %s7606_s25, %s5515_s20  }
0x14a6 PF: > { %p6357_p1 = scmp.ge.s32.totalorder %s6566_s21, 2  ;;  %s5540_s2 = sand.u32 1, %s6554_s18  }
0x14a7   : > { %s5541_s22 = scalar_lea.sflag [#allocation3], %s5540_s2 }
0x14a8   : > { %p6354_p2 = pnand %p6357_p1, %p6708_p6 }
0x14aa   : > { %6549 = dma.done.wait (!%p6354_p2), %s5541_s22, 64  }
0x14ab   : > { %6551 = vsyncadd (!%p6354_p2), %s5541_s22, 4294967232  ;;  %s7719_s17 = sld [smem:[#allocation5_spill]]  ;;  %s7720_s20 = sld [smem:[#allocation6_spill]] }
0x14ac   : > { %p25_p3 = scmp.ge.s32.totalorder %s6691_s24, 4   ;;  %s7721_s18 = smov %s6558_s19 }
0x14ad   : > { %s7723_s21 = smov %s6691_s24 }
0x14ae   :  { %27 = sbr.rel (!%p25_p3) target bundleno = 7 (0x7), region = 130 }
0x14b1   : > { %s7722_s19 = smov %s7719_s17 }
0x14b5   :  { %5546 = vsyncpa [#allocation3], 1 }
0x14b6   :  { %5548 = vsyncpa [#allocation3 + $0x1], 1 }

</bundles_post_ra>
